<compile_context>
chip_gen: v7x
topology: tpu7x:2x2x1
jax: 0.10.0
libtpu: 0.0.40
codegen_flags: <defaults>
</compile_context>

<pallas_src>
import functools
import math

import jax
import jax.numpy as jnp
from jax.experimental import pallas as pl
from jax.experimental.pallas import tpu as pltpu


def _round_up(x, m):
    return ((x + m - 1) // m) * m


def _cdiv(a, b):
    return (a + b - 1) // b


# ----------------------------- Sinkhorn kernel ------------------------------
def _sinkhorn_kernel(n_iter, la_ref, p_ref):
    x = la_ref[...]  # (R, F, F) float32 — all replicas in one grid step

    # n_iter is a compile-time constant -> statically unrolled (LLO-visible).
    for _ in range(n_iter):
        # row normalization: x -= logsumexp(x, axis=-1, keepdims=True)
        m = jnp.max(x, axis=-1, keepdims=True)
        x = x - (m + jnp.log(jnp.sum(jnp.exp(x - m), axis=-1, keepdims=True)))
        # column normalization: x -= logsumexp(x, axis=-2, keepdims=True)
        m = jnp.max(x, axis=-2, keepdims=True)
        x = x - (m + jnp.log(jnp.sum(jnp.exp(x - m), axis=-2, keepdims=True)))

    p_ref[...] = jnp.exp(x)


def log_sinkhorn_pallas(log_alpha, n_iter):
    """log_alpha: (R, F, F) -> close-to-doubly-stochastic p: (R, F, F) f32."""
    R, F, _ = log_alpha.shape
    return pl.pallas_call(
        functools.partial(_sinkhorn_kernel, n_iter),
        out_shape=jax.ShapeDtypeStruct((R, F, F), jnp.float32),
        grid_spec=pltpu.PrefetchScalarGridSpec(
            num_scalar_prefetch=0,
            grid=(1,),
            in_specs=[pl.BlockSpec((R, F, F), lambda i: (0, 0, 0))],
            out_specs=pl.BlockSpec((R, F, F), lambda i: (0, 0, 0)),
        ),
        compiler_params=pltpu.CompilerParams(dimension_semantics=("arbitrary",)),
    )(log_alpha.astype(jnp.float32))


# ----------------------- Permutation application kernel ---------------------
def _apply_perm_kernel(rf, p_ref, m_ref, x_ref, o_ref):
    # p_ref: (R*F, F) resident, X's dtype; p_ref[r*F + f, m] = p[r, f, m]
    # m_ref: (R, 1, TN) resident 0/1 mask; mask[r_i, 0, n] = (n % R == r_i).
    #        Block-invariant: TN % R == 0, so every lane tile starts ≡ 0 (mod R).
    # x_ref/o_ref: (1, F, TN) in X's native (B, F, L*C*R) layout — no transposes.
    x = x_ref[...]                                        # (1, F, TN)
    tn = x.shape[-1]
    # Single broadcast multiply builds the masked operand:
    #   xr[r*F + f, n] = x[f, n] * (n % R == r)
    xr = (x * m_ref[...]).reshape(rf, tn)                 # (R*F, TN)
    # out[m, n] = sum_{r,f} p[r, f, m] * xr[r*F + f, n]   (one K = R*F matmul)
    out = jax.lax.dot_general(
        p_ref[...], xr, (((0,), (0,)), ((), ())),
        preferred_element_type=jnp.float32,
    )                                                     # (F, TN) f32
    o_ref[0] = out.astype(o_ref.dtype)


def _pick_lane_tile(n2, b, r, f, rf, esize):
    """Lane tile for the flattened (L, C, R) axis.

    Constraints / targets:
      * multiple of lcm(128, r): lane-dense stores and block-invariant replica mask
      * ~1 MiB-class x blocks (amortize the ~0.35 us per-grid-step overhead)
      * explicit VMEM budget including the (RF, tn) masked operand (v7x: 64 MiB)
      * at least ~4 total grid steps so v7x's two TensorCores both get work
    """
    step = (128 * r) // math.gcd(128, r)          # lcm(128, r)
    n_ceil = _round_up(n2, step)

    # ~1 MiB of x per block.
    target = max(step, ((1 << 20) // (f * esize) // step) * step)
    # Per-lane VMEM: double-buffered x in+out blocks, (RF, tn) masked operand,
    # (F, tn) f32 matmul result, (R, tn) mask.  Budget well under v7x's 64 MiB.
    per_lane = esize * (4 * f + rf + r) + 4 * f
    cap = max(step, ((20 << 20) // per_lane // step) * step)

    tn = min(n_ceil, target, cap)
    tn = max(step, (tn // step) * step)
    # Keep >= 4 grid steps total so both v7x TensorCores get work.
    while tn > step and b * _cdiv(n_ceil, tn) < 4:
        tn = max(step, ((tn // 2) // step) * step)
    return tn


def apply_permutation_pallas(p, x2, r):
    """p: (R, F, F) f32 doubly-stochastic; x2: (B, F, L*C*R) -> same shape/dtype."""
    B, F, N2 = x2.shape
    R = r
    RF = R * F
    esize = jnp.dtype(x2.dtype).itemsize

    tn = _pick_lane_tile(N2, B, R, F, RF, esize)
    n2p = _round_up(N2, tn)
    if n2p != N2:
        # One-time zero pad keeps every block full width (unmasked vst stores,
        # no ragged final block, no OOB reads).
        x2 = jnp.pad(x2, ((0, 0), (0, 0), (0, n2p - N2)))
    grid = (B, n2p // tn)

    # Hoisted once out of the kernel: p quantized to X's dtype (for bf16
    # activations this costs ~1e-3 relative error vs an all-f32 reference).
    p_flat = p.reshape(RF, F).astype(x2.dtype)
    # 0/1 replica mask, identical for every lane tile because tn % R == 0.
    mask = (jax.lax.broadcasted_iota(jnp.int32, (R, 1, tn), 2) % R
            == jax.lax.broadcasted_iota(jnp.int32, (R, 1, tn), 0)).astype(x2.dtype)

    y = pl.pallas_call(
        functools.partial(_apply_perm_kernel, RF),
        out_shape=jax.ShapeDtypeStruct((B, F, n2p), x2.dtype),
        grid_spec=pltpu.PrefetchScalarGridSpec(
            num_scalar_prefetch=0,
            grid=grid,
            in_specs=[
                pl.BlockSpec((RF, F), lambda b, n: (0, 0)),      # resident p
                pl.BlockSpec((R, 1, tn), lambda b, n: (0, 0, 0)),  # resident mask
                pl.BlockSpec((1, F, tn), lambda b, n: (b, 0, n)),
            ],
            out_specs=pl.BlockSpec((1, F, tn), lambda b, n: (b, 0, n)),
        ),
        compiler_params=pltpu.CompilerParams(
            dimension_semantics=("parallel", "parallel"),
            vmem_limit_bytes=32 * 1024 * 1024,
        ),
    )(p_flat, mask, x2)

    return y[:, :, :N2] if n2p != N2 else y


# ------------------------------- Forward glue --------------------------------
def permutation_layer_forward(X, perm_seed, noise_key, tau=1.0, iterations=20):
    """X: (B, F, L, C, R), perm_seed: (F, F, R). Returns ((B,F,L,C,R), p)."""
    B, F, L, C, R = X.shape
    eps = 1e-20
    # sample_gumbel on perm_seed.permute(2,0,1) -> shape (R, F, F)
    u = jax.random.uniform(noise_key, (R, F, F), dtype=jnp.float32)
    gumbel = -jnp.log(-jnp.log(u + eps) + eps)
    log_alpha = (jnp.transpose(perm_seed, (2, 0, 1)).astype(jnp.float32) + gumbel) / tau

    p = log_sinkhorn_pallas(log_alpha, iterations)        # (R, F, F) f32

    # Native-layout apply: no activation transposes, only free reshapes.
    x2 = X.reshape(B, F, L * C * R)                       # (B, F, N2)
    y2 = apply_permutation_pallas(p, x2, R)               # (B, F, N2), dtype of X
    return y2.reshape(B, F, L, C, R), p


# ------------------------------- References ----------------------------------
def reference_forward(X, p):
    X_perm = jnp.transpose(X, (4, 1, 0, 2, 3))            # (R, F, B, L, C)
    Y = jnp.einsum("rfm,rfblc->rmblc", p, X_perm)
    return jnp.transpose(Y, (2, 1, 3, 4, 0))


def reference_sinkhorn(log_alpha, n_iter):
    x = log_alpha
    for _ in range(n_iter):
        x = x - jax.scipy.special.logsumexp(x, axis=-1, keepdims=True)
        x = x - jax.scipy.special.logsumexp(x, axis=-2, keepdims=True)
    return jnp.exp(x)


if __name__ == "__main__":
    # Small shapes consistent with forward(): X is (B, F, L, C, R)
    B, F, L, C, R = 2, 8, 16, 16, 4
    iterations = 20
    tau = 1.0

    key = jax.random.PRNGKey(0)
    k_seed, k_x, k_noise = jax.random.split(key, 3)

    # deterministic parameter init (torch.rand -> uniform [0,1))
    perm_seed = jax.random.uniform(k_seed, (F, F, R), dtype=jnp.float32)
    X = jax.random.normal(k_x, (B, F, L, C, R), dtype=jnp.float32)

    fwd = jax.jit(permutation_layer_forward, static_argnames=("tau", "iterations"))
    out, p = fwd(X, perm_seed, k_noise, tau=tau, iterations=iterations)
    out = jax.block_until_ready(out)

    # correctness check against pure-JAX reference
    eps = 1e-20
    u = jax.random.uniform(k_noise, (R, F, F), dtype=jnp.float32)
    gumbel = -jnp.log(-jnp.log(u + eps) + eps)
    log_alpha = (jnp.transpose(perm_seed, (2, 0, 1)) + gumbel) / tau
    p_ref = reference_sinkhorn(log_alpha, iterations)
    out_ref = reference_forward(X, p_ref)

    assert out.shape == X.shape
    assert out.dtype == X.dtype
    assert jnp.allclose(p, p_ref, atol=1e-5, rtol=1e-5)
    assert jnp.allclose(out, out_ref, atol=1e-5, rtol=1e-5)

    print("KERNEL_OK")
</pallas_src>

<mosaic_0001>
module attributes {stable_mosaic.version = 11 : i64} {
  func.func @_sinkhorn_kernel(%arg0: i32, %arg1: memref<4x8x8xf32, #tpu.memory_space<vmem>>, %arg2: memref<4x8x8xf32, #tpu.memory_space<vmem>>) attributes {dimension_semantics = [#tpu.dimension_semantics<arbitrary>], iteration_bounds = array<i64: 1>, scalar_prefetch = 0 : i64, scratch_operands = 0 : i64, tpu.core_type = #tpu.core_type<tc>, window_params = [{pipeline_mode = #tpu.pipeline_mode<synchronous>, transform_indices = @transform_0, window_bounds = array<i64: 4, 8, 8>}, {pipeline_mode = #tpu.pipeline_mode<synchronous>, transform_indices = @transform_1, window_bounds = array<i64: 4, 8, 8>}]} {
    %c0 = arith.constant 0 : index
    %c0_0 = arith.constant 0 : index
    %c0_1 = arith.constant 0 : index
    %0 = vector.load %arg1[%c0, %c0_0, %c0_1] : memref<4x8x8xf32, #tpu.memory_space<vmem>>, vector<4x8x8xf32>
    %cst = arith.constant dense<0xFF800000> : vector<4x8xf32>
    %1 = vector.multi_reduction <maximumf>, %0, %cst [2] : vector<4x8x8xf32> to vector<4x8xf32>
    %2 = vector.shape_cast %1 : vector<4x8xf32> to vector<4x8x1xf32>
    %3 = vector.broadcast %2 : vector<4x8x1xf32> to vector<4x8x8xf32>
    %4 = arith.subf %0, %3 : vector<4x8x8xf32>
    %5 = math.exp %4 : vector<4x8x8xf32>
    %cst_2 = arith.constant dense<0.000000e+00> : vector<4x8xf32>
    %6 = vector.multi_reduction <add>, %5, %cst_2 [2] : vector<4x8x8xf32> to vector<4x8xf32>
    %7 = vector.shape_cast %6 : vector<4x8xf32> to vector<4x8x1xf32>
    %8 = math.log %7 : vector<4x8x1xf32>
    %9 = arith.addf %2, %8 : vector<4x8x1xf32>
    %10 = vector.broadcast %9 : vector<4x8x1xf32> to vector<4x8x8xf32>
    %11 = arith.subf %0, %10 : vector<4x8x8xf32>
    %cst_3 = arith.constant dense<0xFF800000> : vector<4x8xf32>
    %12 = vector.multi_reduction <maximumf>, %11, %cst_3 [1] : vector<4x8x8xf32> to vector<4x8xf32>
    %13 = vector.shape_cast %12 : vector<4x8xf32> to vector<4x1x8xf32>
    %14 = vector.broadcast %13 : vector<4x1x8xf32> to vector<4x8x8xf32>
    %15 = arith.subf %11, %14 : vector<4x8x8xf32>
    %16 = math.exp %15 : vector<4x8x8xf32>
    %cst_4 = arith.constant dense<0.000000e+00> : vector<4x8xf32>
    %17 = vector.multi_reduction <add>, %16, %cst_4 [1] : vector<4x8x8xf32> to vector<4x8xf32>
    %18 = vector.shape_cast %17 : vector<4x8xf32> to vector<4x1x8xf32>
    %19 = math.log %18 : vector<4x1x8xf32>
    %20 = arith.addf %13, %19 : vector<4x1x8xf32>
    %21 = vector.broadcast %20 : vector<4x1x8xf32> to vector<4x8x8xf32>
    %22 = arith.subf %11, %21 : vector<4x8x8xf32>
    %cst_5 = arith.constant dense<0xFF800000> : vector<4x8xf32>
    %23 = vector.multi_reduction <maximumf>, %22, %cst_5 [2] : vector<4x8x8xf32> to vector<4x8xf32>
    %24 = vector.shape_cast %23 : vector<4x8xf32> to vector<4x8x1xf32>
    %25 = vector.broadcast %24 : vector<4x8x1xf32> to vector<4x8x8xf32>
    %26 = arith.subf %22, %25 : vector<4x8x8xf32>
    %27 = math.exp %26 : vector<4x8x8xf32>
    %cst_6 = arith.constant dense<0.000000e+00> : vector<4x8xf32>
    %28 = vector.multi_reduction <add>, %27, %cst_6 [2] : vector<4x8x8xf32> to vector<4x8xf32>
    %29 = vector.shape_cast %28 : vector<4x8xf32> to vector<4x8x1xf32>
    %30 = math.log %29 : vector<4x8x1xf32>
    %31 = arith.addf %24, %30 : vector<4x8x1xf32>
    %32 = vector.broadcast %31 : vector<4x8x1xf32> to vector<4x8x8xf32>
    %33 = arith.subf %22, %32 : vector<4x8x8xf32>
    %cst_7 = arith.constant dense<0xFF800000> : vector<4x8xf32>
    %34 = vector.multi_reduction <maximumf>, %33, %cst_7 [1] : vector<4x8x8xf32> to vector<4x8xf32>
    %35 = vector.shape_cast %34 : vector<4x8xf32> to vector<4x1x8xf32>
    %36 = vector.broadcast %35 : vector<4x1x8xf32> to vector<4x8x8xf32>
    %37 = arith.subf %33, %36 : vector<4x8x8xf32>
    %38 = math.exp %37 : vector<4x8x8xf32>
    %cst_8 = arith.constant dense<0.000000e+00> : vector<4x8xf32>
    %39 = vector.multi_reduction <add>, %38, %cst_8 [1] : vector<4x8x8xf32> to vector<4x8xf32>
    %40 = vector.shape_cast %39 : vector<4x8xf32> to vector<4x1x8xf32>
    %41 = math.log %40 : vector<4x1x8xf32>
    %42 = arith.addf %35, %41 : vector<4x1x8xf32>
    %43 = vector.broadcast %42 : vector<4x1x8xf32> to vector<4x8x8xf32>
    %44 = arith.subf %33, %43 : vector<4x8x8xf32>
    %cst_9 = arith.constant dense<0xFF800000> : vector<4x8xf32>
    %45 = vector.multi_reduction <maximumf>, %44, %cst_9 [2] : vector<4x8x8xf32> to vector<4x8xf32>
    %46 = vector.shape_cast %45 : vector<4x8xf32> to vector<4x8x1xf32>
    %47 = vector.broadcast %46 : vector<4x8x1xf32> to vector<4x8x8xf32>
    %48 = arith.subf %44, %47 : vector<4x8x8xf32>
    %49 = math.exp %48 : vector<4x8x8xf32>
    %cst_10 = arith.constant dense<0.000000e+00> : vector<4x8xf32>
    %50 = vector.multi_reduction <add>, %49, %cst_10 [2] : vector<4x8x8xf32> to vector<4x8xf32>
    %51 = vector.shape_cast %50 : vector<4x8xf32> to vector<4x8x1xf32>
    %52 = math.log %51 : vector<4x8x1xf32>
    %53 = arith.addf %46, %52 : vector<4x8x1xf32>
    %54 = vector.broadcast %53 : vector<4x8x1xf32> to vector<4x8x8xf32>
    %55 = arith.subf %44, %54 : vector<4x8x8xf32>
    %cst_11 = arith.constant dense<0xFF800000> : vector<4x8xf32>
    %56 = vector.multi_reduction <maximumf>, %55, %cst_11 [1] : vector<4x8x8xf32> to vector<4x8xf32>
    %57 = vector.shape_cast %56 : vector<4x8xf32> to vector<4x1x8xf32>
    %58 = vector.broadcast %57 : vector<4x1x8xf32> to vector<4x8x8xf32>
    %59 = arith.subf %55, %58 : vector<4x8x8xf32>
    %60 = math.exp %59 : vector<4x8x8xf32>
    %cst_12 = arith.constant dense<0.000000e+00> : vector<4x8xf32>
    %61 = vector.multi_reduction <add>, %60, %cst_12 [1] : vector<4x8x8xf32> to vector<4x8xf32>
    %62 = vector.shape_cast %61 : vector<4x8xf32> to vector<4x1x8xf32>
    %63 = math.log %62 : vector<4x1x8xf32>
    %64 = arith.addf %57, %63 : vector<4x1x8xf32>
    %65 = vector.broadcast %64 : vector<4x1x8xf32> to vector<4x8x8xf32>
    %66 = arith.subf %55, %65 : vector<4x8x8xf32>
    %cst_13 = arith.constant dense<0xFF800000> : vector<4x8xf32>
    %67 = vector.multi_reduction <maximumf>, %66, %cst_13 [2] : vector<4x8x8xf32> to vector<4x8xf32>
    %68 = vector.shape_cast %67 : vector<4x8xf32> to vector<4x8x1xf32>
    %69 = vector.broadcast %68 : vector<4x8x1xf32> to vector<4x8x8xf32>
    %70 = arith.subf %66, %69 : vector<4x8x8xf32>
    %71 = math.exp %70 : vector<4x8x8xf32>
    %cst_14 = arith.constant dense<0.000000e+00> : vector<4x8xf32>
    %72 = vector.multi_reduction <add>, %71, %cst_14 [2] : vector<4x8x8xf32> to vector<4x8xf32>
    %73 = vector.shape_cast %72 : vector<4x8xf32> to vector<4x8x1xf32>
    %74 = math.log %73 : vector<4x8x1xf32>
    %75 = arith.addf %68, %74 : vector<4x8x1xf32>
    %76 = vector.broadcast %75 : vector<4x8x1xf32> to vector<4x8x8xf32>
    %77 = arith.subf %66, %76 : vector<4x8x8xf32>
    %cst_15 = arith.constant dense<0xFF800000> : vector<4x8xf32>
    %78 = vector.multi_reduction <maximumf>, %77, %cst_15 [1] : vector<4x8x8xf32> to vector<4x8xf32>
    %79 = vector.shape_cast %78 : vector<4x8xf32> to vector<4x1x8xf32>
    %80 = vector.broadcast %79 : vector<4x1x8xf32> to vector<4x8x8xf32>
    %81 = arith.subf %77, %80 : vector<4x8x8xf32>
    %82 = math.exp %81 : vector<4x8x8xf32>
    %cst_16 = arith.constant dense<0.000000e+00> : vector<4x8xf32>
    %83 = vector.multi_reduction <add>, %82, %cst_16 [1] : vector<4x8x8xf32> to vector<4x8xf32>
    %84 = vector.shape_cast %83 : vector<4x8xf32> to vector<4x1x8xf32>
    %85 = math.log %84 : vector<4x1x8xf32>
    %86 = arith.addf %79, %85 : vector<4x1x8xf32>
    %87 = vector.broadcast %86 : vector<4x1x8xf32> to vector<4x8x8xf32>
    %88 = arith.subf %77, %87 : vector<4x8x8xf32>
    %cst_17 = arith.constant dense<0xFF800000> : vector<4x8xf32>
    %89 = vector.multi_reduction <maximumf>, %88, %cst_17 [2] : vector<4x8x8xf32> to vector<4x8xf32>
    %90 = vector.shape_cast %89 : vector<4x8xf32> to vector<4x8x1xf32>
    %91 = vector.broadcast %90 : vector<4x8x1xf32> to vector<4x8x8xf32>
    %92 = arith.subf %88, %91 : vector<4x8x8xf32>
    %93 = math.exp %92 : vector<4x8x8xf32>
    %cst_18 = arith.constant dense<0.000000e+00> : vector<4x8xf32>
    %94 = vector.multi_reduction <add>, %93, %cst_18 [2] : vector<4x8x8xf32> to vector<4x8xf32>
    %95 = vector.shape_cast %94 : vector<4x8xf32> to vector<4x8x1xf32>
    %96 = math.log %95 : vector<4x8x1xf32>
    %97 = arith.addf %90, %96 : vector<4x8x1xf32>
    %98 = vector.broadcast %97 : vector<4x8x1xf32> to vector<4x8x8xf32>
    %99 = arith.subf %88, %98 : vector<4x8x8xf32>
    %cst_19 = arith.constant dense<0xFF800000> : vector<4x8xf32>
    %100 = vector.multi_reduction <maximumf>, %99, %cst_19 [1] : vector<4x8x8xf32> to vector<4x8xf32>
    %101 = vector.shape_cast %100 : vector<4x8xf32> to vector<4x1x8xf32>
    %102 = vector.broadcast %101 : vector<4x1x8xf32> to vector<4x8x8xf32>
    %103 = arith.subf %99, %102 : vector<4x8x8xf32>
    %104 = math.exp %103 : vector<4x8x8xf32>
    %cst_20 = arith.constant dense<0.000000e+00> : vector<4x8xf32>
    %105 = vector.multi_reduction <add>, %104, %cst_20 [1] : vector<4x8x8xf32> to vector<4x8xf32>
    %106 = vector.shape_cast %105 : vector<4x8xf32> to vector<4x1x8xf32>
    %107 = math.log %106 : vector<4x1x8xf32>
    %108 = arith.addf %101, %107 : vector<4x1x8xf32>
    %109 = vector.broadcast %108 : vector<4x1x8xf32> to vector<4x8x8xf32>
    %110 = arith.subf %99, %109 : vector<4x8x8xf32>
    %cst_21 = arith.constant dense<0xFF800000> : vector<4x8xf32>
    %111 = vector.multi_reduction <maximumf>, %110, %cst_21 [2] : vector<4x8x8xf32> to vector<4x8xf32>
    %112 = vector.shape_cast %111 : vector<4x8xf32> to vector<4x8x1xf32>
    %113 = vector.broadcast %112 : vector<4x8x1xf32> to vector<4x8x8xf32>
    %114 = arith.subf %110, %113 : vector<4x8x8xf32>
    %115 = math.exp %114 : vector<4x8x8xf32>
    %cst_22 = arith.constant dense<0.000000e+00> : vector<4x8xf32>
    %116 = vector.multi_reduction <add>, %115, %cst_22 [2] : vector<4x8x8xf32> to vector<4x8xf32>
    %117 = vector.shape_cast %116 : vector<4x8xf32> to vector<4x8x1xf32>
    %118 = math.log %117 : vector<4x8x1xf32>
    %119 = arith.addf %112, %118 : vector<4x8x1xf32>
    %120 = vector.broadcast %119 : vector<4x8x1xf32> to vector<4x8x8xf32>
    %121 = arith.subf %110, %120 : vector<4x8x8xf32>
    %cst_23 = arith.constant dense<0xFF800000> : vector<4x8xf32>
    %122 = vector.multi_reduction <maximumf>, %121, %cst_23 [1] : vector<4x8x8xf32> to vector<4x8xf32>
    %123 = vector.shape_cast %122 : vector<4x8xf32> to vector<4x1x8xf32>
    %124 = vector.broadcast %123 : vector<4x1x8xf32> to vector<4x8x8xf32>
    %125 = arith.subf %121, %124 : vector<4x8x8xf32>
    %126 = math.exp %125 : vector<4x8x8xf32>
    %cst_24 = arith.constant dense<0.000000e+00> : vector<4x8xf32>
    %127 = vector.multi_reduction <add>, %126, %cst_24 [1] : vector<4x8x8xf32> to vector<4x8xf32>
    %128 = vector.shape_cast %127 : vector<4x8xf32> to vector<4x1x8xf32>
    %129 = math.log %128 : vector<4x1x8xf32>
    %130 = arith.addf %123, %129 : vector<4x1x8xf32>
    %131 = vector.broadcast %130 : vector<4x1x8xf32> to vector<4x8x8xf32>
    %132 = arith.subf %121, %131 : vector<4x8x8xf32>
    %cst_25 = arith.constant dense<0xFF800000> : vector<4x8xf32>
    %133 = vector.multi_reduction <maximumf>, %132, %cst_25 [2] : vector<4x8x8xf32> to vector<4x8xf32>
    %134 = vector.shape_cast %133 : vector<4x8xf32> to vector<4x8x1xf32>
    %135 = vector.broadcast %134 : vector<4x8x1xf32> to vector<4x8x8xf32>
    %136 = arith.subf %132, %135 : vector<4x8x8xf32>
    %137 = math.exp %136 : vector<4x8x8xf32>
    %cst_26 = arith.constant dense<0.000000e+00> : vector<4x8xf32>
    %138 = vector.multi_reduction <add>, %137, %cst_26 [2] : vector<4x8x8xf32> to vector<4x8xf32>
    %139 = vector.shape_cast %138 : vector<4x8xf32> to vector<4x8x1xf32>
    %140 = math.log %139 : vector<4x8x1xf32>
    %141 = arith.addf %134, %140 : vector<4x8x1xf32>
    %142 = vector.broadcast %141 : vector<4x8x1xf32> to vector<4x8x8xf32>
    %143 = arith.subf %132, %142 : vector<4x8x8xf32>
    %cst_27 = arith.constant dense<0xFF800000> : vector<4x8xf32>
    %144 = vector.multi_reduction <maximumf>, %143, %cst_27 [1] : vector<4x8x8xf32> to vector<4x8xf32>
    %145 = vector.shape_cast %144 : vector<4x8xf32> to vector<4x1x8xf32>
    %146 = vector.broadcast %145 : vector<4x1x8xf32> to vector<4x8x8xf32>
    %147 = arith.subf %143, %146 : vector<4x8x8xf32>
    %148 = math.exp %147 : vector<4x8x8xf32>
    %cst_28 = arith.constant dense<0.000000e+00> : vector<4x8xf32>
    %149 = vector.multi_reduction <add>, %148, %cst_28 [1] : vector<4x8x8xf32> to vector<4x8xf32>
    %150 = vector.shape_cast %149 : vector<4x8xf32> to vector<4x1x8xf32>
    %151 = math.log %150 : vector<4x1x8xf32>
    %152 = arith.addf %145, %151 : vector<4x1x8xf32>
    %153 = vector.broadcast %152 : vector<4x1x8xf32> to vector<4x8x8xf32>
    %154 = arith.subf %143, %153 : vector<4x8x8xf32>
    %cst_29 = arith.constant dense<0xFF800000> : vector<4x8xf32>
    %155 = vector.multi_reduction <maximumf>, %154, %cst_29 [2] : vector<4x8x8xf32> to vector<4x8xf32>
    %156 = vector.shape_cast %155 : vector<4x8xf32> to vector<4x8x1xf32>
    %157 = vector.broadcast %156 : vector<4x8x1xf32> to vector<4x8x8xf32>
    %158 = arith.subf %154, %157 : vector<4x8x8xf32>
    %159 = math.exp %158 : vector<4x8x8xf32>
    %cst_30 = arith.constant dense<0.000000e+00> : vector<4x8xf32>
    %160 = vector.multi_reduction <add>, %159, %cst_30 [2] : vector<4x8x8xf32> to vector<4x8xf32>
    %161 = vector.shape_cast %160 : vector<4x8xf32> to vector<4x8x1xf32>
    %162 = math.log %161 : vector<4x8x1xf32>
    %163 = arith.addf %156, %162 : vector<4x8x1xf32>
    %164 = vector.broadcast %163 : vector<4x8x1xf32> to vector<4x8x8xf32>
    %165 = arith.subf %154, %164 : vector<4x8x8xf32>
    %cst_31 = arith.constant dense<0xFF800000> : vector<4x8xf32>
    %166 = vector.multi_reduction <maximumf>, %165, %cst_31 [1] : vector<4x8x8xf32> to vector<4x8xf32>
    %167 = vector.shape_cast %166 : vector<4x8xf32> to vector<4x1x8xf32>
    %168 = vector.broadcast %167 : vector<4x1x8xf32> to vector<4x8x8xf32>
    %169 = arith.subf %165, %168 : vector<4x8x8xf32>
    %170 = math.exp %169 : vector<4x8x8xf32>
    %cst_32 = arith.constant dense<0.000000e+00> : vector<4x8xf32>
    %171 = vector.multi_reduction <add>, %170, %cst_32 [1] : vector<4x8x8xf32> to vector<4x8xf32>
    %172 = vector.shape_cast %171 : vector<4x8xf32> to vector<4x1x8xf32>
    %173 = math.log %172 : vector<4x1x8xf32>
    %174 = arith.addf %167, %173 : vector<4x1x8xf32>
    %175 = vector.broadcast %174 : vector<4x1x8xf32> to vector<4x8x8xf32>
    %176 = arith.subf %165, %175 : vector<4x8x8xf32>
    %cst_33 = arith.constant dense<0xFF800000> : vector<4x8xf32>
    %177 = vector.multi_reduction <maximumf>, %176, %cst_33 [2] : vector<4x8x8xf32> to vector<4x8xf32>
    %178 = vector.shape_cast %177 : vector<4x8xf32> to vector<4x8x1xf32>
    %179 = vector.broadcast %178 : vector<4x8x1xf32> to vector<4x8x8xf32>
    %180 = arith.subf %176, %179 : vector<4x8x8xf32>
    %181 = math.exp %180 : vector<4x8x8xf32>
    %cst_34 = arith.constant dense<0.000000e+00> : vector<4x8xf32>
    %182 = vector.multi_reduction <add>, %181, %cst_34 [2] : vector<4x8x8xf32> to vector<4x8xf32>
    %183 = vector.shape_cast %182 : vector<4x8xf32> to vector<4x8x1xf32>
    %184 = math.log %183 : vector<4x8x1xf32>
    %185 = arith.addf %178, %184 : vector<4x8x1xf32>
    %186 = vector.broadcast %185 : vector<4x8x1xf32> to vector<4x8x8xf32>
    %187 = arith.subf %176, %186 : vector<4x8x8xf32>
    %cst_35 = arith.constant dense<0xFF800000> : vector<4x8xf32>
    %188 = vector.multi_reduction <maximumf>, %187, %cst_35 [1] : vector<4x8x8xf32> to vector<4x8xf32>
    %189 = vector.shape_cast %188 : vector<4x8xf32> to vector<4x1x8xf32>
    %190 = vector.broadcast %189 : vector<4x1x8xf32> to vector<4x8x8xf32>
    %191 = arith.subf %187, %190 : vector<4x8x8xf32>
    %192 = math.exp %191 : vector<4x8x8xf32>
    %cst_36 = arith.constant dense<0.000000e+00> : vector<4x8xf32>
    %193 = vector.multi_reduction <add>, %192, %cst_36 [1] : vector<4x8x8xf32> to vector<4x8xf32>
    %194 = vector.shape_cast %193 : vector<4x8xf32> to vector<4x1x8xf32>
    %195 = math.log %194 : vector<4x1x8xf32>
    %196 = arith.addf %189, %195 : vector<4x1x8xf32>
    %197 = vector.broadcast %196 : vector<4x1x8xf32> to vector<4x8x8xf32>
    %198 = arith.subf %187, %197 : vector<4x8x8xf32>
    %cst_37 = arith.constant dense<0xFF800000> : vector<4x8xf32>
    %199 = vector.multi_reduction <maximumf>, %198, %cst_37 [2] : vector<4x8x8xf32> to vector<4x8xf32>
    %200 = vector.shape_cast %199 : vector<4x8xf32> to vector<4x8x1xf32>
    %201 = vector.broadcast %200 : vector<4x8x1xf32> to vector<4x8x8xf32>
    %202 = arith.subf %198, %201 : vector<4x8x8xf32>
    %203 = math.exp %202 : vector<4x8x8xf32>
    %cst_38 = arith.constant dense<0.000000e+00> : vector<4x8xf32>
    %204 = vector.multi_reduction <add>, %203, %cst_38 [2] : vector<4x8x8xf32> to vector<4x8xf32>
    %205 = vector.shape_cast %204 : vector<4x8xf32> to vector<4x8x1xf32>
    %206 = math.log %205 : vector<4x8x1xf32>
    %207 = arith.addf %200, %206 : vector<4x8x1xf32>
    %208 = vector.broadcast %207 : vector<4x8x1xf32> to vector<4x8x8xf32>
    %209 = arith.subf %198, %208 : vector<4x8x8xf32>
    %cst_39 = arith.constant dense<0xFF800000> : vector<4x8xf32>
    %210 = vector.multi_reduction <maximumf>, %209, %cst_39 [1] : vector<4x8x8xf32> to vector<4x8xf32>
    %211 = vector.shape_cast %210 : vector<4x8xf32> to vector<4x1x8xf32>
    %212 = vector.broadcast %211 : vector<4x1x8xf32> to vector<4x8x8xf32>
    %213 = arith.subf %209, %212 : vector<4x8x8xf32>
    %214 = math.exp %213 : vector<4x8x8xf32>
    %cst_40 = arith.constant dense<0.000000e+00> : vector<4x8xf32>
    %215 = vector.multi_reduction <add>, %214, %cst_40 [1] : vector<4x8x8xf32> to vector<4x8xf32>
    %216 = vector.shape_cast %215 : vector<4x8xf32> to vector<4x1x8xf32>
    %217 = math.log %216 : vector<4x1x8xf32>
    %218 = arith.addf %211, %217 : vector<4x1x8xf32>
    %219 = vector.broadcast %218 : vector<4x1x8xf32> to vector<4x8x8xf32>
    %220 = arith.subf %209, %219 : vector<4x8x8xf32>
    %cst_41 = arith.constant dense<0xFF800000> : vector<4x8xf32>
    %221 = vector.multi_reduction <maximumf>, %220, %cst_41 [2] : vector<4x8x8xf32> to vector<4x8xf32>
    %222 = vector.shape_cast %221 : vector<4x8xf32> to vector<4x8x1xf32>
    %223 = vector.broadcast %222 : vector<4x8x1xf32> to vector<4x8x8xf32>
    %224 = arith.subf %220, %223 : vector<4x8x8xf32>
    %225 = math.exp %224 : vector<4x8x8xf32>
    %cst_42 = arith.constant dense<0.000000e+00> : vector<4x8xf32>
    %226 = vector.multi_reduction <add>, %225, %cst_42 [2] : vector<4x8x8xf32> to vector<4x8xf32>
    %227 = vector.shape_cast %226 : vector<4x8xf32> to vector<4x8x1xf32>
    %228 = math.log %227 : vector<4x8x1xf32>
    %229 = arith.addf %222, %228 : vector<4x8x1xf32>
    %230 = vector.broadcast %229 : vector<4x8x1xf32> to vector<4x8x8xf32>
    %231 = arith.subf %220, %230 : vector<4x8x8xf32>
    %cst_43 = arith.constant dense<0xFF800000> : vector<4x8xf32>
    %232 = vector.multi_reduction <maximumf>, %231, %cst_43 [1] : vector<4x8x8xf32> to vector<4x8xf32>
    %233 = vector.shape_cast %232 : vector<4x8xf32> to vector<4x1x8xf32>
    %234 = vector.broadcast %233 : vector<4x1x8xf32> to vector<4x8x8xf32>
    %235 = arith.subf %231, %234 : vector<4x8x8xf32>
    %236 = math.exp %235 : vector<4x8x8xf32>
    %cst_44 = arith.constant dense<0.000000e+00> : vector<4x8xf32>
    %237 = vector.multi_reduction <add>, %236, %cst_44 [1] : vector<4x8x8xf32> to vector<4x8xf32>
    %238 = vector.shape_cast %237 : vector<4x8xf32> to vector<4x1x8xf32>
    %239 = math.log %238 : vector<4x1x8xf32>
    %240 = arith.addf %233, %239 : vector<4x1x8xf32>
    %241 = vector.broadcast %240 : vector<4x1x8xf32> to vector<4x8x8xf32>
    %242 = arith.subf %231, %241 : vector<4x8x8xf32>
    %cst_45 = arith.constant dense<0xFF800000> : vector<4x8xf32>
    %243 = vector.multi_reduction <maximumf>, %242, %cst_45 [2] : vector<4x8x8xf32> to vector<4x8xf32>
    %244 = vector.shape_cast %243 : vector<4x8xf32> to vector<4x8x1xf32>
    %245 = vector.broadcast %244 : vector<4x8x1xf32> to vector<4x8x8xf32>
    %246 = arith.subf %242, %245 : vector<4x8x8xf32>
    %247 = math.exp %246 : vector<4x8x8xf32>
    %cst_46 = arith.constant dense<0.000000e+00> : vector<4x8xf32>
    %248 = vector.multi_reduction <add>, %247, %cst_46 [2] : vector<4x8x8xf32> to vector<4x8xf32>
    %249 = vector.shape_cast %248 : vector<4x8xf32> to vector<4x8x1xf32>
    %250 = math.log %249 : vector<4x8x1xf32>
    %251 = arith.addf %244, %250 : vector<4x8x1xf32>
    %252 = vector.broadcast %251 : vector<4x8x1xf32> to vector<4x8x8xf32>
    %253 = arith.subf %242, %252 : vector<4x8x8xf32>
    %cst_47 = arith.constant dense<0xFF800000> : vector<4x8xf32>
    %254 = vector.multi_reduction <maximumf>, %253, %cst_47 [1] : vector<4x8x8xf32> to vector<4x8xf32>
    %255 = vector.shape_cast %254 : vector<4x8xf32> to vector<4x1x8xf32>
    %256 = vector.broadcast %255 : vector<4x1x8xf32> to vector<4x8x8xf32>
    %257 = arith.subf %253, %256 : vector<4x8x8xf32>
    %258 = math.exp %257 : vector<4x8x8xf32>
    %cst_48 = arith.constant dense<0.000000e+00> : vector<4x8xf32>
    %259 = vector.multi_reduction <add>, %258, %cst_48 [1] : vector<4x8x8xf32> to vector<4x8xf32>
    %260 = vector.shape_cast %259 : vector<4x8xf32> to vector<4x1x8xf32>
    %261 = math.log %260 : vector<4x1x8xf32>
    %262 = arith.addf %255, %261 : vector<4x1x8xf32>
    %263 = vector.broadcast %262 : vector<4x1x8xf32> to vector<4x8x8xf32>
    %264 = arith.subf %253, %263 : vector<4x8x8xf32>
    %cst_49 = arith.constant dense<0xFF800000> : vector<4x8xf32>
    %265 = vector.multi_reduction <maximumf>, %264, %cst_49 [2] : vector<4x8x8xf32> to vector<4x8xf32>
    %266 = vector.shape_cast %265 : vector<4x8xf32> to vector<4x8x1xf32>
    %267 = vector.broadcast %266 : vector<4x8x1xf32> to vector<4x8x8xf32>
    %268 = arith.subf %264, %267 : vector<4x8x8xf32>
    %269 = math.exp %268 : vector<4x8x8xf32>
    %cst_50 = arith.constant dense<0.000000e+00> : vector<4x8xf32>
    %270 = vector.multi_reduction <add>, %269, %cst_50 [2] : vector<4x8x8xf32> to vector<4x8xf32>
    %271 = vector.shape_cast %270 : vector<4x8xf32> to vector<4x8x1xf32>
    %272 = math.log %271 : vector<4x8x1xf32>
    %273 = arith.addf %266, %272 : vector<4x8x1xf32>
    %274 = vector.broadcast %273 : vector<4x8x1xf32> to vector<4x8x8xf32>
    %275 = arith.subf %264, %274 : vector<4x8x8xf32>
    %cst_51 = arith.constant dense<0xFF800000> : vector<4x8xf32>
    %276 = vector.multi_reduction <maximumf>, %275, %cst_51 [1] : vector<4x8x8xf32> to vector<4x8xf32>
    %277 = vector.shape_cast %276 : vector<4x8xf32> to vector<4x1x8xf32>
    %278 = vector.broadcast %277 : vector<4x1x8xf32> to vector<4x8x8xf32>
    %279 = arith.subf %275, %278 : vector<4x8x8xf32>
    %280 = math.exp %279 : vector<4x8x8xf32>
    %cst_52 = arith.constant dense<0.000000e+00> : vector<4x8xf32>
    %281 = vector.multi_reduction <add>, %280, %cst_52 [1] : vector<4x8x8xf32> to vector<4x8xf32>
    %282 = vector.shape_cast %281 : vector<4x8xf32> to vector<4x1x8xf32>
    %283 = math.log %282 : vector<4x1x8xf32>
    %284 = arith.addf %277, %283 : vector<4x1x8xf32>
    %285 = vector.broadcast %284 : vector<4x1x8xf32> to vector<4x8x8xf32>
    %286 = arith.subf %275, %285 : vector<4x8x8xf32>
    %cst_53 = arith.constant dense<0xFF800000> : vector<4x8xf32>
    %287 = vector.multi_reduction <maximumf>, %286, %cst_53 [2] : vector<4x8x8xf32> to vector<4x8xf32>
    %288 = vector.shape_cast %287 : vector<4x8xf32> to vector<4x8x1xf32>
    %289 = vector.broadcast %288 : vector<4x8x1xf32> to vector<4x8x8xf32>
    %290 = arith.subf %286, %289 : vector<4x8x8xf32>
    %291 = math.exp %290 : vector<4x8x8xf32>
    %cst_54 = arith.constant dense<0.000000e+00> : vector<4x8xf32>
    %292 = vector.multi_reduction <add>, %291, %cst_54 [2] : vector<4x8x8xf32> to vector<4x8xf32>
    %293 = vector.shape_cast %292 : vector<4x8xf32> to vector<4x8x1xf32>
    %294 = math.log %293 : vector<4x8x1xf32>
    %295 = arith.addf %288, %294 : vector<4x8x1xf32>
    %296 = vector.broadcast %295 : vector<4x8x1xf32> to vector<4x8x8xf32>
    %297 = arith.subf %286, %296 : vector<4x8x8xf32>
    %cst_55 = arith.constant dense<0xFF800000> : vector<4x8xf32>
    %298 = vector.multi_reduction <maximumf>, %297, %cst_55 [1] : vector<4x8x8xf32> to vector<4x8xf32>
    %299 = vector.shape_cast %298 : vector<4x8xf32> to vector<4x1x8xf32>
    %300 = vector.broadcast %299 : vector<4x1x8xf32> to vector<4x8x8xf32>
    %301 = arith.subf %297, %300 : vector<4x8x8xf32>
    %302 = math.exp %301 : vector<4x8x8xf32>
    %cst_56 = arith.constant dense<0.000000e+00> : vector<4x8xf32>
    %303 = vector.multi_reduction <add>, %302, %cst_56 [1] : vector<4x8x8xf32> to vector<4x8xf32>
    %304 = vector.shape_cast %303 : vector<4x8xf32> to vector<4x1x8xf32>
    %305 = math.log %304 : vector<4x1x8xf32>
    %306 = arith.addf %299, %305 : vector<4x1x8xf32>
    %307 = vector.broadcast %306 : vector<4x1x8xf32> to vector<4x8x8xf32>
    %308 = arith.subf %297, %307 : vector<4x8x8xf32>
    %cst_57 = arith.constant dense<0xFF800000> : vector<4x8xf32>
    %309 = vector.multi_reduction <maximumf>, %308, %cst_57 [2] : vector<4x8x8xf32> to vector<4x8xf32>
    %310 = vector.shape_cast %309 : vector<4x8xf32> to vector<4x8x1xf32>
    %311 = vector.broadcast %310 : vector<4x8x1xf32> to vector<4x8x8xf32>
    %312 = arith.subf %308, %311 : vector<4x8x8xf32>
    %313 = math.exp %312 : vector<4x8x8xf32>
    %cst_58 = arith.constant dense<0.000000e+00> : vector<4x8xf32>
    %314 = vector.multi_reduction <add>, %313, %cst_58 [2] : vector<4x8x8xf32> to vector<4x8xf32>
    %315 = vector.shape_cast %314 : vector<4x8xf32> to vector<4x8x1xf32>
    %316 = math.log %315 : vector<4x8x1xf32>
    %317 = arith.addf %310, %316 : vector<4x8x1xf32>
    %318 = vector.broadcast %317 : vector<4x8x1xf32> to vector<4x8x8xf32>
    %319 = arith.subf %308, %318 : vector<4x8x8xf32>
    %cst_59 = arith.constant dense<0xFF800000> : vector<4x8xf32>
    %320 = vector.multi_reduction <maximumf>, %319, %cst_59 [1] : vector<4x8x8xf32> to vector<4x8xf32>
    %321 = vector.shape_cast %320 : vector<4x8xf32> to vector<4x1x8xf32>
    %322 = vector.broadcast %321 : vector<4x1x8xf32> to vector<4x8x8xf32>
    %323 = arith.subf %319, %322 : vector<4x8x8xf32>
    %324 = math.exp %323 : vector<4x8x8xf32>
    %cst_60 = arith.constant dense<0.000000e+00> : vector<4x8xf32>
    %325 = vector.multi_reduction <add>, %324, %cst_60 [1] : vector<4x8x8xf32> to vector<4x8xf32>
    %326 = vector.shape_cast %325 : vector<4x8xf32> to vector<4x1x8xf32>
    %327 = math.log %326 : vector<4x1x8xf32>
    %328 = arith.addf %321, %327 : vector<4x1x8xf32>
    %329 = vector.broadcast %328 : vector<4x1x8xf32> to vector<4x8x8xf32>
    %330 = arith.subf %319, %329 : vector<4x8x8xf32>
    %cst_61 = arith.constant dense<0xFF800000> : vector<4x8xf32>
    %331 = vector.multi_reduction <maximumf>, %330, %cst_61 [2] : vector<4x8x8xf32> to vector<4x8xf32>
    %332 = vector.shape_cast %331 : vector<4x8xf32> to vector<4x8x1xf32>
    %333 = vector.broadcast %332 : vector<4x8x1xf32> to vector<4x8x8xf32>
    %334 = arith.subf %330, %333 : vector<4x8x8xf32>
    %335 = math.exp %334 : vector<4x8x8xf32>
    %cst_62 = arith.constant dense<0.000000e+00> : vector<4x8xf32>
    %336 = vector.multi_reduction <add>, %335, %cst_62 [2] : vector<4x8x8xf32> to vector<4x8xf32>
    %337 = vector.shape_cast %336 : vector<4x8xf32> to vector<4x8x1xf32>
    %338 = math.log %337 : vector<4x8x1xf32>
    %339 = arith.addf %332, %338 : vector<4x8x1xf32>
    %340 = vector.broadcast %339 : vector<4x8x1xf32> to vector<4x8x8xf32>
    %341 = arith.subf %330, %340 : vector<4x8x8xf32>
    %cst_63 = arith.constant dense<0xFF800000> : vector<4x8xf32>
    %342 = vector.multi_reduction <maximumf>, %341, %cst_63 [1] : vector<4x8x8xf32> to vector<4x8xf32>
    %343 = vector.shape_cast %342 : vector<4x8xf32> to vector<4x1x8xf32>
    %344 = vector.broadcast %343 : vector<4x1x8xf32> to vector<4x8x8xf32>
    %345 = arith.subf %341, %344 : vector<4x8x8xf32>
    %346 = math.exp %345 : vector<4x8x8xf32>
    %cst_64 = arith.constant dense<0.000000e+00> : vector<4x8xf32>
    %347 = vector.multi_reduction <add>, %346, %cst_64 [1] : vector<4x8x8xf32> to vector<4x8xf32>
    %348 = vector.shape_cast %347 : vector<4x8xf32> to vector<4x1x8xf32>
    %349 = math.log %348 : vector<4x1x8xf32>
    %350 = arith.addf %343, %349 : vector<4x1x8xf32>
    %351 = vector.broadcast %350 : vector<4x1x8xf32> to vector<4x8x8xf32>
    %352 = arith.subf %341, %351 : vector<4x8x8xf32>
    %cst_65 = arith.constant dense<0xFF800000> : vector<4x8xf32>
    %353 = vector.multi_reduction <maximumf>, %352, %cst_65 [2] : vector<4x8x8xf32> to vector<4x8xf32>
    %354 = vector.shape_cast %353 : vector<4x8xf32> to vector<4x8x1xf32>
    %355 = vector.broadcast %354 : vector<4x8x1xf32> to vector<4x8x8xf32>
    %356 = arith.subf %352, %355 : vector<4x8x8xf32>
    %357 = math.exp %356 : vector<4x8x8xf32>
    %cst_66 = arith.constant dense<0.000000e+00> : vector<4x8xf32>
    %358 = vector.multi_reduction <add>, %357, %cst_66 [2] : vector<4x8x8xf32> to vector<4x8xf32>
    %359 = vector.shape_cast %358 : vector<4x8xf32> to vector<4x8x1xf32>
    %360 = math.log %359 : vector<4x8x1xf32>
    %361 = arith.addf %354, %360 : vector<4x8x1xf32>
    %362 = vector.broadcast %361 : vector<4x8x1xf32> to vector<4x8x8xf32>
    %363 = arith.subf %352, %362 : vector<4x8x8xf32>
    %cst_67 = arith.constant dense<0xFF800000> : vector<4x8xf32>
    %364 = vector.multi_reduction <maximumf>, %363, %cst_67 [1] : vector<4x8x8xf32> to vector<4x8xf32>
    %365 = vector.shape_cast %364 : vector<4x8xf32> to vector<4x1x8xf32>
    %366 = vector.broadcast %365 : vector<4x1x8xf32> to vector<4x8x8xf32>
    %367 = arith.subf %363, %366 : vector<4x8x8xf32>
    %368 = math.exp %367 : vector<4x8x8xf32>
    %cst_68 = arith.constant dense<0.000000e+00> : vector<4x8xf32>
    %369 = vector.multi_reduction <add>, %368, %cst_68 [1] : vector<4x8x8xf32> to vector<4x8xf32>
    %370 = vector.shape_cast %369 : vector<4x8xf32> to vector<4x1x8xf32>
    %371 = math.log %370 : vector<4x1x8xf32>
    %372 = arith.addf %365, %371 : vector<4x1x8xf32>
    %373 = vector.broadcast %372 : vector<4x1x8xf32> to vector<4x8x8xf32>
    %374 = arith.subf %363, %373 : vector<4x8x8xf32>
    %cst_69 = arith.constant dense<0xFF800000> : vector<4x8xf32>
    %375 = vector.multi_reduction <maximumf>, %374, %cst_69 [2] : vector<4x8x8xf32> to vector<4x8xf32>
    %376 = vector.shape_cast %375 : vector<4x8xf32> to vector<4x8x1xf32>
    %377 = vector.broadcast %376 : vector<4x8x1xf32> to vector<4x8x8xf32>
    %378 = arith.subf %374, %377 : vector<4x8x8xf32>
    %379 = math.exp %378 : vector<4x8x8xf32>
    %cst_70 = arith.constant dense<0.000000e+00> : vector<4x8xf32>
    %380 = vector.multi_reduction <add>, %379, %cst_70 [2] : vector<4x8x8xf32> to vector<4x8xf32>
    %381 = vector.shape_cast %380 : vector<4x8xf32> to vector<4x8x1xf32>
    %382 = math.log %381 : vector<4x8x1xf32>
    %383 = arith.addf %376, %382 : vector<4x8x1xf32>
    %384 = vector.broadcast %383 : vector<4x8x1xf32> to vector<4x8x8xf32>
    %385 = arith.subf %374, %384 : vector<4x8x8xf32>
    %cst_71 = arith.constant dense<0xFF800000> : vector<4x8xf32>
    %386 = vector.multi_reduction <maximumf>, %385, %cst_71 [1] : vector<4x8x8xf32> to vector<4x8xf32>
    %387 = vector.shape_cast %386 : vector<4x8xf32> to vector<4x1x8xf32>
    %388 = vector.broadcast %387 : vector<4x1x8xf32> to vector<4x8x8xf32>
    %389 = arith.subf %385, %388 : vector<4x8x8xf32>
    %390 = math.exp %389 : vector<4x8x8xf32>
    %cst_72 = arith.constant dense<0.000000e+00> : vector<4x8xf32>
    %391 = vector.multi_reduction <add>, %390, %cst_72 [1] : vector<4x8x8xf32> to vector<4x8xf32>
    %392 = vector.shape_cast %391 : vector<4x8xf32> to vector<4x1x8xf32>
    %393 = math.log %392 : vector<4x1x8xf32>
    %394 = arith.addf %387, %393 : vector<4x1x8xf32>
    %395 = vector.broadcast %394 : vector<4x1x8xf32> to vector<4x8x8xf32>
    %396 = arith.subf %385, %395 : vector<4x8x8xf32>
    %cst_73 = arith.constant dense<0xFF800000> : vector<4x8xf32>
    %397 = vector.multi_reduction <maximumf>, %396, %cst_73 [2] : vector<4x8x8xf32> to vector<4x8xf32>
    %398 = vector.shape_cast %397 : vector<4x8xf32> to vector<4x8x1xf32>
    %399 = vector.broadcast %398 : vector<4x8x1xf32> to vector<4x8x8xf32>
    %400 = arith.subf %396, %399 : vector<4x8x8xf32>
    %401 = math.exp %400 : vector<4x8x8xf32>
    %cst_74 = arith.constant dense<0.000000e+00> : vector<4x8xf32>
    %402 = vector.multi_reduction <add>, %401, %cst_74 [2] : vector<4x8x8xf32> to vector<4x8xf32>
    %403 = vector.shape_cast %402 : vector<4x8xf32> to vector<4x8x1xf32>
    %404 = math.log %403 : vector<4x8x1xf32>
    %405 = arith.addf %398, %404 : vector<4x8x1xf32>
    %406 = vector.broadcast %405 : vector<4x8x1xf32> to vector<4x8x8xf32>
    %407 = arith.subf %396, %406 : vector<4x8x8xf32>
    %cst_75 = arith.constant dense<0xFF800000> : vector<4x8xf32>
    %408 = vector.multi_reduction <maximumf>, %407, %cst_75 [1] : vector<4x8x8xf32> to vector<4x8xf32>
    %409 = vector.shape_cast %408 : vector<4x8xf32> to vector<4x1x8xf32>
    %410 = vector.broadcast %409 : vector<4x1x8xf32> to vector<4x8x8xf32>
    %411 = arith.subf %407, %410 : vector<4x8x8xf32>
    %412 = math.exp %411 : vector<4x8x8xf32>
    %cst_76 = arith.constant dense<0.000000e+00> : vector<4x8xf32>
    %413 = vector.multi_reduction <add>, %412, %cst_76 [1] : vector<4x8x8xf32> to vector<4x8xf32>
    %414 = vector.shape_cast %413 : vector<4x8xf32> to vector<4x1x8xf32>
    %415 = math.log %414 : vector<4x1x8xf32>
    %416 = arith.addf %409, %415 : vector<4x1x8xf32>
    %417 = vector.broadcast %416 : vector<4x1x8xf32> to vector<4x8x8xf32>
    %418 = arith.subf %407, %417 : vector<4x8x8xf32>
    %cst_77 = arith.constant dense<0xFF800000> : vector<4x8xf32>
    %419 = vector.multi_reduction <maximumf>, %418, %cst_77 [2] : vector<4x8x8xf32> to vector<4x8xf32>
    %420 = vector.shape_cast %419 : vector<4x8xf32> to vector<4x8x1xf32>
    %421 = vector.broadcast %420 : vector<4x8x1xf32> to vector<4x8x8xf32>
    %422 = arith.subf %418, %421 : vector<4x8x8xf32>
    %423 = math.exp %422 : vector<4x8x8xf32>
    %cst_78 = arith.constant dense<0.000000e+00> : vector<4x8xf32>
    %424 = vector.multi_reduction <add>, %423, %cst_78 [2] : vector<4x8x8xf32> to vector<4x8xf32>
    %425 = vector.shape_cast %424 : vector<4x8xf32> to vector<4x8x1xf32>
    %426 = math.log %425 : vector<4x8x1xf32>
    %427 = arith.addf %420, %426 : vector<4x8x1xf32>
    %428 = vector.broadcast %427 : vector<4x8x1xf32> to vector<4x8x8xf32>
    %429 = arith.subf %418, %428 : vector<4x8x8xf32>
    %cst_79 = arith.constant dense<0xFF800000> : vector<4x8xf32>
    %430 = vector.multi_reduction <maximumf>, %429, %cst_79 [1] : vector<4x8x8xf32> to vector<4x8xf32>
    %431 = vector.shape_cast %430 : vector<4x8xf32> to vector<4x1x8xf32>
    %432 = vector.broadcast %431 : vector<4x1x8xf32> to vector<4x8x8xf32>
    %433 = arith.subf %429, %432 : vector<4x8x8xf32>
    %434 = math.exp %433 : vector<4x8x8xf32>
    %cst_80 = arith.constant dense<0.000000e+00> : vector<4x8xf32>
    %435 = vector.multi_reduction <add>, %434, %cst_80 [1] : vector<4x8x8xf32> to vector<4x8xf32>
    %436 = vector.shape_cast %435 : vector<4x8xf32> to vector<4x1x8xf32>
    %437 = math.log %436 : vector<4x1x8xf32>
    %438 = arith.addf %431, %437 : vector<4x1x8xf32>
    %439 = vector.broadcast %438 : vector<4x1x8xf32> to vector<4x8x8xf32>
    %440 = arith.subf %429, %439 : vector<4x8x8xf32>
    %441 = math.exp %440 : vector<4x8x8xf32>
    %c0_81 = arith.constant 0 : index
    %c0_82 = arith.constant 0 : index
    %c0_83 = arith.constant 0 : index
    %442 = vector.load %arg2[%c0_81, %c0_82, %c0_83] : memref<4x8x8xf32, #tpu.memory_space<vmem>>, vector<4x8x8xf32>
    tpu.vector_store %arg2[%c0_81, %c0_82, %c0_83], %441 {strides = array<i32>} : memref<4x8x8xf32, #tpu.memory_space<vmem>>, vector<4x8x8xf32>,
    return
  }
  func.func @transform_0(%arg0: i32) -> (i32, i32, i32) {
    %c0_i32 = arith.constant 0 : i32
    %c0_i32_0 = arith.constant 0 : i32
    %c0_i32_1 = arith.constant 0 : i32
    %c0_i32_2 = arith.constant 0 : i32
    return %c0_i32, %c0_i32_0, %c0_i32_1 : i32, i32, i32
  }
  func.func @transform_1(%arg0: i32) -> (i32, i32, i32) {
    %c0_i32 = arith.constant 0 : i32
    %c0_i32_0 = arith.constant 0 : i32
    %c0_i32_1 = arith.constant 0 : i32
    %c0_i32_2 = arith.constant 0 : i32
    return %c0_i32, %c0_i32_0, %c0_i32_1 : i32, i32, i32
  }
}

module attributes {stable_mosaic.version = 11 : i64} {
  func.func @_apply_perm_kernel(%arg0: i32, %arg1: i32, %arg2: memref<32x8xf32, #tpu.memory_space<vmem>>, %arg3: memref<4x1x512xf32, #tpu.memory_space<vmem>>, %arg4: memref<1x8x512xf32, #tpu.memory_space<vmem>>, %arg5: memref<1x8x512xf32, #tpu.memory_space<vmem>>) attributes {dimension_semantics = [#tpu.dimension_semantics<parallel>, #tpu.dimension_semantics<parallel>], iteration_bounds = array<i64: 2, 2>, scalar_prefetch = 0 : i64, scratch_operands = 0 : i64, tpu.core_type = #tpu.core_type<tc>, window_params = [{pipeline_mode = #tpu.pipeline_mode<synchronous>, transform_indices = @transform_0, window_bounds = array<i64: 32, 8>}, {pipeline_mode = #tpu.pipeline_mode<synchronous>, transform_indices = @transform_1, window_bounds = array<i64: 4, 1, 512>}, {transform_indices = @transform_2, window_bounds = array<i64: 1, 8, 512>}, {transform_indices = @transform_3, window_bounds = array<i64: 1, 8, 512>}]} {
    %c0 = arith.constant 0 : index
    %c0_0 = arith.constant 0 : index
    %c0_1 = arith.constant 0 : index
    %0 = vector.load %arg4[%c0, %c0_0, %c0_1] : memref<1x8x512xf32, #tpu.memory_space<vmem>>, vector<1x8x512xf32>
    %c0_2 = arith.constant 0 : index
    %c0_3 = arith.constant 0 : index
    %c0_4 = arith.constant 0 : index
    %1 = vector.load %arg3[%c0_2, %c0_3, %c0_4] : memref<4x1x512xf32, #tpu.memory_space<vmem>>, vector<4x1x512xf32>
    %2 = vector.broadcast %0 : vector<1x8x512xf32> to vector<4x8x512xf32>
    %3 = vector.broadcast %1 : vector<4x1x512xf32> to vector<4x8x512xf32>
    %4 = arith.mulf %2, %3 : vector<4x8x512xf32>
    %5 = vector.shape_cast %4 : vector<4x8x512xf32> to vector<32x512xf32>
    %c0_5 = arith.constant 0 : index
    %c0_6 = arith.constant 0 : index
    %6 = vector.load %arg2[%c0_5, %c0_6] : memref<32x8xf32, #tpu.memory_space<vmem>>, vector<32x8xf32>
    %cst = arith.constant dense<0.000000e+00> : vector<8x512xf32>
    %7 = tpu.matmul %6, %5, %cst {dimension_numbers = #tpu.dot_dimension_numbers<[0], [0], [1], [1], [0, 1, 1, 1], [], []>} : vector<32x8xf32>, vector<32x512xf32>, vector<8x512xf32> -> vector<8x512xf32>
    %c0_7 = arith.constant 0 : index
    %c0_8 = arith.constant 0 : index
    %c0_9 = arith.constant 0 : index
    %8 = vector.load %arg5[%c0_7, %c0_8, %c0_9] : memref<1x8x512xf32, #tpu.memory_space<vmem>>, vector<1x8x512xf32>
    %9 = vector.shape_cast %8 : vector<1x8x512xf32> to vector<8x512xf32>
    %10 = vector.shape_cast %7 : vector<8x512xf32> to vector<1x8x512xf32>
    tpu.vector_store %arg5[%c0_7, %c0_8, %c0_9], %10 {strides = array<i32>} : memref<1x8x512xf32, #tpu.memory_space<vmem>>, vector<1x8x512xf32>,
    return
  }
  func.func @transform_0(%arg0: i32, %arg1: i32) -> (i32, i32) {
    %c0_i32 = arith.constant 0 : i32
    %c0_i32_0 = arith.constant 0 : i32
    %c0_i32_1 = arith.constant 0 : i32
    return %c0_i32, %c0_i32_0 : i32, i32
  }
  func.func @transform_1(%arg0: i32, %arg1: i32) -> (i32, i32, i32) {
    %c0_i32 = arith.constant 0 : i32
    %c0_i32_0 = arith.constant 0 : i32
    %c0_i32_1 = arith.constant 0 : i32
    %c0_i32_2 = arith.constant 0 : i32
    return %c0_i32, %c0_i32_0, %c0_i32_1 : i32, i32, i32
  }
  func.func @transform_2(%arg0: i32, %arg1: i32) -> (i32, i32, i32) {
    %c0_i32 = arith.constant 0 : i32
    %c0_i32_0 = arith.constant 0 : i32
    return %arg0, %c0_i32, %arg1 : i32, i32, i32
  }
  func.func @transform_3(%arg0: i32, %arg1: i32) -> (i32, i32, i32) {
    %c0_i32 = arith.constant 0 : i32
    %c0_i32_0 = arith.constant 0 : i32
    return %arg0, %c0_i32, %arg1 : i32, i32, i32
  }
}

</mosaic_0001>

<bundles_post_ra>
// kernel: permutation_layer_forward.3
= control target key start
LH: loop header
LB: loop body
LE: loop exit
PB: predicated region body
PF: predicated region fallthrough
CT: control target
= control target key end

     0   :  { %s727_s12 = smov 0   ;;  %s729_s13 = smov 0   ;;  %s809_s0 = inlined_call_operand.vmem [shape: f32[32,8], index: 0, kind: input, shape index: {}]   ;;  %s810_s1 = inlined_call_operand.vmem [shape: f32[4,1,512], index: 1, kind: input, shape index: {}]   ;;  %s811_s2 = inlined_call_operand.vmem [shape: f32[2,8,1024], index: 2, kind: input, shape index: {}]   ;;  %s812_s3 = inlined_call_operand.vmem [shape: f32[2,8,1024], index: 3, kind: output, shape index: {}]  }
   0x1   :  { %s731_s14 = smov 0   ;;  %s733_s15 = smov 0  }
   0x2   :  { %s735_s16 = smov 0  }
   0x3 LB: > { %s22_s17 = sadd.s32 1, %s696_s14  ;;  %s25_s18 = sadd.s32 1, %s700_s15  ;;  %s704_s16 = sphi %s735_s16, %s13_s16   ;;  %s700_s15 = sphi %s733_s15, %s816_s15   ;;  %s696_s14 = sphi %s731_s14, %s815_s14   ;;  %s692_s13 = sphi %s729_s13, %s814_s13   ;;  %s688_s12 = sphi %s727_s12, %s813_s12  }
   0x4   : > { %p23_p0 = scmp.ge.s32.totalorder %s22_s17, 2  ;;  %p598_p1 = scmp.ge.s32.totalorder %s704_s16, 1 }
   0x5   : > { %p158_p2 = scmp.lt.s32.totalorder %s704_s16, 5 }
   0x6   : > { %s818_s17 = smov (%p23_p0, %s22_s17), 0  ;;  %s820_s18 = smov (!%p23_p0, %s25_s18), %s700_s15 }
   0x7   : > { %p159_p3 = pnand %p598_p1, %p158_p2  ;;  %p27_p4 = scmp.ge.s32.totalorder %s820_s18, 2 }
   0x8   : > { %v318_v0 = vld [vmem:[%s809_s0] sm:$0xff] (!%p159_p3)  ;;  %s599_s21 = sshll.u32 (!%p159_p3), %s688_s12, 2  ;;  %p191_p5 = scmp.lt.s32.totalorder (!%p159_p3), %s692_s13, 1  ;;  %v222_v1 = vlaneseq (!%p159_p3)  ;;  %v706_v2 = vmov (!%p159_p3), 0.0   ;;  %v319_v3 = vld [vmem:[%s809_s0 + $0x8] sm:$0xff] (!%p159_p3)  ;;  %v320_v13 = vld [vmem:[%s809_s0 + $0x10] sm:$0xff] (!%p159_p3) }
   0x9   : > { %s822_s18 = smov (%p27_p4, %s820_s18), 0  ;;  %162 = sbr.rel (%p159_p3) target bundleno = 353 (0x161), region = 32 }
   0xa   : > { %322 = vxpose.xlu0.b32.start [1/4] (short) (narrow) (!%p159_p3), %v318_v0, 8  ;;  %p193_p6 = scmp.lt.s32.totalorder (!%p159_p3), %s599_s21, 7  ;;  %422 = vmatprep.mubr.f32.mxu0 (!%p159_p3), %v706_v2  ;;  %v223_v4 = vshrl.u32 (!%p159_p3), %v222_v1, 7  ;;  %v214_v5 = vld [vmem:[%s810_s1] sm:$0xf] (!%p159_p3)  ;;  %v321_v34 = vld [vmem:[%s809_s0 + $0x18] sm:$0xff] (!%p159_p3) }
   0xb   : > { %493 = vmatprep.mubr.f32.mxu1 (!%p159_p3), %v706_v2  ;;  %v215_v6 = vld [vmem:[%s810_s1 + $0x4] sm:$0xf] (!%p159_p3)  ;;  %v216_v11 = vld [vmem:[%s810_s1 + $0x8] sm:$0xf] (!%p159_p3)  ;;  %v217_v12 = vld [vmem:[%s810_s1 + $0xc] sm:$0xf] (!%p159_p3) }
   0xc   : > { %v228_v7 = vsub.s32 (!%p159_p3), 1, %v223_v4  ;;  %v236_v8 = vsub.s32 (!%p159_p3), 3, %v223_v4  ;;  %v224_v9 = vsub.s32 (!%p159_p3), 0, %v223_v4  ;;  %v232_v10 = vsub.s32 (!%p159_p3), 2, %v223_v4 }
   0xd   : > { %vm354_vm0 = vcmask (!%p159_p3), 261120  }
   0xe   : > { %323 = vxpose.xlu0.b32.cont [2/4] (short) (narrow) (!%p159_p3), %v319_v3, 8  ;;  %v229_v14 = vrot.slane (!%p159_p3), %v214_v5, %v228_v7  ;;  %v245_v15 = vrot.slane (!%p159_p3), %v215_v6, %v228_v7  ;;  %v237_v16 = vrot.slane (!%p159_p3), %v214_v5, %v236_v8  ;;  %v253_v17 = vrot.slane (!%p159_p3), %v215_v6, %v236_v8 }
   0xf   : > { %v225_v18 = vrot.slane (!%p159_p3), %v214_v5, %v224_v9  ;;  %v241_v19 = vrot.slane (!%p159_p3), %v215_v6, %v224_v9  ;;  %v233_v20 = vrot.slane (!%p159_p3), %v214_v5, %v232_v10  ;;  %v249_v21 = vrot.slane (!%p159_p3), %v215_v6, %v232_v10 }
  0x10   : > { %s824_s13 = smov (!%p191_p5, %s692_s13), 1  ;;  %s826_s21 = smov (!%p193_p6, %s599_s21), 7  ;;  %v261_v25 = vrot.slane %v216_v11, %v228_v7  ;;  %v277_v26 = vrot.slane %v217_v12, %v228_v7  ;;  %v269_v27 = vrot.slane %v216_v11, %v236_v8  ;;  %v285_v28 = vrot.slane %v217_v12, %v236_v8 }
  0x11   : > { %s600_s28 = sshll.u32 %s824_s13, 3  ;;  %v257_v48 = vrot.slane %v216_v11, %v224_v9  ;;  %v273_v49 = vrot.slane %v217_v12, %v224_v9  ;;  %v265_v51 = vrot.slane %v216_v11, %v232_v10  ;;  %v281_v52 = vrot.slane %v217_v12, %v232_v10 }
  0x12   : > { %s769_s29 = sadd.s32 %s600_s28, %s826_s21  ;;  %324 = vxpose.xlu0.b32.cont [3/4] (short) (narrow) %v320_v13, 8 }
  0x13   : > { %s601_s9 = sshll.u32 %s769_s29, 3 }
  0x14   : > { %s198_s12 = scalar_lea.vmem %s811_s2, %s601_s9  ;;  %s208_s22 = scalar_lea.vmem %s812_s3, %s601_s9 }
  0x15   : > { %v211_v22 = vld [vmem:[%s198_s12 + $0x8] sm:$0xff]  ;;  %v213_v23 = vld [vmem:[%s198_s12 + $0x18] sm:$0xff]  ;;  %v210_v24 = vld [vmem:[%s198_s12] sm:$0xff] }
  0x16   : > { %v303_v29 = vmul.f32 %v229_v14, %v211_v22  ;;  %v307_v30 = vmul.f32 %v245_v15, %v211_v22  ;;  %v305_v31 = vmul.f32 %v237_v16, %v213_v23  ;;  %v309_v32 = vmul.f32 %v253_v17, %v213_v23  ;;  %v212_v33 = vld [vmem:[%s198_s12 + $0x10] sm:$0xff]  ;;  %325 = vxpose.xlu0.b32.end [4/4] (short) (narrow) %v321_v34, 8 }
  0x17   : > { %v302_v35 = vmul.f32 %v225_v18, %v210_v24  ;;  %v306_v36 = vmul.f32 %v241_v19, %v210_v24  ;;  %v304_v37 = vmul.f32 %v233_v20, %v212_v33  ;;  %v308_v38 = vmul.f32 %v249_v21, %v212_v33 }
  0x18   : > { %v609_v39 = vpack.c.bf16 %v307_v30, %v303_v29  ;;  %v617_v40 = vpack.c.bf16 %v309_v32, %v305_v31  ;;  %v311_v41 = vmul.f32 %v261_v25, %v211_v22  ;;  %v315_v42 = vmul.f32 %v277_v26, %v211_v22 }
  0x19   : > { %v611_v43 = vpack.c.bf16 %v306_v36, %v302_v35  ;;  %v619_v44 = vpack.c.bf16 %v308_v38, %v304_v37  ;;  %v313_v45 = vmul.f32 %v269_v27, %v213_v23  ;;  %v317_v46 = vmul.f32 %v285_v28, %v213_v23 }
  0x1a   : > { %610 = vmatprep.subr.bf16.mxu0 %v609_v39  ;;  %v613_v47 = vpack.c.bf16 %v315_v42, %v311_v41  ;;  %618 = vmatprep.subr.bf16.mxu1 %v617_v40  ;;  %v310_v53 = vmul.f32 %v257_v48, %v210_v24  ;;  %v314_v54 = vmul.f32 %v273_v49, %v210_v24 }
  0x1b   : > { %612 = vmatpush1.bf16.msra.mxu0 %v611_v43  ;;  %v621_v50 = vpack.c.bf16 %v317_v46, %v313_v45  ;;  %620 = vmatpush1.bf16.msra.mxu1 %v619_v44  ;;  %v312_v55 = vmul.f32 %v265_v51, %v212_v33  ;;  %v316_v56 = vmul.f32 %v281_v52, %v212_v33 }
  0x1c   : > { %614 = vmatprep.subr.bf16.mxu0 %v613_v47  ;;  %v615_v57 = vpack.c.bf16 %v314_v54, %v310_v53 }
  0x1d   : > { %622 = vmatprep.subr.bf16.mxu1 %v621_v50  ;;  %v623_v58 = vpack.c.bf16 %v316_v56, %v312_v55 }
  0x1f   : > { %616 = vmatpush1.bf16.msra.mxu0 %v615_v57  ;;  %624 = vmatpush1.bf16.msra.mxu1 %v623_v58 }
  0x8a   : > { %v338_v59 = vpop.trf.xlu0 }
  0x8b   : > { %605 = vmatmul.mubr.msk.f32.vlgmr.msra.gmra.mrb[0].mxu0 %vm354_vm0, %v338_v59  ;;  %606 = vmatmul.mubr.msk.f32.vlgmr.msra.gmra.mrb[0].mxu1 %vm354_vm0, %v338_v59 }
 0x15e   : > { %v424_v60 = vpop.f32.mrb[0].mxu0  ;;  %v495_v61 = vpop.f32.mrb[0].mxu1 }
 0x15f   : > { %500 = vst [vmem:[%s208_s22] sm:$0xff] %v424_v60  ;;  %502 = vst [vmem:[%s208_s22 + $0x10] sm:$0xff] %v495_v61  ;;  %v426_v62 = vpop.f32.mrb[1].mxu0  ;;  %v497_v63 = vpop.f32.mrb[1].mxu1 }
 0x160   : > { %501 = vst [vmem:[%s208_s22 + $0x8] sm:$0xff] %v426_v62  ;;  %503 = vst [vmem:[%s208_s22 + $0x18] sm:$0xff] %v497_v63 }
 0x161 PF: > { %s13_s16 = sadd.s32 1, %s704_s16   ;;  %s813_s12 = smov %s696_s14 }
 0x162   : > { %p10_p7 = scmp.ge.s32.totalorder %s13_s16, 6   ;;  %s814_s13 = smov %s700_s15 }
 0x163   : > { %s815_s14 = smov %s818_s17  ;;  %s816_s15 = smov %s822_s18 }
 0x164   :  { %12 = sbr.rel (!%p10_p7) target bundleno = 3 (0x3), region = 62 }

// kernel: permutation_layer_forward.2
= control target key start
LH: loop header
LB: loop body
LE: loop exit
PB: predicated region body
PF: predicated region fallthrough
CT: control target
= control target key end

     0   :  { %vm12_vm0 = vcmask 64512   ;;  %s4160_s0 = inlined_call_operand.vmem [shape: f32[4,8,8], index: 0, kind: input, shape index: {}]   ;;  %s4161_s1 = inlined_call_operand.vmem [shape: f32[4,8,8], index: 1, kind: output, shape index: {}]  }
   0x1   :  { %v8_v0 = vld [vmem:[%s4160_s0] sm:$0xff]  ;;  %v10_v1 = vld [vmem:[%s4160_s0 + $0x10] sm:$0xff]  ;;  %v9_v2 = vld [vmem:[%s4160_s0 + $0x8] sm:$0xff] }
   0x2   :  { %v13_v3 = vsel %vm12_vm0, %v8_v0, -inf  ;;  %v19_v4 = vsel %vm12_vm0, %v10_v1, -inf  ;;  %v3421_v5 = vld [vmem:[%s4160_s0 + $0x18] sm:$0xff]  ;;  %v16_v6 = vsel %vm12_vm0, %v9_v2, -inf }
   0x3   :  { %14 = vmax.xlane.f32.xlu0 %v13_v3  ;;  %20 = vmax.xlane.f32.xlu1 %v19_v4  ;;  %v22_v7 = vsel %vm12_vm0, %v3421_v5, -inf }
   0x7   :  { %17 = vmax.xlane.f32.xlu0 %v16_v6  ;;  %23 = vmax.xlane.f32.xlu1 %v22_v7 }
  0x90   :  { %v15_v8 = vpop.xlane.xlu0 %14  ;;  %v21_v9 = vpop.xlane.xlu1 %20 }
  0x91   :  { %v25_v10 = vsub.f32 %v8_v0, %v15_v8  ;;  %v27_v11 = vsub.f32 %v10_v1, %v21_v9 }
  0x93   :  { %v29_v12 = vmul.f32 1.442695, %v25_v10  ;;  %v33_v13 = vmul.f32 1.442695, %v27_v11 }
  0x94   :  { %v18_v14 = vpop.xlane.xlu0 %17  ;;  %v24_v15 = vpop.xlane.xlu1 %23 }
  0x95   :  { %2749 = vpow2.f32 %v29_v12  ;;  %v26_v16 = vsub.f32 %v9_v2, %v18_v14  ;;  %v28_v17 = vsub.f32 %v3421_v5, %v24_v15 }
  0x96   :  { %2751 = vpow2.f32 %v33_v13 }
  0x97   :  { %v31_v18 = vmul.f32 1.442695, %v26_v16  ;;  %v35_v19 = vmul.f32 1.442695, %v28_v17 }
  0x99   :  { %2753 = vpow2.f32 %v31_v18 }
  0x9a   :  { %2755 = vpow2.f32 %v35_v19 }
  0x9f   :  { %v2750_v20 = vpop.eup %2749 }
  0xa0   :  { %v2752_v21 = vpop.eup %2751  ;;  %v37_v22 = vsel %vm12_vm0, %v2750_v20, 0.0 }
  0xa1   :  { %38 = vadd.xlane.f32.xlu0 %v37_v22  ;;  %v43_v23 = vsel %vm12_vm0, %v2752_v21, 0.0 }
  0xa3   :  { %v2754_v24 = vpop.eup %2753 }
  0xa4   :  { %v2756_v25 = vpop.eup %2755  ;;  %v40_v26 = vsel %vm12_vm0, %v2754_v24, 0.0 }
  0xa5   :  { %44 = vadd.xlane.f32.xlu0 %v43_v23  ;;  %41 = vadd.xlane.f32.xlu1 %v40_v26  ;;  %v46_v27 = vsel %vm12_vm0, %v2756_v25, 0.0 }
  0xa9   :  { %47 = vadd.xlane.f32.xlu1 %v46_v27 }
 0x12e   :  { %v39_v28 = vpop.xlane.xlu0 %38 }
 0x12f   :  { %2757 = vlog2.f32 %v39_v28 }
 0x132   :  { %v42_v29 = vpop.xlane.xlu1 %41  ;;  %v45_v30 = vpop.xlane.xlu0 %44 }
 0x133   :  { %2759 = vlog2.f32 %v42_v29 }
 0x134   :  { %2761 = vlog2.f32 %v45_v30 }
 0x136   :  { %v48_v31 = vpop.xlane.xlu1 %47 }
 0x137   :  { %2763 = vlog2.f32 %v48_v31 }
 0x139   :  { %v2758_v32 = vpop.eup %2757 }
 0x13a   :  { %v50_v33 = vmul.f32 0.6931472, %v2758_v32 }
 0x13c   :  { %v57_v34 = vadd.f32 %v50_v33, %v15_v8 }
 0x13d   :  { %v2760_v35 = vpop.eup %2759 }
 0x13e   :  { %v2762_v36 = vpop.eup %2761  ;;  %v3431_v37 = vsub.f32 %v8_v0, %v57_v34  ;;  %v52_v38 = vmul.f32 0.6931472, %v2760_v35 }
 0x13f   :  { %v54_v39 = vmul.f32 0.6931472, %v2762_v36 }
 0x140   :  { %v65_v40 = vsel %vm12_vm0, %v3431_v37, -inf  ;;  %v58_v41 = vadd.f32 %v52_v38, %v18_v14 }
 0x141   :  { %v2764_v42 = vpop.eup %2763  ;;  %v66_v43 = vrot.slane %v65_v40, 4  ;;  %v59_v44 = vadd.f32 %v54_v39, %v21_v9 }
 0x142   :  { %v3435_v45 = vsub.f32 %v9_v2, %v58_v41  ;;  %v56_v46 = vmul.f32 0.6931472, %v2764_v42 }
 0x143   :  { %v3437_v47 = vsub.f32 %v10_v1, %v59_v44  ;;  %v67_v48 = vmax.f32 %v65_v40, %v66_v43 }
 0x144   :  { %v72_v49 = vsel %vm12_vm0, %v3435_v45, -inf  ;;  %v60_v50 = vadd.f32 %v56_v46, %v24_v15 }
 0x145   :  { %v73_v51 = vrot.slane %v72_v49, 4  ;;  %v79_v52 = vsel %vm12_vm0, %v3437_v47, -inf  ;;  %v68_v53 = vrot.slane %v67_v48, 2 }
 0x146   :  { %v80_v54 = vrot.slane %v79_v52, 4  ;;  %v3444_v55 = vsub.f32 %v3421_v5, %v60_v50 }
 0x147   :  { %v69_v56 = vmax.f32 %v67_v48, %v68_v53  ;;  %v74_v57 = vmax.f32 %v72_v49, %v73_v51 }
 0x148   :  { %v86_v58 = vsel %vm12_vm0, %v3444_v55, -inf  ;;  %v81_v59 = vmax.f32 %v79_v52, %v80_v54 }
 0x149   :  { %v87_v60 = vrot.slane %v86_v58, 4  ;;  %v70_v61 = vrot.slane %v69_v56, 1  ;;  %v75_v62 = vrot.slane %v74_v57, 2 }
 0x14a   :  { %v82_v63 = vrot.slane %v81_v59, 2 }
 0x14b   :  { %v71_v0 = vmax.f32 %v69_v56, %v70_v61  ;;  %v76_v1 = vmax.f32 %v74_v57, %v75_v62  ;;  %v88_v2 = vmax.f32 %v86_v58, %v87_v60 }
 0x14c   :  { %v83_v3 = vmax.f32 %v81_v59, %v82_v63 }
 0x14d   :  { %v93_v4 = vsub.f32 %v3431_v37, %v71_v0  ;;  %v77_v6 = vrot.slane %v76_v1, 1  ;;  %v89_v7 = vrot.slane %v88_v2, 2 }
 0x14e   :  { %v84_v5 = vrot.slane %v83_v3, 1 }
 0x14f   :  { %v97_v8 = vmul.f32 1.442695, %v93_v4  ;;  %v78_v9 = vmax.f32 %v76_v1, %v77_v6  ;;  %v90_v10 = vmax.f32 %v88_v2, %v89_v7 }
 0x150   :  { %v85_v11 = vmax.f32 %v83_v3, %v84_v5 }
 0x151   :  { %2765 = vpow2.f32 %v97_v8  ;;  %v94_v12 = vsub.f32 %v3435_v45, %v78_v9  ;;  %v91_v13 = vrot.slane %v90_v10, 1 }
 0x152   :  { %v95_v14 = vsub.f32 %v3437_v47, %v85_v11 }
 0x153   :  { %v99_v15 = vmul.f32 1.442695, %v94_v12  ;;  %v92_v16 = vmax.f32 %v90_v10, %v91_v13 }
 0x154   :  { %v101_v17 = vmul.f32 1.442695, %v95_v14 }
 0x155   :  { %2767 = vpow2.f32 %v99_v15  ;;  %v96_v18 = vsub.f32 %v3444_v55, %v92_v16 }
 0x156   :  { %2769 = vpow2.f32 %v101_v17 }
 0x157   :  { %v103_v19 = vmul.f32 1.442695, %v96_v18 }
 0x159   :  { %2771 = vpow2.f32 %v103_v19 }
 0x15b   :  { %v2766_v20 = vpop.eup %2765 }
 0x15c   :  { %v105_v21 = vsel %vm12_vm0, %v2766_v20, 0.0 }
 0x15d   :  { %v106_v22 = vrot.slane %v105_v21, 4 }
 0x15f   :  { %v2768_v23 = vpop.eup %2767  ;;  %v107_v24 = vadd.f32 %v106_v22, %v105_v21 }
 0x160   :  { %v2770_v25 = vpop.eup %2769  ;;  %v112_v26 = vsel %vm12_vm0, %v2768_v23, 0.0 }
 0x161   :  { %v108_v27 = vrot.slane %v107_v24, 2  ;;  %v113_v28 = vrot.slane %v112_v26, 4  ;;  %v119_v29 = vsel %vm12_vm0, %v2770_v25, 0.0 }
 0x162   :  { %v120_v30 = vrot.slane %v119_v29, 4 }
 0x163   :  { %v2772_v31 = vpop.eup %2771  ;;  %v109_v32 = vadd.f32 %v108_v27, %v107_v24  ;;  %v114_v33 = vadd.f32 %v113_v28, %v112_v26 }
 0x164   :  { %v121_v34 = vadd.f32 %v120_v30, %v119_v29  ;;  %v126_v35 = vsel %vm12_vm0, %v2772_v31, 0.0 }
 0x165   :  { %v110_v36 = vrot.slane %v109_v32, 1  ;;  %v115_v38 = vrot.slane %v114_v33, 2  ;;  %v127_v39 = vrot.slane %v126_v35, 4 }
 0x166   :  { %v122_v40 = vrot.slane %v121_v34, 2 }
 0x167   :  { %v111_v41 = vadd.f32 %v110_v36, %v109_v32  ;;  %v116_v42 = vadd.f32 %v115_v38, %v114_v33  ;;  %v128_v43 = vadd.f32 %v127_v39, %v126_v35 }
 0x168   :  { %v123_v44 = vadd.f32 %v122_v40, %v121_v34 }
 0x169   :  { %2773 = vlog2.f32 %v111_v41  ;;  %v117_v46 = vrot.slane %v116_v42, 1  ;;  %v129_v48 = vrot.slane %v128_v43, 2 }
 0x16a   :  { %v124_v49 = vrot.slane %v123_v44, 1 }
 0x16b   :  { %v118_v50 = vadd.f32 %v117_v46, %v116_v42  ;;  %v130_v51 = vadd.f32 %v129_v48, %v128_v43 }
 0x16c   :  { %v125_v52 = vadd.f32 %v124_v49, %v123_v44 }
 0x16d   :  { %2775 = vlog2.f32 %v118_v50  ;;  %v131_v53 = vrot.slane %v130_v51, 1 }
 0x16e   :  { %2777 = vlog2.f32 %v125_v52 }
 0x16f   :  { %v132_v54 = vadd.f32 %v131_v53, %v130_v51 }
 0x171   :  { %2779 = vlog2.f32 %v132_v54 }
 0x173   :  { %v2774_v56 = vpop.eup %2773 }
 0x174   :  { %v134_v57 = vmul.f32 0.6931472, %v2774_v56 }
 0x176   :  { %v141_v58 = vadd.f32 %v134_v57, %v71_v0 }
 0x177   :  { %v2776_v59 = vpop.eup %2775 }
 0x178   :  { %v2778_v60 = vpop.eup %2777  ;;  %v145_v61 = vsub.f32 %v3431_v37, %v141_v58  ;;  %v136_v62 = vmul.f32 0.6931472, %v2776_v59 }
 0x179   :  { %v138_v63 = vmul.f32 0.6931472, %v2778_v60 }
 0x17a   :  { %v149_v1 = vsel %vm12_vm0, %v145_v61, -inf  ;;  %v142_v2 = vadd.f32 %v136_v62, %v78_v9 }
 0x17b   :  { %v2780_v3 = vpop.eup %2779  ;;  %150 = vmax.xlane.f32.xlu0 %v149_v1  ;;  %v143_v4 = vadd.f32 %v138_v63, %v85_v11 }
 0x17c   :  { %v146_v6 = vsub.f32 %v3435_v45, %v142_v2  ;;  %v140_v7 = vmul.f32 0.6931472, %v2780_v3 }
 0x17d   :  { %v147_v5 = vsub.f32 %v3437_v47, %v143_v4 }
 0x17e   :  { %v152_v8 = vsel %vm12_vm0, %v146_v6, -inf  ;;  %v144_v0 = vadd.f32 %v140_v7, %v92_v16 }
 0x17f   :  { %153 = vmax.xlane.f32.xlu1 %v152_v8  ;;  %v155_v10 = vsel %vm12_vm0, %v147_v5, -inf }
 0x180   :  { %156 = vmax.xlane.f32.xlu0 %v155_v10  ;;  %v148_v37 = vsub.f32 %v3444_v55, %v144_v0 }
 0x182   :  { %v158_v12 = vsel %vm12_vm0, %v148_v37, -inf }
 0x183   :  { %159 = vmax.xlane.f32.xlu1 %v158_v12 }
 0x208   :  { %v151_v9 = vpop.xlane.xlu0 %150 }
 0x209   :  { %v161_v13 = vsub.f32 %v145_v61, %v151_v9 }
 0x20b   :  { %v165_v11 = vmul.f32 1.442695, %v161_v13 }
 0x20c   :  { %v154_v14 = vpop.xlane.xlu1 %153 }
 0x20d   :  { %2781 = vpow2.f32 %v165_v11  ;;  %v162_v45 = vsub.f32 %v146_v6, %v154_v14  ;;  %v157_v15 = vpop.xlane.xlu0 %156 }
 0x20e   :  { %v163_v47 = vsub.f32 %v147_v5, %v157_v15 }
 0x20f   :  { %v167_v17 = vmul.f32 1.442695, %v162_v45 }
 0x210   :  { %v169_v18 = vmul.f32 1.442695, %v163_v47  ;;  %v160_v16 = vpop.xlane.xlu1 %159 }
 0x211   :  { %2783 = vpow2.f32 %v167_v17  ;;  %v164_v19 = vsub.f32 %v148_v37, %v160_v16 }
 0x212   :  { %2785 = vpow2.f32 %v169_v18 }
 0x213   :  { %v171_v20 = vmul.f32 1.442695, %v164_v19 }
 0x215   :  { %2787 = vpow2.f32 %v171_v20 }
 0x217   :  { %v2782_v55 = vpop.eup %2781 }
 0x218   :  { %v173_v21 = vsel %vm12_vm0, %v2782_v55, 0.0 }
 0x219   :  { %174 = vadd.xlane.f32.xlu0 %v173_v21 }
 0x21b   :  { %v2784_v22 = vpop.eup %2783 }
 0x21c   :  { %v2786_v23 = vpop.eup %2785  ;;  %v176_v24 = vsel %vm12_vm0, %v2784_v22, 0.0 }
 0x21d   :  { %177 = vadd.xlane.f32.xlu1 %v176_v24  ;;  %v179_v25 = vsel %vm12_vm0, %v2786_v23, 0.0 }
 0x21e   :  { %180 = vadd.xlane.f32.xlu0 %v179_v25 }
 0x21f   :  { %v2788_v26 = vpop.eup %2787 }
 0x220   :  { %v182_v27 = vsel %vm12_vm0, %v2788_v26, 0.0 }
 0x221   :  { %183 = vadd.xlane.f32.xlu1 %v182_v27 }
 0x2a6   :  { %v175_v28 = vpop.xlane.xlu0 %174 }
 0x2a7   :  { %2789 = vlog2.f32 %v175_v28 }
 0x2aa   :  { %v178_v29 = vpop.xlane.xlu1 %177 }
 0x2ab   :  { %2791 = vlog2.f32 %v178_v29  ;;  %v181_v30 = vpop.xlane.xlu0 %180 }
 0x2ac   :  { %2793 = vlog2.f32 %v181_v30 }
 0x2ae   :  { %v184_v31 = vpop.xlane.xlu1 %183 }
 0x2af   :  { %2795 = vlog2.f32 %v184_v31 }
 0x2b1   :  { %v2790_v32 = vpop.eup %2789 }
 0x2b2   :  { %v186_v33 = vmul.f32 0.6931472, %v2790_v32 }
 0x2b4   :  { %v193_v34 = vadd.f32 %v186_v33, %v151_v9 }
 0x2b5   :  { %v2792_v35 = vpop.eup %2791 }
 0x2b6   :  { %v2794_v36 = vpop.eup %2793  ;;  %v3468_v38 = vsub.f32 %v145_v61, %v193_v34  ;;  %v188_v39 = vmul.f32 0.6931472, %v2792_v35 }
 0x2b7   :  { %v190_v40 = vmul.f32 0.6931472, %v2794_v36 }
 0x2b8   :  { %v201_v41 = vsel %vm12_vm0, %v3468_v38, -inf  ;;  %v194_v42 = vadd.f32 %v188_v39, %v154_v14 }
 0x2b9   :  { %v2796_v43 = vpop.eup %2795  ;;  %v202_v44 = vrot.slane %v201_v41, 4  ;;  %v195_v46 = vadd.f32 %v190_v40, %v157_v15 }
 0x2ba   :  { %v3472_v48 = vsub.f32 %v146_v6, %v194_v42  ;;  %v192_v49 = vmul.f32 0.6931472, %v2796_v43 }
 0x2bb   :  { %v3474_v50 = vsub.f32 %v147_v5, %v195_v46  ;;  %v203_v51 = vmax.f32 %v201_v41, %v202_v44 }
 0x2bc   :  { %v208_v52 = vsel %vm12_vm0, %v3472_v48, -inf  ;;  %v196_v53 = vadd.f32 %v192_v49, %v160_v16 }
 0x2bd   :  { %v209_v54 = vrot.slane %v208_v52, 4  ;;  %v215_v56 = vsel %vm12_vm0, %v3474_v50, -inf  ;;  %v204_v57 = vrot.slane %v203_v51, 2 }
 0x2be   :  { %v216_v58 = vrot.slane %v215_v56, 4  ;;  %v3480_v59 = vsub.f32 %v148_v37, %v196_v53 }
 0x2bf   :  { %v205_v60 = vmax.f32 %v203_v51, %v204_v57  ;;  %v210_v61 = vmax.f32 %v208_v52, %v209_v54 }
 0x2c0   :  { %v222_v62 = vsel %vm12_vm0, %v3480_v59, -inf  ;;  %v217_v63 = vmax.f32 %v215_v56, %v216_v58 }
 0x2c1   :  { %v223_v1 = vrot.slane %v222_v62, 4  ;;  %v206_v2 = vrot.slane %v205_v60, 1  ;;  %v211_v3 = vrot.slane %v210_v61, 2 }
 0x2c2   :  { %v218_v4 = vrot.slane %v217_v63, 2 }
 0x2c3   :  { %v207_v6 = vmax.f32 %v205_v60, %v206_v2  ;;  %v212_v7 = vmax.f32 %v210_v61, %v211_v3  ;;  %v224_v5 = vmax.f32 %v222_v62, %v223_v1 }
 0x2c4   :  { %v219_v8 = vmax.f32 %v217_v63, %v218_v4 }
 0x2c5   :  { %v229_v0 = vsub.f32 %v3468_v38, %v207_v6  ;;  %v213_v10 = vrot.slane %v212_v7, 1  ;;  %v225_v12 = vrot.slane %v224_v5, 2 }
 0x2c6   :  { %v220_v37 = vrot.slane %v219_v8, 1 }
 0x2c7   :  { %v233_v9 = vmul.f32 1.442695, %v229_v0  ;;  %v214_v13 = vmax.f32 %v212_v7, %v213_v10  ;;  %v226_v11 = vmax.f32 %v224_v5, %v225_v12 }
 0x2c8   :  { %v221_v14 = vmax.f32 %v219_v8, %v220_v37 }
 0x2c9   :  { %2797 = vpow2.f32 %v233_v9  ;;  %v230_v45 = vsub.f32 %v3472_v48, %v214_v13  ;;  %v227_v15 = vrot.slane %v226_v11, 1 }
 0x2ca   :  { %v231_v47 = vsub.f32 %v3474_v50, %v221_v14 }
 0x2cb   :  { %v235_v17 = vmul.f32 1.442695, %v230_v45  ;;  %v228_v18 = vmax.f32 %v226_v11, %v227_v15 }
 0x2cc   :  { %v237_v16 = vmul.f32 1.442695, %v231_v47 }
 0x2cd   :  { %2799 = vpow2.f32 %v235_v17  ;;  %v232_v19 = vsub.f32 %v3480_v59, %v228_v18 }
 0x2ce   :  { %2801 = vpow2.f32 %v237_v16 }
 0x2cf   :  { %v239_v20 = vmul.f32 1.442695, %v232_v19 }
 0x2d1   :  { %2803 = vpow2.f32 %v239_v20 }
 0x2d3   :  { %v2798_v55 = vpop.eup %2797 }
 0x2d4   :  { %v241_v21 = vsel %vm12_vm0, %v2798_v55, 0.0 }
 0x2d5   :  { %v242_v22 = vrot.slane %v241_v21, 4 }
 0x2d7   :  { %v2800_v23 = vpop.eup %2799  ;;  %v243_v24 = vadd.f32 %v242_v22, %v241_v21 }
 0x2d8   :  { %v2802_v25 = vpop.eup %2801  ;;  %v248_v26 = vsel %vm12_vm0, %v2800_v23, 0.0 }
 0x2d9   :  { %v244_v27 = vrot.slane %v243_v24, 2  ;;  %v249_v28 = vrot.slane %v248_v26, 4  ;;  %v255_v29 = vsel %vm12_vm0, %v2802_v25, 0.0 }
 0x2da   :  { %v256_v30 = vrot.slane %v255_v29, 4 }
 0x2db   :  { %v2804_v31 = vpop.eup %2803  ;;  %v245_v32 = vadd.f32 %v244_v27, %v243_v24  ;;  %v250_v33 = vadd.f32 %v249_v28, %v248_v26 }
 0x2dc   :  { %v257_v34 = vadd.f32 %v256_v30, %v255_v29  ;;  %v262_v35 = vsel %vm12_vm0, %v2804_v31, 0.0 }
 0x2dd   :  { %v246_v36 = vrot.slane %v245_v32, 1  ;;  %v251_v39 = vrot.slane %v250_v33, 2  ;;  %v263_v40 = vrot.slane %v262_v35, 4 }
 0x2de   :  { %v258_v41 = vrot.slane %v257_v34, 2 }
 0x2df   :  { %v247_v42 = vadd.f32 %v246_v36, %v245_v32  ;;  %v252_v43 = vadd.f32 %v251_v39, %v250_v33  ;;  %v264_v44 = vadd.f32 %v263_v40, %v262_v35 }
 0x2e0   :  { %v259_v46 = vadd.f32 %v258_v41, %v257_v34 }
 0x2e1   :  { %2805 = vlog2.f32 %v247_v42  ;;  %v253_v49 = vrot.slane %v252_v43, 1  ;;  %v265_v51 = vrot.slane %v264_v44, 2 }
 0x2e2   :  { %v260_v52 = vrot.slane %v259_v46, 1 }
 0x2e3   :  { %v254_v53 = vadd.f32 %v253_v49, %v252_v43  ;;  %v266_v54 = vadd.f32 %v265_v51, %v264_v44 }
 0x2e4   :  { %v261_v56 = vadd.f32 %v260_v52, %v259_v46 }
 0x2e5   :  { %2807 = vlog2.f32 %v254_v53  ;;  %v267_v57 = vrot.slane %v266_v54, 1 }
 0x2e6   :  { %2809 = vlog2.f32 %v261_v56 }
 0x2e7   :  { %v268_v58 = vadd.f32 %v267_v57, %v266_v54 }
 0x2e9   :  { %2811 = vlog2.f32 %v268_v58 }
 0x2eb   :  { %v2806_v60 = vpop.eup %2805 }
 0x2ec   :  { %v270_v61 = vmul.f32 0.6931472, %v2806_v60 }
 0x2ee   :  { %v277_v62 = vadd.f32 %v270_v61, %v207_v6 }
 0x2ef   :  { %v2808_v63 = vpop.eup %2807 }
 0x2f0   :  { %v2810_v1 = vpop.eup %2809  ;;  %v281_v2 = vsub.f32 %v3468_v38, %v277_v62  ;;  %v272_v3 = vmul.f32 0.6931472, %v2808_v63 }
 0x2f1   :  { %v274_v4 = vmul.f32 0.6931472, %v2810_v1 }
 0x2f2   :  { %v285_v7 = vsel %vm12_vm0, %v281_v2, -inf  ;;  %v278_v5 = vadd.f32 %v272_v3, %v214_v13 }
 0x2f3   :  { %v2812_v8 = vpop.eup %2811  ;;  %286 = vmax.xlane.f32.xlu0 %v285_v7  ;;  %v279_v0 = vadd.f32 %v274_v4, %v221_v14 }
 0x2f4   :  { %v282_v10 = vsub.f32 %v3472_v48, %v278_v5  ;;  %v276_v12 = vmul.f32 0.6931472, %v2812_v8 }
 0x2f5   :  { %v283_v37 = vsub.f32 %v3474_v50, %v279_v0 }
 0x2f6   :  { %v288_v9 = vsel %vm12_vm0, %v282_v10, -inf  ;;  %v280_v6 = vadd.f32 %v276_v12, %v228_v18 }
 0x2f7   :  { %289 = vmax.xlane.f32.xlu1 %v288_v9  ;;  %v291_v11 = vsel %vm12_vm0, %v283_v37, -inf }
 0x2f8   :  { %292 = vmax.xlane.f32.xlu0 %v291_v11  ;;  %v284_v38 = vsub.f32 %v3480_v59, %v280_v6 }
 0x2fa   :  { %v294_v45 = vsel %vm12_vm0, %v284_v38, -inf }
 0x2fb   :  { %295 = vmax.xlane.f32.xlu1 %v294_v45 }
 0x380   :  { %v287_v13 = vpop.xlane.xlu0 %286 }
 0x381   :  { %v297_v15 = vsub.f32 %v281_v2, %v287_v13 }
 0x383   :  { %v301_v14 = vmul.f32 1.442695, %v297_v15 }
 0x384   :  { %v290_v47 = vpop.xlane.xlu1 %289 }
 0x385   :  { %2813 = vpow2.f32 %v301_v14  ;;  %v298_v48 = vsub.f32 %v282_v10, %v290_v47  ;;  %v293_v17 = vpop.xlane.xlu0 %292 }
 0x386   :  { %v299_v50 = vsub.f32 %v283_v37, %v293_v17 }
 0x387   :  { %v303_v16 = vmul.f32 1.442695, %v298_v48 }
 0x388   :  { %v305_v19 = vmul.f32 1.442695, %v299_v50  ;;  %v296_v18 = vpop.xlane.xlu1 %295 }
 0x389   :  { %2815 = vpow2.f32 %v303_v16  ;;  %v300_v20 = vsub.f32 %v284_v38, %v296_v18 }
 0x38a   :  { %2817 = vpow2.f32 %v305_v19 }
 0x38b   :  { %v307_v55 = vmul.f32 1.442695, %v300_v20 }
 0x38d   :  { %2819 = vpow2.f32 %v307_v55 }
 0x38f   :  { %v2814_v59 = vpop.eup %2813 }
 0x390   :  { %v309_v21 = vsel %vm12_vm0, %v2814_v59, 0.0 }
 0x391   :  { %310 = vadd.xlane.f32.xlu0 %v309_v21 }
 0x393   :  { %v2816_v22 = vpop.eup %2815 }
 0x394   :  { %v2818_v23 = vpop.eup %2817  ;;  %v312_v24 = vsel %vm12_vm0, %v2816_v22, 0.0 }
 0x395   :  { %313 = vadd.xlane.f32.xlu1 %v312_v24  ;;  %v315_v25 = vsel %vm12_vm0, %v2818_v23, 0.0 }
 0x396   :  { %316 = vadd.xlane.f32.xlu0 %v315_v25 }
 0x397   :  { %v2820_v26 = vpop.eup %2819 }
 0x398   :  { %v318_v27 = vsel %vm12_vm0, %v2820_v26, 0.0 }
 0x399   :  { %319 = vadd.xlane.f32.xlu1 %v318_v27 }
 0x41e   :  { %v311_v28 = vpop.xlane.xlu0 %310 }
 0x41f   :  { %2821 = vlog2.f32 %v311_v28 }
 0x422   :  { %v314_v29 = vpop.xlane.xlu1 %313 }
 0x423   :  { %2823 = vlog2.f32 %v314_v29  ;;  %v317_v30 = vpop.xlane.xlu0 %316 }
 0x424   :  { %2825 = vlog2.f32 %v317_v30 }
 0x426   :  { %v320_v31 = vpop.xlane.xlu1 %319 }
 0x427   :  { %2827 = vlog2.f32 %v320_v31 }
 0x429   :  { %v2822_v32 = vpop.eup %2821 }
 0x42a   :  { %v322_v33 = vmul.f32 0.6931472, %v2822_v32 }
 0x42c   :  { %v329_v34 = vadd.f32 %v322_v33, %v287_v13 }
 0x42d   :  { %v2824_v35 = vpop.eup %2823 }
 0x42e   :  { %v2826_v36 = vpop.eup %2825  ;;  %v3504_v39 = vsub.f32 %v281_v2, %v329_v34  ;;  %v324_v40 = vmul.f32 0.6931472, %v2824_v35 }
 0x42f   :  { %v326_v41 = vmul.f32 0.6931472, %v2826_v36 }
 0x430   :  { %v337_v42 = vsel %vm12_vm0, %v3504_v39, -inf  ;;  %v330_v43 = vadd.f32 %v324_v40, %v290_v47 }
 0x431   :  { %v2828_v44 = vpop.eup %2827  ;;  %v338_v46 = vrot.slane %v337_v42, 4  ;;  %v331_v49 = vadd.f32 %v326_v41, %v293_v17 }
 0x432   :  { %v3508_v51 = vsub.f32 %v282_v10, %v330_v43  ;;  %v328_v52 = vmul.f32 0.6931472, %v2828_v44 }
 0x433   :  { %v3510_v53 = vsub.f32 %v283_v37, %v331_v49  ;;  %v339_v54 = vmax.f32 %v337_v42, %v338_v46 }
 0x434   :  { %v344_v56 = vsel %vm12_vm0, %v3508_v51, -inf  ;;  %v332_v57 = vadd.f32 %v328_v52, %v296_v18 }
 0x435   :  { %v345_v58 = vrot.slane %v344_v56, 4  ;;  %v351_v60 = vsel %vm12_vm0, %v3510_v53, -inf  ;;  %v340_v61 = vrot.slane %v339_v54, 2 }
 0x436   :  { %v352_v62 = vrot.slane %v351_v60, 4  ;;  %v3516_v63 = vsub.f32 %v284_v38, %v332_v57 }
 0x437   :  { %v341_v1 = vmax.f32 %v339_v54, %v340_v61  ;;  %v346_v2 = vmax.f32 %v344_v56, %v345_v58 }
 0x438   :  { %v358_v3 = vsel %vm12_vm0, %v3516_v63, -inf  ;;  %v353_v4 = vmax.f32 %v351_v60, %v352_v62 }
 0x439   :  { %v359_v7 = vrot.slane %v358_v3, 4  ;;  %v342_v5 = vrot.slane %v341_v1, 1  ;;  %v347_v8 = vrot.slane %v346_v2, 2 }
 0x43a   :  { %v354_v0 = vrot.slane %v353_v4, 2 }
 0x43b   :  { %v343_v10 = vmax.f32 %v341_v1, %v342_v5  ;;  %v348_v12 = vmax.f32 %v346_v2, %v347_v8  ;;  %v360_v37 = vmax.f32 %v358_v3, %v359_v7 }
 0x43c   :  { %v355_v9 = vmax.f32 %v353_v4, %v354_v0 }
 0x43d   :  { %v365_v6 = vsub.f32 %v3504_v39, %v343_v10  ;;  %v349_v11 = vrot.slane %v348_v12, 1  ;;  %v361_v45 = vrot.slane %v360_v37, 2 }
 0x43e   :  { %v356_v38 = vrot.slane %v355_v9, 1 }
 0x43f   :  { %v369_v13 = vmul.f32 1.442695, %v365_v6  ;;  %v350_v15 = vmax.f32 %v348_v12, %v349_v11  ;;  %v362_v14 = vmax.f32 %v360_v37, %v361_v45 }
 0x440   :  { %v357_v47 = vmax.f32 %v355_v9, %v356_v38 }
 0x441   :  { %2829 = vpow2.f32 %v369_v13  ;;  %v366_v48 = vsub.f32 %v3508_v51, %v350_v15  ;;  %v363_v17 = vrot.slane %v362_v14, 1 }
 0x442   :  { %v367_v50 = vsub.f32 %v3510_v53, %v357_v47 }
 0x443   :  { %v371_v16 = vmul.f32 1.442695, %v366_v48  ;;  %v364_v19 = vmax.f32 %v362_v14, %v363_v17 }
 0x444   :  { %v373_v18 = vmul.f32 1.442695, %v367_v50 }
 0x445   :  { %2831 = vpow2.f32 %v371_v16  ;;  %v368_v20 = vsub.f32 %v3516_v63, %v364_v19 }
 0x446   :  { %2833 = vpow2.f32 %v373_v18 }
 0x447   :  { %v375_v55 = vmul.f32 1.442695, %v368_v20 }
 0x449   :  { %2835 = vpow2.f32 %v375_v55 }
 0x44b   :  { %v2830_v59 = vpop.eup %2829 }
 0x44c   :  { %v377_v21 = vsel %vm12_vm0, %v2830_v59, 0.0 }
 0x44d   :  { %v378_v22 = vrot.slane %v377_v21, 4 }
 0x44f   :  { %v2832_v23 = vpop.eup %2831  ;;  %v379_v24 = vadd.f32 %v378_v22, %v377_v21 }
 0x450   :  { %v2834_v25 = vpop.eup %2833  ;;  %v384_v26 = vsel %vm12_vm0, %v2832_v23, 0.0 }
 0x451   :  { %v380_v27 = vrot.slane %v379_v24, 2  ;;  %v385_v28 = vrot.slane %v384_v26, 4  ;;  %v391_v29 = vsel %vm12_vm0, %v2834_v25, 0.0 }
 0x452   :  { %v392_v30 = vrot.slane %v391_v29, 4 }
 0x453   :  { %v2836_v31 = vpop.eup %2835  ;;  %v381_v32 = vadd.f32 %v380_v27, %v379_v24  ;;  %v386_v33 = vadd.f32 %v385_v28, %v384_v26 }
 0x454   :  { %v393_v34 = vadd.f32 %v392_v30, %v391_v29  ;;  %v398_v35 = vsel %vm12_vm0, %v2836_v31, 0.0 }
 0x455   :  { %v382_v36 = vrot.slane %v381_v32, 1  ;;  %v387_v40 = vrot.slane %v386_v33, 2  ;;  %v399_v41 = vrot.slane %v398_v35, 4 }
 0x456   :  { %v394_v42 = vrot.slane %v393_v34, 2 }
 0x457   :  { %v383_v43 = vadd.f32 %v382_v36, %v381_v32  ;;  %v388_v44 = vadd.f32 %v387_v40, %v386_v33  ;;  %v400_v46 = vadd.f32 %v399_v41, %v398_v35 }
 0x458   :  { %v395_v49 = vadd.f32 %v394_v42, %v393_v34 }
 0x459   :  { %2837 = vlog2.f32 %v383_v43  ;;  %v389_v52 = vrot.slane %v388_v44, 1  ;;  %v401_v54 = vrot.slane %v400_v46, 2 }
 0x45a   :  { %v396_v56 = vrot.slane %v395_v49, 1 }
 0x45b   :  { %v390_v57 = vadd.f32 %v389_v52, %v388_v44  ;;  %v402_v58 = vadd.f32 %v401_v54, %v400_v46 }
 0x45c   :  { %v397_v60 = vadd.f32 %v396_v56, %v395_v49 }
 0x45d   :  { %2839 = vlog2.f32 %v390_v57  ;;  %v403_v61 = vrot.slane %v402_v58, 1 }
 0x45e   :  { %2841 = vlog2.f32 %v397_v60 }
 0x45f   :  { %v404_v62 = vadd.f32 %v403_v61, %v402_v58 }
 0x461   :  { %2843 = vlog2.f32 %v404_v62 }
 0x463   :  { %v2838_v1 = vpop.eup %2837 }
 0x464   :  { %v406_v2 = vmul.f32 0.6931472, %v2838_v1 }
 0x466   :  { %v413_v3 = vadd.f32 %v406_v2, %v343_v10 }
 0x467   :  { %v2840_v4 = vpop.eup %2839 }
 0x468   :  { %v2842_v7 = vpop.eup %2841  ;;  %v417_v5 = vsub.f32 %v3504_v39, %v413_v3  ;;  %v408_v8 = vmul.f32 0.6931472, %v2840_v4 }
 0x469   :  { %v410_v0 = vmul.f32 0.6931472, %v2842_v7 }
 0x46a   :  { %v421_v12 = vsel %vm12_vm0, %v417_v5, -inf  ;;  %v414_v37 = vadd.f32 %v408_v8, %v350_v15 }
 0x46b   :  { %v2844_v9 = vpop.eup %2843  ;;  %422 = vmax.xlane.f32.xlu0 %v421_v12  ;;  %v415_v6 = vadd.f32 %v410_v0, %v357_v47 }
 0x46c   :  { %v418_v11 = vsub.f32 %v3508_v51, %v414_v37  ;;  %v412_v45 = vmul.f32 0.6931472, %v2844_v9 }
 0x46d   :  { %v419_v38 = vsub.f32 %v3510_v53, %v415_v6 }
 0x46e   :  { %v424_v13 = vsel %vm12_vm0, %v418_v11, -inf  ;;  %v416_v10 = vadd.f32 %v412_v45, %v364_v19 }
 0x46f   :  { %425 = vmax.xlane.f32.xlu1 %v424_v13  ;;  %v427_v14 = vsel %vm12_vm0, %v419_v38, -inf }
 0x470   :  { %428 = vmax.xlane.f32.xlu0 %v427_v14  ;;  %v420_v39 = vsub.f32 %v3516_v63, %v416_v10 }
 0x472   :  { %v430_v48 = vsel %vm12_vm0, %v420_v39, -inf }
 0x473   :  { %431 = vmax.xlane.f32.xlu1 %v430_v48 }
 0x4f8   :  { %v423_v15 = vpop.xlane.xlu0 %422 }
 0x4f9   :  { %v433_v17 = vsub.f32 %v417_v5, %v423_v15 }
 0x4fb   :  { %v437_v47 = vmul.f32 1.442695, %v433_v17 }
 0x4fc   :  { %v426_v50 = vpop.xlane.xlu1 %425 }
 0x4fd   :  { %2845 = vpow2.f32 %v437_v47  ;;  %v434_v51 = vsub.f32 %v418_v11, %v426_v50  ;;  %v429_v16 = vpop.xlane.xlu0 %428 }
 0x4fe   :  { %v435_v53 = vsub.f32 %v419_v38, %v429_v16 }
 0x4ff   :  { %v439_v18 = vmul.f32 1.442695, %v434_v51 }
 0x500   :  { %v441_v20 = vmul.f32 1.442695, %v435_v53  ;;  %v432_v19 = vpop.xlane.xlu1 %431 }
 0x501   :  { %2847 = vpow2.f32 %v439_v18  ;;  %v436_v55 = vsub.f32 %v420_v39, %v432_v19 }
 0x502   :  { %2849 = vpow2.f32 %v441_v20 }
 0x503   :  { %v443_v59 = vmul.f32 1.442695, %v436_v55 }
 0x505   :  { %2851 = vpow2.f32 %v443_v59 }
 0x507   :  { %v2846_v63 = vpop.eup %2845 }
 0x508   :  { %v445_v21 = vsel %vm12_vm0, %v2846_v63, 0.0 }
 0x509   :  { %446 = vadd.xlane.f32.xlu0 %v445_v21 }
 0x50b   :  { %v2848_v22 = vpop.eup %2847 }
 0x50c   :  { %v2850_v23 = vpop.eup %2849  ;;  %v448_v24 = vsel %vm12_vm0, %v2848_v22, 0.0 }
 0x50d   :  { %449 = vadd.xlane.f32.xlu1 %v448_v24  ;;  %v451_v25 = vsel %vm12_vm0, %v2850_v23, 0.0 }
 0x50e   :  { %452 = vadd.xlane.f32.xlu0 %v451_v25 }
 0x50f   :  { %v2852_v26 = vpop.eup %2851 }
 0x510   :  { %v454_v27 = vsel %vm12_vm0, %v2852_v26, 0.0 }
 0x511   :  { %455 = vadd.xlane.f32.xlu1 %v454_v27 }
 0x596   :  { %v447_v28 = vpop.xlane.xlu0 %446 }
 0x597   :  { %2853 = vlog2.f32 %v447_v28 }
 0x59a   :  { %v450_v29 = vpop.xlane.xlu1 %449 }
 0x59b   :  { %2855 = vlog2.f32 %v450_v29  ;;  %v453_v30 = vpop.xlane.xlu0 %452 }
 0x59c   :  { %2857 = vlog2.f32 %v453_v30 }
 0x59e   :  { %v456_v31 = vpop.xlane.xlu1 %455 }
 0x59f   :  { %2859 = vlog2.f32 %v456_v31 }
 0x5a1   :  { %v2854_v32 = vpop.eup %2853 }
 0x5a2   :  { %v458_v33 = vmul.f32 0.6931472, %v2854_v32 }
 0x5a4   :  { %v465_v34 = vadd.f32 %v458_v33, %v423_v15 }
 0x5a5   :  { %v2856_v35 = vpop.eup %2855 }
 0x5a6   :  { %v2858_v36 = vpop.eup %2857  ;;  %v3540_v40 = vsub.f32 %v417_v5, %v465_v34  ;;  %v460_v41 = vmul.f32 0.6931472, %v2856_v35 }
 0x5a7   :  { %v462_v42 = vmul.f32 0.6931472, %v2858_v36 }
 0x5a8   :  { %v473_v43 = vsel %vm12_vm0, %v3540_v40, -inf  ;;  %v466_v44 = vadd.f32 %v460_v41, %v426_v50 }
 0x5a9   :  { %v2860_v46 = vpop.eup %2859  ;;  %v474_v49 = vrot.slane %v473_v43, 4  ;;  %v467_v52 = vadd.f32 %v462_v42, %v429_v16 }
 0x5aa   :  { %v3544_v54 = vsub.f32 %v418_v11, %v466_v44  ;;  %v464_v56 = vmul.f32 0.6931472, %v2860_v46 }
 0x5ab   :  { %v3546_v57 = vsub.f32 %v419_v38, %v467_v52  ;;  %v475_v58 = vmax.f32 %v473_v43, %v474_v49 }
 0x5ac   :  { %v480_v60 = vsel %vm12_vm0, %v3544_v54, -inf  ;;  %v468_v61 = vadd.f32 %v464_v56, %v432_v19 }
 0x5ad   :  { %v481_v62 = vrot.slane %v480_v60, 4  ;;  %v487_v1 = vsel %vm12_vm0, %v3546_v57, -inf  ;;  %v476_v2 = vrot.slane %v475_v58, 2 }
 0x5ae   :  { %v488_v3 = vrot.slane %v487_v1, 4  ;;  %v3552_v4 = vsub.f32 %v420_v39, %v468_v61 }
 0x5af   :  { %v477_v7 = vmax.f32 %v475_v58, %v476_v2  ;;  %v482_v5 = vmax.f32 %v480_v60, %v481_v62 }
 0x5b0   :  { %v494_v8 = vsel %vm12_vm0, %v3552_v4, -inf  ;;  %v489_v0 = vmax.f32 %v487_v1, %v488_v3 }
 0x5b1   :  { %v495_v12 = vrot.slane %v494_v8, 4  ;;  %v478_v37 = vrot.slane %v477_v7, 1  ;;  %v483_v9 = vrot.slane %v482_v5, 2 }
 0x5b2   :  { %v490_v6 = vrot.slane %v489_v0, 2 }
 0x5b3   :  { %v479_v11 = vmax.f32 %v477_v7, %v478_v37  ;;  %v484_v45 = vmax.f32 %v482_v5, %v483_v9  ;;  %v496_v38 = vmax.f32 %v494_v8, %v495_v12 }
 0x5b4   :  { %v491_v13 = vmax.f32 %v489_v0, %v490_v6 }
 0x5b5   :  { %v501_v10 = vsub.f32 %v3540_v40, %v479_v11  ;;  %v485_v14 = vrot.slane %v484_v45, 1  ;;  %v497_v48 = vrot.slane %v496_v38, 2 }
 0x5b6   :  { %v492_v39 = vrot.slane %v491_v13, 1 }
 0x5b7   :  { %v505_v15 = vmul.f32 1.442695, %v501_v10  ;;  %v486_v17 = vmax.f32 %v484_v45, %v485_v14  ;;  %v498_v47 = vmax.f32 %v496_v38, %v497_v48 }
 0x5b8   :  { %v493_v50 = vmax.f32 %v491_v13, %v492_v39 }
 0x5b9   :  { %2861 = vpow2.f32 %v505_v15  ;;  %v502_v51 = vsub.f32 %v3544_v54, %v486_v17  ;;  %v499_v16 = vrot.slane %v498_v47, 1 }
 0x5ba   :  { %v503_v53 = vsub.f32 %v3546_v57, %v493_v50 }
 0x5bb   :  { %v507_v18 = vmul.f32 1.442695, %v502_v51  ;;  %v500_v20 = vmax.f32 %v498_v47, %v499_v16 }
 0x5bc   :  { %v509_v19 = vmul.f32 1.442695, %v503_v53 }
 0x5bd   :  { %2863 = vpow2.f32 %v507_v18  ;;  %v504_v55 = vsub.f32 %v3552_v4, %v500_v20 }
 0x5be   :  { %2865 = vpow2.f32 %v509_v19 }
 0x5bf   :  { %v511_v59 = vmul.f32 1.442695, %v504_v55 }
 0x5c1   :  { %2867 = vpow2.f32 %v511_v59 }
 0x5c3   :  { %v2862_v63 = vpop.eup %2861 }
 0x5c4   :  { %v513_v21 = vsel %vm12_vm0, %v2862_v63, 0.0 }
 0x5c5   :  { %v514_v22 = vrot.slane %v513_v21, 4 }
 0x5c7   :  { %v2864_v23 = vpop.eup %2863  ;;  %v515_v24 = vadd.f32 %v514_v22, %v513_v21 }
 0x5c8   :  { %v2866_v25 = vpop.eup %2865  ;;  %v520_v26 = vsel %vm12_vm0, %v2864_v23, 0.0 }
 0x5c9   :  { %v516_v27 = vrot.slane %v515_v24, 2  ;;  %v521_v28 = vrot.slane %v520_v26, 4  ;;  %v527_v29 = vsel %vm12_vm0, %v2866_v25, 0.0 }
 0x5ca   :  { %v528_v30 = vrot.slane %v527_v29, 4 }
 0x5cb   :  { %v2868_v31 = vpop.eup %2867  ;;  %v517_v32 = vadd.f32 %v516_v27, %v515_v24  ;;  %v522_v33 = vadd.f32 %v521_v28, %v520_v26 }
 0x5cc   :  { %v529_v34 = vadd.f32 %v528_v30, %v527_v29  ;;  %v534_v35 = vsel %vm12_vm0, %v2868_v31, 0.0 }
 0x5cd   :  { %v518_v36 = vrot.slane %v517_v32, 1  ;;  %v523_v41 = vrot.slane %v522_v33, 2  ;;  %v535_v42 = vrot.slane %v534_v35, 4 }
 0x5ce   :  { %v530_v43 = vrot.slane %v529_v34, 2 }
 0x5cf   :  { %v519_v44 = vadd.f32 %v518_v36, %v517_v32  ;;  %v524_v46 = vadd.f32 %v523_v41, %v522_v33  ;;  %v536_v49 = vadd.f32 %v535_v42, %v534_v35 }
 0x5d0   :  { %v531_v52 = vadd.f32 %v530_v43, %v529_v34 }
 0x5d1   :  { %2869 = vlog2.f32 %v519_v44  ;;  %v525_v56 = vrot.slane %v524_v46, 1  ;;  %v537_v58 = vrot.slane %v536_v49, 2 }
 0x5d2   :  { %v532_v60 = vrot.slane %v531_v52, 1 }
 0x5d3   :  { %v526_v61 = vadd.f32 %v525_v56, %v524_v46  ;;  %v538_v62 = vadd.f32 %v537_v58, %v536_v49 }
 0x5d4   :  { %v533_v1 = vadd.f32 %v532_v60, %v531_v52 }
 0x5d5   :  { %2871 = vlog2.f32 %v526_v61  ;;  %v539_v2 = vrot.slane %v538_v62, 1 }
 0x5d6   :  { %2873 = vlog2.f32 %v533_v1 }
 0x5d7   :  { %v540_v3 = vadd.f32 %v539_v2, %v538_v62 }
 0x5d9   :  { %2875 = vlog2.f32 %v540_v3 }
 0x5db   :  { %v2870_v7 = vpop.eup %2869 }
 0x5dc   :  { %v542_v5 = vmul.f32 0.6931472, %v2870_v7 }
 0x5de   :  { %v549_v8 = vadd.f32 %v542_v5, %v479_v11 }
 0x5df   :  { %v2872_v0 = vpop.eup %2871 }
 0x5e0   :  { %v2874_v12 = vpop.eup %2873  ;;  %v553_v37 = vsub.f32 %v3540_v40, %v549_v8  ;;  %v544_v9 = vmul.f32 0.6931472, %v2872_v0 }
 0x5e1   :  { %v546_v6 = vmul.f32 0.6931472, %v2874_v12 }
 0x5e2   :  { %v557_v45 = vsel %vm12_vm0, %v553_v37, -inf  ;;  %v550_v38 = vadd.f32 %v544_v9, %v486_v17 }
 0x5e3   :  { %v2876_v13 = vpop.eup %2875  ;;  %558 = vmax.xlane.f32.xlu0 %v557_v45  ;;  %v551_v10 = vadd.f32 %v546_v6, %v493_v50 }
 0x5e4   :  { %v554_v14 = vsub.f32 %v3544_v54, %v550_v38  ;;  %v548_v48 = vmul.f32 0.6931472, %v2876_v13 }
 0x5e5   :  { %v555_v39 = vsub.f32 %v3546_v57, %v551_v10 }
 0x5e6   :  { %v560_v15 = vsel %vm12_vm0, %v554_v14, -inf  ;;  %v552_v11 = vadd.f32 %v548_v48, %v500_v20 }
 0x5e7   :  { %561 = vmax.xlane.f32.xlu1 %v560_v15  ;;  %v563_v47 = vsel %vm12_vm0, %v555_v39, -inf }
 0x5e8   :  { %564 = vmax.xlane.f32.xlu0 %v563_v47  ;;  %v556_v40 = vsub.f32 %v3552_v4, %v552_v11 }
 0x5ea   :  { %v566_v51 = vsel %vm12_vm0, %v556_v40, -inf }
 0x5eb   :  { %567 = vmax.xlane.f32.xlu1 %v566_v51 }
 0x670   :  { %v559_v17 = vpop.xlane.xlu0 %558 }
 0x671   :  { %v569_v16 = vsub.f32 %v553_v37, %v559_v17 }
 0x673   :  { %v573_v50 = vmul.f32 1.442695, %v569_v16 }
 0x674   :  { %v562_v53 = vpop.xlane.xlu1 %561 }
 0x675   :  { %2877 = vpow2.f32 %v573_v50  ;;  %v570_v54 = vsub.f32 %v554_v14, %v562_v53  ;;  %v565_v18 = vpop.xlane.xlu0 %564 }
 0x676   :  { %v571_v57 = vsub.f32 %v555_v39, %v565_v18 }
 0x677   :  { %v575_v19 = vmul.f32 1.442695, %v570_v54 }
 0x678   :  { %v577_v55 = vmul.f32 1.442695, %v571_v57  ;;  %v568_v20 = vpop.xlane.xlu1 %567 }
 0x679   :  { %2879 = vpow2.f32 %v575_v19  ;;  %v572_v59 = vsub.f32 %v556_v40, %v568_v20 }
 0x67a   :  { %2881 = vpow2.f32 %v577_v55 }
 0x67b   :  { %v579_v63 = vmul.f32 1.442695, %v572_v59 }
 0x67d   :  { %2883 = vpow2.f32 %v579_v63 }
 0x67f   :  { %v2878_v4 = vpop.eup %2877 }
 0x680   :  { %v581_v21 = vsel %vm12_vm0, %v2878_v4, 0.0 }
 0x681   :  { %582 = vadd.xlane.f32.xlu0 %v581_v21 }
 0x683   :  { %v2880_v22 = vpop.eup %2879 }
 0x684   :  { %v2882_v23 = vpop.eup %2881  ;;  %v584_v24 = vsel %vm12_vm0, %v2880_v22, 0.0 }
 0x685   :  { %585 = vadd.xlane.f32.xlu1 %v584_v24  ;;  %v587_v25 = vsel %vm12_vm0, %v2882_v23, 0.0 }
 0x686   :  { %588 = vadd.xlane.f32.xlu0 %v587_v25 }
 0x687   :  { %v2884_v26 = vpop.eup %2883 }
 0x688   :  { %v590_v27 = vsel %vm12_vm0, %v2884_v26, 0.0 }
 0x689   :  { %591 = vadd.xlane.f32.xlu1 %v590_v27 }
 0x70e   :  { %v583_v28 = vpop.xlane.xlu0 %582 }
 0x70f   :  { %2885 = vlog2.f32 %v583_v28 }
 0x712   :  { %v586_v29 = vpop.xlane.xlu1 %585 }
 0x713   :  { %2887 = vlog2.f32 %v586_v29  ;;  %v589_v30 = vpop.xlane.xlu0 %588 }
 0x714   :  { %2889 = vlog2.f32 %v589_v30 }
 0x716   :  { %v592_v31 = vpop.xlane.xlu1 %591 }
 0x717   :  { %2891 = vlog2.f32 %v592_v31 }
 0x719   :  { %v2886_v32 = vpop.eup %2885 }
 0x71a   :  { %v594_v33 = vmul.f32 0.6931472, %v2886_v32 }
 0x71c   :  { %v601_v34 = vadd.f32 %v594_v33, %v559_v17 }
 0x71d   :  { %v2888_v35 = vpop.eup %2887 }
 0x71e   :  { %v2890_v36 = vpop.eup %2889  ;;  %v3576_v41 = vsub.f32 %v553_v37, %v601_v34  ;;  %v596_v42 = vmul.f32 0.6931472, %v2888_v35 }
 0x71f   :  { %v598_v43 = vmul.f32 0.6931472, %v2890_v36 }
 0x720   :  { %v609_v44 = vsel %vm12_vm0, %v3576_v41, -inf  ;;  %v602_v46 = vadd.f32 %v596_v42, %v562_v53 }
 0x721   :  { %v2892_v49 = vpop.eup %2891  ;;  %v610_v52 = vrot.slane %v609_v44, 4  ;;  %v603_v56 = vadd.f32 %v598_v43, %v565_v18 }
 0x722   :  { %v3580_v58 = vsub.f32 %v554_v14, %v602_v46  ;;  %v600_v60 = vmul.f32 0.6931472, %v2892_v49 }
 0x723   :  { %v3582_v61 = vsub.f32 %v555_v39, %v603_v56  ;;  %v611_v62 = vmax.f32 %v609_v44, %v610_v52 }
 0x724   :  { %v616_v1 = vsel %vm12_vm0, %v3580_v58, -inf  ;;  %v604_v2 = vadd.f32 %v600_v60, %v568_v20 }
 0x725   :  { %v617_v3 = vrot.slane %v616_v1, 4  ;;  %v623_v7 = vsel %vm12_vm0, %v3582_v61, -inf  ;;  %v612_v5 = vrot.slane %v611_v62, 2 }
 0x726   :  { %v624_v8 = vrot.slane %v623_v7, 4  ;;  %v3588_v0 = vsub.f32 %v556_v40, %v604_v2 }
 0x727   :  { %v613_v12 = vmax.f32 %v611_v62, %v612_v5  ;;  %v618_v37 = vmax.f32 %v616_v1, %v617_v3 }
 0x728   :  { %v630_v9 = vsel %vm12_vm0, %v3588_v0, -inf  ;;  %v625_v6 = vmax.f32 %v623_v7, %v624_v8 }
 0x729   :  { %v631_v45 = vrot.slane %v630_v9, 4  ;;  %v614_v38 = vrot.slane %v613_v12, 1  ;;  %v619_v13 = vrot.slane %v618_v37, 2 }
 0x72a   :  { %v626_v10 = vrot.slane %v625_v6, 2 }
 0x72b   :  { %v615_v14 = vmax.f32 %v613_v12, %v614_v38  ;;  %v620_v48 = vmax.f32 %v618_v37, %v619_v13  ;;  %v632_v39 = vmax.f32 %v630_v9, %v631_v45 }
 0x72c   :  { %v627_v15 = vmax.f32 %v625_v6, %v626_v10 }
 0x72d   :  { %v637_v11 = vsub.f32 %v3576_v41, %v615_v14  ;;  %v621_v47 = vrot.slane %v620_v48, 1  ;;  %v633_v51 = vrot.slane %v632_v39, 2 }
 0x72e   :  { %v628_v40 = vrot.slane %v627_v15, 1 }
 0x72f   :  { %v641_v17 = vmul.f32 1.442695, %v637_v11  ;;  %v622_v16 = vmax.f32 %v620_v48, %v621_v47  ;;  %v634_v50 = vmax.f32 %v632_v39, %v633_v51 }
 0x730   :  { %v629_v53 = vmax.f32 %v627_v15, %v628_v40 }
 0x731   :  { %2893 = vpow2.f32 %v641_v17  ;;  %v638_v54 = vsub.f32 %v3580_v58, %v622_v16  ;;  %v635_v18 = vrot.slane %v634_v50, 1 }
 0x732   :  { %v639_v57 = vsub.f32 %v3582_v61, %v629_v53 }
 0x733   :  { %v643_v19 = vmul.f32 1.442695, %v638_v54  ;;  %v636_v55 = vmax.f32 %v634_v50, %v635_v18 }
 0x734   :  { %v645_v20 = vmul.f32 1.442695, %v639_v57 }
 0x735   :  { %2895 = vpow2.f32 %v643_v19  ;;  %v640_v59 = vsub.f32 %v3588_v0, %v636_v55 }
 0x736   :  { %2897 = vpow2.f32 %v645_v20 }
 0x737   :  { %v647_v63 = vmul.f32 1.442695, %v640_v59 }
 0x739   :  { %2899 = vpow2.f32 %v647_v63 }
 0x73b   :  { %v2894_v4 = vpop.eup %2893 }
 0x73c   :  { %v649_v21 = vsel %vm12_vm0, %v2894_v4, 0.0 }
 0x73d   :  { %v650_v22 = vrot.slane %v649_v21, 4 }
 0x73f   :  { %v2896_v23 = vpop.eup %2895  ;;  %v651_v24 = vadd.f32 %v650_v22, %v649_v21 }
 0x740   :  { %v2898_v25 = vpop.eup %2897  ;;  %v656_v26 = vsel %vm12_vm0, %v2896_v23, 0.0 }
 0x741   :  { %v652_v27 = vrot.slane %v651_v24, 2  ;;  %v657_v28 = vrot.slane %v656_v26, 4  ;;  %v663_v29 = vsel %vm12_vm0, %v2898_v25, 0.0 }
 0x742   :  { %v664_v30 = vrot.slane %v663_v29, 4 }
 0x743   :  { %v2900_v31 = vpop.eup %2899  ;;  %v653_v32 = vadd.f32 %v652_v27, %v651_v24  ;;  %v658_v33 = vadd.f32 %v657_v28, %v656_v26 }
 0x744   :  { %v665_v34 = vadd.f32 %v664_v30, %v663_v29  ;;  %v670_v35 = vsel %vm12_vm0, %v2900_v31, 0.0 }
 0x745   :  { %v654_v36 = vrot.slane %v653_v32, 1  ;;  %v659_v42 = vrot.slane %v658_v33, 2  ;;  %v671_v43 = vrot.slane %v670_v35, 4 }
 0x746   :  { %v666_v44 = vrot.slane %v665_v34, 2 }
 0x747   :  { %v655_v46 = vadd.f32 %v654_v36, %v653_v32  ;;  %v660_v49 = vadd.f32 %v659_v42, %v658_v33  ;;  %v672_v52 = vadd.f32 %v671_v43, %v670_v35 }
 0x748   :  { %v667_v56 = vadd.f32 %v666_v44, %v665_v34 }
 0x749   :  { %2901 = vlog2.f32 %v655_v46  ;;  %v661_v60 = vrot.slane %v660_v49, 1  ;;  %v673_v62 = vrot.slane %v672_v52, 2 }
 0x74a   :  { %v668_v1 = vrot.slane %v667_v56, 1 }
 0x74b   :  { %v662_v2 = vadd.f32 %v661_v60, %v660_v49  ;;  %v674_v3 = vadd.f32 %v673_v62, %v672_v52 }
 0x74c   :  { %v669_v7 = vadd.f32 %v668_v1, %v667_v56 }
 0x74d   :  { %2903 = vlog2.f32 %v662_v2  ;;  %v675_v5 = vrot.slane %v674_v3, 1 }
 0x74e   :  { %2905 = vlog2.f32 %v669_v7 }
 0x74f   :  { %v676_v8 = vadd.f32 %v675_v5, %v674_v3 }
 0x751   :  { %2907 = vlog2.f32 %v676_v8 }
 0x753   :  { %v2902_v12 = vpop.eup %2901 }
 0x754   :  { %v678_v37 = vmul.f32 0.6931472, %v2902_v12 }
 0x756   :  { %v685_v9 = vadd.f32 %v678_v37, %v615_v14 }
 0x757   :  { %v2904_v6 = vpop.eup %2903 }
 0x758   :  { %v2906_v45 = vpop.eup %2905  ;;  %v689_v38 = vsub.f32 %v3576_v41, %v685_v9  ;;  %v680_v13 = vmul.f32 0.6931472, %v2904_v6 }
 0x759   :  { %v682_v10 = vmul.f32 0.6931472, %v2906_v45 }
 0x75a   :  { %v693_v48 = vsel %vm12_vm0, %v689_v38, -inf  ;;  %v686_v39 = vadd.f32 %v680_v13, %v622_v16 }
 0x75b   :  { %v2908_v15 = vpop.eup %2907  ;;  %694 = vmax.xlane.f32.xlu0 %v693_v48  ;;  %v687_v11 = vadd.f32 %v682_v10, %v629_v53 }
 0x75c   :  { %v690_v47 = vsub.f32 %v3580_v58, %v686_v39  ;;  %v684_v51 = vmul.f32 0.6931472, %v2908_v15 }
 0x75d   :  { %v691_v40 = vsub.f32 %v3582_v61, %v687_v11 }
 0x75e   :  { %v696_v17 = vsel %vm12_vm0, %v690_v47, -inf  ;;  %v688_v14 = vadd.f32 %v684_v51, %v636_v55 }
 0x75f   :  { %697 = vmax.xlane.f32.xlu1 %v696_v17  ;;  %v699_v50 = vsel %vm12_vm0, %v691_v40, -inf }
 0x760   :  { %700 = vmax.xlane.f32.xlu0 %v699_v50  ;;  %v692_v41 = vsub.f32 %v3588_v0, %v688_v14 }
 0x762   :  { %v702_v54 = vsel %vm12_vm0, %v692_v41, -inf }
 0x763   :  { %703 = vmax.xlane.f32.xlu1 %v702_v54 }
 0x7e8   :  { %v695_v16 = vpop.xlane.xlu0 %694 }
 0x7e9   :  { %v705_v18 = vsub.f32 %v689_v38, %v695_v16 }
 0x7eb   :  { %v709_v53 = vmul.f32 1.442695, %v705_v18 }
 0x7ec   :  { %v698_v57 = vpop.xlane.xlu1 %697 }
 0x7ed   :  { %2909 = vpow2.f32 %v709_v53  ;;  %v706_v58 = vsub.f32 %v690_v47, %v698_v57  ;;  %v701_v19 = vpop.xlane.xlu0 %700 }
 0x7ee   :  { %v707_v61 = vsub.f32 %v691_v40, %v701_v19 }
 0x7ef   :  { %v711_v20 = vmul.f32 1.442695, %v706_v58 }
 0x7f0   :  { %v713_v59 = vmul.f32 1.442695, %v707_v61  ;;  %v704_v55 = vpop.xlane.xlu1 %703 }
 0x7f1   :  { %2911 = vpow2.f32 %v711_v20  ;;  %v708_v63 = vsub.f32 %v692_v41, %v704_v55 }
 0x7f2   :  { %2913 = vpow2.f32 %v713_v59 }
 0x7f3   :  { %v715_v4 = vmul.f32 1.442695, %v708_v63 }
 0x7f5   :  { %2915 = vpow2.f32 %v715_v4 }
 0x7f7   :  { %v2910_v0 = vpop.eup %2909 }
 0x7f8   :  { %v717_v21 = vsel %vm12_vm0, %v2910_v0, 0.0 }
 0x7f9   :  { %718 = vadd.xlane.f32.xlu0 %v717_v21 }
 0x7fb   :  { %v2912_v22 = vpop.eup %2911 }
 0x7fc   :  { %v2914_v23 = vpop.eup %2913  ;;  %v720_v24 = vsel %vm12_vm0, %v2912_v22, 0.0 }
 0x7fd   :  { %721 = vadd.xlane.f32.xlu1 %v720_v24  ;;  %v723_v25 = vsel %vm12_vm0, %v2914_v23, 0.0 }
 0x7fe   :  { %724 = vadd.xlane.f32.xlu0 %v723_v25 }
 0x7ff   :  { %v2916_v26 = vpop.eup %2915 }
 0x800   :  { %v726_v27 = vsel %vm12_vm0, %v2916_v26, 0.0 }
 0x801   :  { %727 = vadd.xlane.f32.xlu1 %v726_v27 }
 0x886   :  { %v719_v28 = vpop.xlane.xlu0 %718 }
 0x887   :  { %2917 = vlog2.f32 %v719_v28 }
 0x88a   :  { %v722_v29 = vpop.xlane.xlu1 %721 }
 0x88b   :  { %2919 = vlog2.f32 %v722_v29  ;;  %v725_v30 = vpop.xlane.xlu0 %724 }
 0x88c   :  { %2921 = vlog2.f32 %v725_v30 }
 0x88e   :  { %v728_v31 = vpop.xlane.xlu1 %727 }
 0x88f   :  { %2923 = vlog2.f32 %v728_v31 }
 0x891   :  { %v2918_v32 = vpop.eup %2917 }
 0x892   :  { %v730_v33 = vmul.f32 0.6931472, %v2918_v32 }
 0x894   :  { %v737_v34 = vadd.f32 %v730_v33, %v695_v16 }
 0x895   :  { %v2920_v35 = vpop.eup %2919 }
 0x896   :  { %v2922_v36 = vpop.eup %2921  ;;  %v3612_v42 = vsub.f32 %v689_v38, %v737_v34  ;;  %v732_v43 = vmul.f32 0.6931472, %v2920_v35 }
 0x897   :  { %v734_v44 = vmul.f32 0.6931472, %v2922_v36 }
 0x898   :  { %v745_v46 = vsel %vm12_vm0, %v3612_v42, -inf  ;;  %v738_v49 = vadd.f32 %v732_v43, %v698_v57 }
 0x899   :  { %v2924_v52 = vpop.eup %2923  ;;  %v746_v56 = vrot.slane %v745_v46, 4  ;;  %v739_v60 = vadd.f32 %v734_v44, %v701_v19 }
 0x89a   :  { %v3616_v62 = vsub.f32 %v690_v47, %v738_v49  ;;  %v736_v1 = vmul.f32 0.6931472, %v2924_v52 }
 0x89b   :  { %v3618_v2 = vsub.f32 %v691_v40, %v739_v60  ;;  %v747_v3 = vmax.f32 %v745_v46, %v746_v56 }
 0x89c   :  { %v752_v7 = vsel %vm12_vm0, %v3616_v62, -inf  ;;  %v740_v5 = vadd.f32 %v736_v1, %v704_v55 }
 0x89d   :  { %v753_v8 = vrot.slane %v752_v7, 4  ;;  %v759_v12 = vsel %vm12_vm0, %v3618_v2, -inf  ;;  %v748_v37 = vrot.slane %v747_v3, 2 }
 0x89e   :  { %v760_v9 = vrot.slane %v759_v12, 4  ;;  %v3624_v6 = vsub.f32 %v692_v41, %v740_v5 }
 0x89f   :  { %v749_v45 = vmax.f32 %v747_v3, %v748_v37  ;;  %v754_v38 = vmax.f32 %v752_v7, %v753_v8 }
 0x8a0   :  { %v766_v13 = vsel %vm12_vm0, %v3624_v6, -inf  ;;  %v761_v10 = vmax.f32 %v759_v12, %v760_v9 }
 0x8a1   :  { %v767_v48 = vrot.slane %v766_v13, 4  ;;  %v750_v39 = vrot.slane %v749_v45, 1  ;;  %v755_v15 = vrot.slane %v754_v38, 2 }
 0x8a2   :  { %v762_v11 = vrot.slane %v761_v10, 2 }
 0x8a3   :  { %v751_v47 = vmax.f32 %v749_v45, %v750_v39  ;;  %v756_v51 = vmax.f32 %v754_v38, %v755_v15  ;;  %v768_v40 = vmax.f32 %v766_v13, %v767_v48 }
 0x8a4   :  { %v763_v17 = vmax.f32 %v761_v10, %v762_v11 }
 0x8a5   :  { %v773_v14 = vsub.f32 %v3612_v42, %v751_v47  ;;  %v757_v50 = vrot.slane %v756_v51, 1  ;;  %v769_v54 = vrot.slane %v768_v40, 2 }
 0x8a6   :  { %v764_v41 = vrot.slane %v763_v17, 1 }
 0x8a7   :  { %v777_v16 = vmul.f32 1.442695, %v773_v14  ;;  %v758_v18 = vmax.f32 %v756_v51, %v757_v50  ;;  %v770_v53 = vmax.f32 %v768_v40, %v769_v54 }
 0x8a8   :  { %v765_v57 = vmax.f32 %v763_v17, %v764_v41 }
 0x8a9   :  { %2925 = vpow2.f32 %v777_v16  ;;  %v774_v58 = vsub.f32 %v3616_v62, %v758_v18  ;;  %v771_v19 = vrot.slane %v770_v53, 1 }
 0x8aa   :  { %v775_v61 = vsub.f32 %v3618_v2, %v765_v57 }
 0x8ab   :  { %v779_v20 = vmul.f32 1.442695, %v774_v58  ;;  %v772_v59 = vmax.f32 %v770_v53, %v771_v19 }
 0x8ac   :  { %v781_v55 = vmul.f32 1.442695, %v775_v61 }
 0x8ad   :  { %2927 = vpow2.f32 %v779_v20  ;;  %v776_v63 = vsub.f32 %v3624_v6, %v772_v59 }
 0x8ae   :  { %2929 = vpow2.f32 %v781_v55 }
 0x8af   :  { %v783_v4 = vmul.f32 1.442695, %v776_v63 }
 0x8b1   :  { %2931 = vpow2.f32 %v783_v4 }
 0x8b3   :  { %v2926_v0 = vpop.eup %2925 }
 0x8b4   :  { %v785_v21 = vsel %vm12_vm0, %v2926_v0, 0.0 }
 0x8b5   :  { %v786_v22 = vrot.slane %v785_v21, 4 }
 0x8b7   :  { %v2928_v23 = vpop.eup %2927  ;;  %v787_v24 = vadd.f32 %v786_v22, %v785_v21 }
 0x8b8   :  { %v2930_v25 = vpop.eup %2929  ;;  %v792_v26 = vsel %vm12_vm0, %v2928_v23, 0.0 }
 0x8b9   :  { %v788_v27 = vrot.slane %v787_v24, 2  ;;  %v793_v28 = vrot.slane %v792_v26, 4  ;;  %v799_v29 = vsel %vm12_vm0, %v2930_v25, 0.0 }
 0x8ba   :  { %v800_v30 = vrot.slane %v799_v29, 4 }
 0x8bb   :  { %v2932_v31 = vpop.eup %2931  ;;  %v789_v32 = vadd.f32 %v788_v27, %v787_v24  ;;  %v794_v33 = vadd.f32 %v793_v28, %v792_v26 }
 0x8bc   :  { %v801_v34 = vadd.f32 %v800_v30, %v799_v29  ;;  %v806_v35 = vsel %vm12_vm0, %v2932_v31, 0.0 }
 0x8bd   :  { %v790_v36 = vrot.slane %v789_v32, 1  ;;  %v795_v43 = vrot.slane %v794_v33, 2  ;;  %v807_v44 = vrot.slane %v806_v35, 4 }
 0x8be   :  { %v802_v46 = vrot.slane %v801_v34, 2 }
 0x8bf   :  { %v791_v49 = vadd.f32 %v790_v36, %v789_v32  ;;  %v796_v52 = vadd.f32 %v795_v43, %v794_v33  ;;  %v808_v56 = vadd.f32 %v807_v44, %v806_v35 }
 0x8c0   :  { %v803_v60 = vadd.f32 %v802_v46, %v801_v34 }
 0x8c1   :  { %2933 = vlog2.f32 %v791_v49  ;;  %v797_v1 = vrot.slane %v796_v52, 1  ;;  %v809_v3 = vrot.slane %v808_v56, 2 }
 0x8c2   :  { %v804_v7 = vrot.slane %v803_v60, 1 }
 0x8c3   :  { %v798_v5 = vadd.f32 %v797_v1, %v796_v52  ;;  %v810_v8 = vadd.f32 %v809_v3, %v808_v56 }
 0x8c4   :  { %v805_v12 = vadd.f32 %v804_v7, %v803_v60 }
 0x8c5   :  { %2935 = vlog2.f32 %v798_v5  ;;  %v811_v37 = vrot.slane %v810_v8, 1 }
 0x8c6   :  { %2937 = vlog2.f32 %v805_v12 }
 0x8c7   :  { %v812_v9 = vadd.f32 %v811_v37, %v810_v8 }
 0x8c9   :  { %2939 = vlog2.f32 %v812_v9 }
 0x8cb   :  { %v2934_v45 = vpop.eup %2933 }
 0x8cc   :  { %v814_v38 = vmul.f32 0.6931472, %v2934_v45 }
 0x8ce   :  { %v821_v13 = vadd.f32 %v814_v38, %v751_v47 }
 0x8cf   :  { %v2936_v10 = vpop.eup %2935 }
 0x8d0   :  { %v2938_v48 = vpop.eup %2937  ;;  %v825_v39 = vsub.f32 %v3612_v42, %v821_v13  ;;  %v816_v15 = vmul.f32 0.6931472, %v2936_v10 }
 0x8d1   :  { %v818_v11 = vmul.f32 0.6931472, %v2938_v48 }
 0x8d2   :  { %v829_v51 = vsel %vm12_vm0, %v825_v39, -inf  ;;  %v822_v40 = vadd.f32 %v816_v15, %v758_v18 }
 0x8d3   :  { %v2940_v17 = vpop.eup %2939  ;;  %830 = vmax.xlane.f32.xlu0 %v829_v51  ;;  %v823_v14 = vadd.f32 %v818_v11, %v765_v57 }
 0x8d4   :  { %v826_v50 = vsub.f32 %v3616_v62, %v822_v40  ;;  %v820_v54 = vmul.f32 0.6931472, %v2940_v17 }
 0x8d5   :  { %v827_v41 = vsub.f32 %v3618_v2, %v823_v14 }
 0x8d6   :  { %v832_v16 = vsel %vm12_vm0, %v826_v50, -inf  ;;  %v824_v47 = vadd.f32 %v820_v54, %v772_v59 }
 0x8d7   :  { %833 = vmax.xlane.f32.xlu1 %v832_v16  ;;  %v835_v53 = vsel %vm12_vm0, %v827_v41, -inf }
 0x8d8   :  { %836 = vmax.xlane.f32.xlu0 %v835_v53  ;;  %v828_v42 = vsub.f32 %v3624_v6, %v824_v47 }
 0x8da   :  { %v838_v58 = vsel %vm12_vm0, %v828_v42, -inf }
 0x8db   :  { %839 = vmax.xlane.f32.xlu1 %v838_v58 }
 0x960   :  { %v831_v18 = vpop.xlane.xlu0 %830 }
 0x961   :  { %v841_v19 = vsub.f32 %v825_v39, %v831_v18 }
 0x963   :  { %v845_v57 = vmul.f32 1.442695, %v841_v19 }
 0x964   :  { %v834_v61 = vpop.xlane.xlu1 %833 }
 0x965   :  { %2941 = vpow2.f32 %v845_v57  ;;  %v842_v62 = vsub.f32 %v826_v50, %v834_v61  ;;  %v837_v20 = vpop.xlane.xlu0 %836 }
 0x966   :  { %v843_v2 = vsub.f32 %v827_v41, %v837_v20 }
 0x967   :  { %v847_v55 = vmul.f32 1.442695, %v842_v62 }
 0x968   :  { %v849_v63 = vmul.f32 1.442695, %v843_v2  ;;  %v840_v59 = vpop.xlane.xlu1 %839 }
 0x969   :  { %2943 = vpow2.f32 %v847_v55  ;;  %v844_v4 = vsub.f32 %v828_v42, %v840_v59 }
 0x96a   :  { %2945 = vpow2.f32 %v849_v63 }
 0x96b   :  { %v851_v0 = vmul.f32 1.442695, %v844_v4 }
 0x96d   :  { %2947 = vpow2.f32 %v851_v0 }
 0x96f   :  { %v2942_v6 = vpop.eup %2941 }
 0x970   :  { %v853_v21 = vsel %vm12_vm0, %v2942_v6, 0.0 }
 0x971   :  { %854 = vadd.xlane.f32.xlu0 %v853_v21 }
 0x973   :  { %v2944_v22 = vpop.eup %2943 }
 0x974   :  { %v2946_v23 = vpop.eup %2945  ;;  %v856_v24 = vsel %vm12_vm0, %v2944_v22, 0.0 }
 0x975   :  { %857 = vadd.xlane.f32.xlu1 %v856_v24  ;;  %v859_v25 = vsel %vm12_vm0, %v2946_v23, 0.0 }
 0x976   :  { %860 = vadd.xlane.f32.xlu0 %v859_v25 }
 0x977   :  { %v2948_v26 = vpop.eup %2947 }
 0x978   :  { %v862_v27 = vsel %vm12_vm0, %v2948_v26, 0.0 }
 0x979   :  { %863 = vadd.xlane.f32.xlu1 %v862_v27 }
 0x9fe   :  { %v855_v28 = vpop.xlane.xlu0 %854 }
 0x9ff   :  { %2949 = vlog2.f32 %v855_v28 }
 0xa02   :  { %v858_v29 = vpop.xlane.xlu1 %857 }
 0xa03   :  { %2951 = vlog2.f32 %v858_v29  ;;  %v861_v30 = vpop.xlane.xlu0 %860 }
 0xa04   :  { %2953 = vlog2.f32 %v861_v30 }
 0xa06   :  { %v864_v31 = vpop.xlane.xlu1 %863 }
 0xa07   :  { %2955 = vlog2.f32 %v864_v31 }
 0xa09   :  { %v2950_v32 = vpop.eup %2949 }
 0xa0a   :  { %v866_v33 = vmul.f32 0.6931472, %v2950_v32 }
 0xa0c   :  { %v873_v34 = vadd.f32 %v866_v33, %v831_v18 }
 0xa0d   :  { %v2952_v35 = vpop.eup %2951 }
 0xa0e   :  { %v2954_v36 = vpop.eup %2953  ;;  %v3648_v43 = vsub.f32 %v825_v39, %v873_v34  ;;  %v868_v44 = vmul.f32 0.6931472, %v2952_v35 }
 0xa0f   :  { %v870_v46 = vmul.f32 0.6931472, %v2954_v36 }
 0xa10   :  { %v881_v49 = vsel %vm12_vm0, %v3648_v43, -inf  ;;  %v874_v52 = vadd.f32 %v868_v44, %v834_v61 }
 0xa11   :  { %v2956_v56 = vpop.eup %2955  ;;  %v882_v60 = vrot.slane %v881_v49, 4  ;;  %v875_v1 = vadd.f32 %v870_v46, %v837_v20 }
 0xa12   :  { %v3652_v3 = vsub.f32 %v826_v50, %v874_v52  ;;  %v872_v7 = vmul.f32 0.6931472, %v2956_v56 }
 0xa13   :  { %v3654_v5 = vsub.f32 %v827_v41, %v875_v1  ;;  %v883_v8 = vmax.f32 %v881_v49, %v882_v60 }
 0xa14   :  { %v888_v12 = vsel %vm12_vm0, %v3652_v3, -inf  ;;  %v876_v37 = vadd.f32 %v872_v7, %v840_v59 }
 0xa15   :  { %v889_v9 = vrot.slane %v888_v12, 4  ;;  %v895_v45 = vsel %vm12_vm0, %v3654_v5, -inf  ;;  %v884_v38 = vrot.slane %v883_v8, 2 }
 0xa16   :  { %v896_v13 = vrot.slane %v895_v45, 4  ;;  %v3660_v10 = vsub.f32 %v828_v42, %v876_v37 }
 0xa17   :  { %v885_v48 = vmax.f32 %v883_v8, %v884_v38  ;;  %v890_v39 = vmax.f32 %v888_v12, %v889_v9 }
 0xa18   :  { %v902_v15 = vsel %vm12_vm0, %v3660_v10, -inf  ;;  %v897_v11 = vmax.f32 %v895_v45, %v896_v13 }
 0xa19   :  { %v903_v51 = vrot.slane %v902_v15, 4  ;;  %v886_v40 = vrot.slane %v885_v48, 1  ;;  %v891_v17 = vrot.slane %v890_v39, 2 }
 0xa1a   :  { %v898_v14 = vrot.slane %v897_v11, 2 }
 0xa1b   :  { %v887_v50 = vmax.f32 %v885_v48, %v886_v40  ;;  %v892_v54 = vmax.f32 %v890_v39, %v891_v17  ;;  %v904_v41 = vmax.f32 %v902_v15, %v903_v51 }
 0xa1c   :  { %v899_v16 = vmax.f32 %v897_v11, %v898_v14 }
 0xa1d   :  { %v909_v47 = vsub.f32 %v3648_v43, %v887_v50  ;;  %v893_v53 = vrot.slane %v892_v54, 1  ;;  %v905_v58 = vrot.slane %v904_v41, 2 }
 0xa1e   :  { %v900_v42 = vrot.slane %v899_v16, 1 }
 0xa1f   :  { %v913_v18 = vmul.f32 1.442695, %v909_v47  ;;  %v894_v19 = vmax.f32 %v892_v54, %v893_v53  ;;  %v906_v57 = vmax.f32 %v904_v41, %v905_v58 }
 0xa20   :  { %v901_v61 = vmax.f32 %v899_v16, %v900_v42 }
 0xa21   :  { %2957 = vpow2.f32 %v913_v18  ;;  %v910_v62 = vsub.f32 %v3652_v3, %v894_v19  ;;  %v907_v20 = vrot.slane %v906_v57, 1 }
 0xa22   :  { %v911_v2 = vsub.f32 %v3654_v5, %v901_v61 }
 0xa23   :  { %v915_v55 = vmul.f32 1.442695, %v910_v62  ;;  %v908_v63 = vmax.f32 %v906_v57, %v907_v20 }
 0xa24   :  { %v917_v59 = vmul.f32 1.442695, %v911_v2 }
 0xa25   :  { %2959 = vpow2.f32 %v915_v55  ;;  %v912_v4 = vsub.f32 %v3660_v10, %v908_v63 }
 0xa26   :  { %2961 = vpow2.f32 %v917_v59 }
 0xa27   :  { %v919_v0 = vmul.f32 1.442695, %v912_v4 }
 0xa29   :  { %2963 = vpow2.f32 %v919_v0 }
 0xa2b   :  { %v2958_v6 = vpop.eup %2957 }
 0xa2c   :  { %v921_v21 = vsel %vm12_vm0, %v2958_v6, 0.0 }
 0xa2d   :  { %v922_v22 = vrot.slane %v921_v21, 4 }
 0xa2f   :  { %v2960_v23 = vpop.eup %2959  ;;  %v923_v24 = vadd.f32 %v922_v22, %v921_v21 }
 0xa30   :  { %v2962_v25 = vpop.eup %2961  ;;  %v928_v26 = vsel %vm12_vm0, %v2960_v23, 0.0 }
 0xa31   :  { %v924_v27 = vrot.slane %v923_v24, 2  ;;  %v929_v28 = vrot.slane %v928_v26, 4  ;;  %v935_v29 = vsel %vm12_vm0, %v2962_v25, 0.0 }
 0xa32   :  { %v936_v30 = vrot.slane %v935_v29, 4 }
 0xa33   :  { %v2964_v31 = vpop.eup %2963  ;;  %v925_v32 = vadd.f32 %v924_v27, %v923_v24  ;;  %v930_v33 = vadd.f32 %v929_v28, %v928_v26 }
 0xa34   :  { %v937_v34 = vadd.f32 %v936_v30, %v935_v29  ;;  %v942_v35 = vsel %vm12_vm0, %v2964_v31, 0.0 }
 0xa35   :  { %v926_v36 = vrot.slane %v925_v32, 1  ;;  %v931_v44 = vrot.slane %v930_v33, 2  ;;  %v943_v46 = vrot.slane %v942_v35, 4 }
 0xa36   :  { %v938_v49 = vrot.slane %v937_v34, 2 }
 0xa37   :  { %v927_v52 = vadd.f32 %v926_v36, %v925_v32  ;;  %v932_v56 = vadd.f32 %v931_v44, %v930_v33  ;;  %v944_v60 = vadd.f32 %v943_v46, %v942_v35 }
 0xa38   :  { %v939_v1 = vadd.f32 %v938_v49, %v937_v34 }
 0xa39   :  { %2965 = vlog2.f32 %v927_v52  ;;  %v933_v7 = vrot.slane %v932_v56, 1  ;;  %v945_v8 = vrot.slane %v944_v60, 2 }
 0xa3a   :  { %v940_v12 = vrot.slane %v939_v1, 1 }
 0xa3b   :  { %v934_v37 = vadd.f32 %v933_v7, %v932_v56  ;;  %v946_v9 = vadd.f32 %v945_v8, %v944_v60 }
 0xa3c   :  { %v941_v45 = vadd.f32 %v940_v12, %v939_v1 }
 0xa3d   :  { %2967 = vlog2.f32 %v934_v37  ;;  %v947_v38 = vrot.slane %v946_v9, 1 }
 0xa3e   :  { %2969 = vlog2.f32 %v941_v45 }
 0xa3f   :  { %v948_v13 = vadd.f32 %v947_v38, %v946_v9 }
 0xa41   :  { %2971 = vlog2.f32 %v948_v13 }
 0xa43   :  { %v2966_v48 = vpop.eup %2965 }
 0xa44   :  { %v950_v39 = vmul.f32 0.6931472, %v2966_v48 }
 0xa46   :  { %v957_v15 = vadd.f32 %v950_v39, %v887_v50 }
 0xa47   :  { %v2968_v11 = vpop.eup %2967 }
 0xa48   :  { %v2970_v51 = vpop.eup %2969  ;;  %v961_v40 = vsub.f32 %v3648_v43, %v957_v15  ;;  %v952_v17 = vmul.f32 0.6931472, %v2968_v11 }
 0xa49   :  { %v954_v14 = vmul.f32 0.6931472, %v2970_v51 }
 0xa4a   :  { %v965_v54 = vsel %vm12_vm0, %v961_v40, -inf  ;;  %v958_v41 = vadd.f32 %v952_v17, %v894_v19 }
 0xa4b   :  { %v2972_v16 = vpop.eup %2971  ;;  %966 = vmax.xlane.f32.xlu0 %v965_v54  ;;  %v959_v47 = vadd.f32 %v954_v14, %v901_v61 }
 0xa4c   :  { %v962_v53 = vsub.f32 %v3652_v3, %v958_v41  ;;  %v956_v58 = vmul.f32 0.6931472, %v2972_v16 }
 0xa4d   :  { %v963_v42 = vsub.f32 %v3654_v5, %v959_v47 }
 0xa4e   :  { %v968_v18 = vsel %vm12_vm0, %v962_v53, -inf  ;;  %v960_v50 = vadd.f32 %v956_v58, %v908_v63 }
 0xa4f   :  { %969 = vmax.xlane.f32.xlu1 %v968_v18  ;;  %v971_v57 = vsel %vm12_vm0, %v963_v42, -inf }
 0xa50   :  { %972 = vmax.xlane.f32.xlu0 %v971_v57  ;;  %v964_v43 = vsub.f32 %v3660_v10, %v960_v50 }
 0xa52   :  { %v974_v62 = vsel %vm12_vm0, %v964_v43, -inf }
 0xa53   :  { %975 = vmax.xlane.f32.xlu1 %v974_v62 }
 0xad8   :  { %v967_v19 = vpop.xlane.xlu0 %966 }
 0xad9   :  { %v977_v20 = vsub.f32 %v961_v40, %v967_v19 }
 0xadb   :  { %v981_v61 = vmul.f32 1.442695, %v977_v20 }
 0xadc   :  { %v970_v2 = vpop.xlane.xlu1 %969 }
 0xadd   :  { %2973 = vpow2.f32 %v981_v61  ;;  %v978_v3 = vsub.f32 %v962_v53, %v970_v2  ;;  %v973_v55 = vpop.xlane.xlu0 %972 }
 0xade   :  { %v979_v5 = vsub.f32 %v963_v42, %v973_v55 }
 0xadf   :  { %v983_v59 = vmul.f32 1.442695, %v978_v3 }
 0xae0   :  { %v985_v4 = vmul.f32 1.442695, %v979_v5  ;;  %v976_v63 = vpop.xlane.xlu1 %975 }
 0xae1   :  { %2975 = vpow2.f32 %v983_v59  ;;  %v980_v0 = vsub.f32 %v964_v43, %v976_v63 }
 0xae2   :  { %2977 = vpow2.f32 %v985_v4 }
 0xae3   :  { %v987_v6 = vmul.f32 1.442695, %v980_v0 }
 0xae5   :  { %2979 = vpow2.f32 %v987_v6 }
 0xae7   :  { %v2974_v10 = vpop.eup %2973 }
 0xae8   :  { %v989_v21 = vsel %vm12_vm0, %v2974_v10, 0.0 }
 0xae9   :  { %990 = vadd.xlane.f32.xlu0 %v989_v21 }
 0xaeb   :  { %v2976_v22 = vpop.eup %2975 }
 0xaec   :  { %v2978_v23 = vpop.eup %2977  ;;  %v992_v24 = vsel %vm12_vm0, %v2976_v22, 0.0 }
 0xaed   :  { %993 = vadd.xlane.f32.xlu1 %v992_v24  ;;  %v995_v25 = vsel %vm12_vm0, %v2978_v23, 0.0 }
 0xaee   :  { %996 = vadd.xlane.f32.xlu0 %v995_v25 }
 0xaef   :  { %v2980_v26 = vpop.eup %2979 }
 0xaf0   :  { %v998_v27 = vsel %vm12_vm0, %v2980_v26, 0.0 }
 0xaf1   :  { %999 = vadd.xlane.f32.xlu1 %v998_v27 }
 0xb76   :  { %v991_v28 = vpop.xlane.xlu0 %990 }
 0xb77   :  { %2981 = vlog2.f32 %v991_v28 }
 0xb7a   :  { %v994_v29 = vpop.xlane.xlu1 %993 }
 0xb7b   :  { %2983 = vlog2.f32 %v994_v29  ;;  %v997_v30 = vpop.xlane.xlu0 %996 }
 0xb7c   :  { %2985 = vlog2.f32 %v997_v30 }
 0xb7e   :  { %v1000_v31 = vpop.xlane.xlu1 %999 }
 0xb7f   :  { %2987 = vlog2.f32 %v1000_v31 }
 0xb81   :  { %v2982_v32 = vpop.eup %2981 }
 0xb82   :  { %v1002_v33 = vmul.f32 0.6931472, %v2982_v32 }
 0xb84   :  { %v1009_v34 = vadd.f32 %v1002_v33, %v967_v19 }
 0xb85   :  { %v2984_v35 = vpop.eup %2983 }
 0xb86   :  { %v2986_v36 = vpop.eup %2985  ;;  %v3684_v44 = vsub.f32 %v961_v40, %v1009_v34  ;;  %v1004_v46 = vmul.f32 0.6931472, %v2984_v35 }
 0xb87   :  { %v1006_v49 = vmul.f32 0.6931472, %v2986_v36 }
 0xb88   :  { %v1017_v52 = vsel %vm12_vm0, %v3684_v44, -inf  ;;  %v1010_v56 = vadd.f32 %v1004_v46, %v970_v2 }
 0xb89   :  { %v2988_v60 = vpop.eup %2987  ;;  %v1018_v1 = vrot.slane %v1017_v52, 4  ;;  %v1011_v7 = vadd.f32 %v1006_v49, %v973_v55 }
 0xb8a   :  { %v3688_v8 = vsub.f32 %v962_v53, %v1010_v56  ;;  %v1008_v12 = vmul.f32 0.6931472, %v2988_v60 }
 0xb8b   :  { %v3690_v37 = vsub.f32 %v963_v42, %v1011_v7  ;;  %v1019_v9 = vmax.f32 %v1017_v52, %v1018_v1 }
 0xb8c   :  { %v1024_v45 = vsel %vm12_vm0, %v3688_v8, -inf  ;;  %v1012_v38 = vadd.f32 %v1008_v12, %v976_v63 }
 0xb8d   :  { %v1025_v13 = vrot.slane %v1024_v45, 4  ;;  %v1031_v48 = vsel %vm12_vm0, %v3690_v37, -inf  ;;  %v1020_v39 = vrot.slane %v1019_v9, 2 }
 0xb8e   :  { %v1032_v15 = vrot.slane %v1031_v48, 4  ;;  %v3696_v11 = vsub.f32 %v964_v43, %v1012_v38 }
 0xb8f   :  { %v1021_v51 = vmax.f32 %v1019_v9, %v1020_v39  ;;  %v1026_v40 = vmax.f32 %v1024_v45, %v1025_v13 }
 0xb90   :  { %v1033_v17 = vmax.f32 %v1031_v48, %v1032_v15  ;;  %v1038_v14 = vsel %vm12_vm0, %v3696_v11, -inf }
 0xb91   :  { %v1039_v54 = vrot.slane %v1038_v14, 4  ;;  %v1022_v41 = vrot.slane %v1021_v51, 1  ;;  %v1027_v16 = vrot.slane %v1026_v40, 2 }
 0xb92   :  { %v1034_v47 = vrot.slane %v1033_v17, 2 }
 0xb93   :  { %v1040_v53 = vmax.f32 %v1038_v14, %v1039_v54  ;;  %v1023_v58 = vmax.f32 %v1021_v51, %v1022_v41  ;;  %v1028_v42 = vmax.f32 %v1026_v40, %v1027_v16 }
 0xb94   :  { %v1035_v18 = vmax.f32 %v1033_v17, %v1034_v47 }
 0xb95   :  { %v1045_v50 = vsub.f32 %v3684_v44, %v1023_v58  ;;  %v1029_v57 = vrot.slane %v1028_v42, 1  ;;  %v1041_v62 = vrot.slane %v1040_v53, 2 }
 0xb96   :  { %v1036_v43 = vrot.slane %v1035_v18, 1 }
 0xb97   :  { %v1049_v19 = vmul.f32 1.442695, %v1045_v50  ;;  %v1030_v20 = vmax.f32 %v1028_v42, %v1029_v57  ;;  %v1042_v61 = vmax.f32 %v1040_v53, %v1041_v62 }
 0xb98   :  { %v1037_v2 = vmax.f32 %v1035_v18, %v1036_v43 }
 0xb99   :  { %2989 = vpow2.f32 %v1049_v19  ;;  %v1046_v3 = vsub.f32 %v3688_v8, %v1030_v20  ;;  %v1043_v55 = vrot.slane %v1042_v61, 1 }
 0xb9a   :  { %v1047_v5 = vsub.f32 %v3690_v37, %v1037_v2 }
 0xb9b   :  { %v1051_v59 = vmul.f32 1.442695, %v1046_v3  ;;  %v1044_v4 = vmax.f32 %v1042_v61, %v1043_v55 }
 0xb9c   :  { %v1053_v63 = vmul.f32 1.442695, %v1047_v5 }
 0xb9d   :  { %2991 = vpow2.f32 %v1051_v59  ;;  %v1048_v0 = vsub.f32 %v3696_v11, %v1044_v4 }
 0xb9e   :  { %2993 = vpow2.f32 %v1053_v63 }
 0xb9f   :  { %v1055_v6 = vmul.f32 1.442695, %v1048_v0 }
 0xba1   :  { %2995 = vpow2.f32 %v1055_v6 }
 0xba3   :  { %v2990_v10 = vpop.eup %2989 }
 0xba4   :  { %v1057_v21 = vsel %vm12_vm0, %v2990_v10, 0.0 }
 0xba5   :  { %v1058_v22 = vrot.slane %v1057_v21, 4 }
 0xba7   :  { %v2992_v23 = vpop.eup %2991  ;;  %v1059_v24 = vadd.f32 %v1058_v22, %v1057_v21 }
 0xba8   :  { %v2994_v25 = vpop.eup %2993  ;;  %v1064_v26 = vsel %vm12_vm0, %v2992_v23, 0.0 }
 0xba9   :  { %v1060_v27 = vrot.slane %v1059_v24, 2  ;;  %v1065_v28 = vrot.slane %v1064_v26, 4  ;;  %v1071_v29 = vsel %vm12_vm0, %v2994_v25, 0.0 }
 0xbaa   :  { %v1072_v30 = vrot.slane %v1071_v29, 4 }
 0xbab   :  { %v2996_v31 = vpop.eup %2995  ;;  %v1061_v32 = vadd.f32 %v1060_v27, %v1059_v24  ;;  %v1066_v33 = vadd.f32 %v1065_v28, %v1064_v26 }
 0xbac   :  { %v1073_v34 = vadd.f32 %v1072_v30, %v1071_v29  ;;  %v1078_v35 = vsel %vm12_vm0, %v2996_v31, 0.0 }
 0xbad   :  { %v1062_v36 = vrot.slane %v1061_v32, 1  ;;  %v1067_v46 = vrot.slane %v1066_v33, 2  ;;  %v1079_v49 = vrot.slane %v1078_v35, 4 }
 0xbae   :  { %v1074_v52 = vrot.slane %v1073_v34, 2 }
 0xbaf   :  { %v1063_v56 = vadd.f32 %v1062_v36, %v1061_v32  ;;  %v1068_v60 = vadd.f32 %v1067_v46, %v1066_v33  ;;  %v1080_v1 = vadd.f32 %v1079_v49, %v1078_v35 }
 0xbb0   :  { %v1075_v7 = vadd.f32 %v1074_v52, %v1073_v34 }
 0xbb1   :  { %2997 = vlog2.f32 %v1063_v56  ;;  %v1069_v12 = vrot.slane %v1068_v60, 1  ;;  %v1081_v9 = vrot.slane %v1080_v1, 2 }
 0xbb2   :  { %v1076_v45 = vrot.slane %v1075_v7, 1 }
 0xbb3   :  { %v1070_v38 = vadd.f32 %v1069_v12, %v1068_v60  ;;  %v1082_v13 = vadd.f32 %v1081_v9, %v1080_v1 }
 0xbb4   :  { %v1077_v48 = vadd.f32 %v1076_v45, %v1075_v7 }
 0xbb5   :  { %2999 = vlog2.f32 %v1070_v38  ;;  %v1083_v39 = vrot.slane %v1082_v13, 1 }
 0xbb6   :  { %3001 = vlog2.f32 %v1077_v48 }
 0xbb7   :  { %v1084_v15 = vadd.f32 %v1083_v39, %v1082_v13 }
 0xbb9   :  { %3003 = vlog2.f32 %v1084_v15 }
 0xbbb   :  { %v2998_v51 = vpop.eup %2997 }
 0xbbc   :  { %v1086_v40 = vmul.f32 0.6931472, %v2998_v51 }
 0xbbe   :  { %v1093_v17 = vadd.f32 %v1086_v40, %v1023_v58 }
 0xbbf   :  { %v3000_v14 = vpop.eup %2999 }
 0xbc0   :  { %v3002_v54 = vpop.eup %3001  ;;  %v1097_v41 = vsub.f32 %v3684_v44, %v1093_v17  ;;  %v1088_v16 = vmul.f32 0.6931472, %v3000_v14 }
 0xbc1   :  { %v1090_v47 = vmul.f32 0.6931472, %v3002_v54 }
 0xbc2   :  { %v1101_v53 = vsel %vm12_vm0, %v1097_v41, -inf  ;;  %v1094_v42 = vadd.f32 %v1088_v16, %v1030_v20 }
 0xbc3   :  { %v3004_v18 = vpop.eup %3003  ;;  %1102 = vmax.xlane.f32.xlu0 %v1101_v53  ;;  %v1095_v50 = vadd.f32 %v1090_v47, %v1037_v2 }
 0xbc4   :  { %v1098_v57 = vsub.f32 %v3688_v8, %v1094_v42  ;;  %v1092_v62 = vmul.f32 0.6931472, %v3004_v18 }
 0xbc5   :  { %v1099_v43 = vsub.f32 %v3690_v37, %v1095_v50 }
 0xbc6   :  { %v1104_v19 = vsel %vm12_vm0, %v1098_v57, -inf  ;;  %v1096_v58 = vadd.f32 %v1092_v62, %v1044_v4 }
 0xbc7   :  { %1105 = vmax.xlane.f32.xlu1 %v1104_v19  ;;  %v1107_v61 = vsel %vm12_vm0, %v1099_v43, -inf }
 0xbc8   :  { %1108 = vmax.xlane.f32.xlu0 %v1107_v61  ;;  %v1100_v44 = vsub.f32 %v3696_v11, %v1096_v58 }
 0xbca   :  { %v1110_v3 = vsel %vm12_vm0, %v1100_v44, -inf }
 0xbcb   :  { %1111 = vmax.xlane.f32.xlu1 %v1110_v3 }
 0xc50   :  { %v1103_v20 = vpop.xlane.xlu0 %1102 }
 0xc51   :  { %v1113_v55 = vsub.f32 %v1097_v41, %v1103_v20 }
 0xc53   :  { %v1117_v2 = vmul.f32 1.442695, %v1113_v55 }
 0xc54   :  { %v1106_v5 = vpop.xlane.xlu1 %1105 }
 0xc55   :  { %3005 = vpow2.f32 %v1117_v2  ;;  %v1114_v8 = vsub.f32 %v1098_v57, %v1106_v5  ;;  %v1109_v59 = vpop.xlane.xlu0 %1108 }
 0xc56   :  { %v1115_v37 = vsub.f32 %v1099_v43, %v1109_v59 }
 0xc57   :  { %v1119_v63 = vmul.f32 1.442695, %v1114_v8 }
 0xc58   :  { %v1121_v0 = vmul.f32 1.442695, %v1115_v37  ;;  %v1112_v4 = vpop.xlane.xlu1 %1111 }
 0xc59   :  { %3007 = vpow2.f32 %v1119_v63  ;;  %v1116_v6 = vsub.f32 %v1100_v44, %v1112_v4 }
 0xc5a   :  { %3009 = vpow2.f32 %v1121_v0 }
 0xc5b   :  { %v1123_v10 = vmul.f32 1.442695, %v1116_v6 }
 0xc5d   :  { %3011 = vpow2.f32 %v1123_v10 }
 0xc5f   :  { %v3006_v11 = vpop.eup %3005 }
 0xc60   :  { %v1125_v21 = vsel %vm12_vm0, %v3006_v11, 0.0 }
 0xc61   :  { %1126 = vadd.xlane.f32.xlu0 %v1125_v21 }
 0xc63   :  { %v3008_v22 = vpop.eup %3007 }
 0xc64   :  { %v3010_v23 = vpop.eup %3009  ;;  %v1128_v24 = vsel %vm12_vm0, %v3008_v22, 0.0 }
 0xc65   :  { %1129 = vadd.xlane.f32.xlu1 %v1128_v24  ;;  %v1131_v25 = vsel %vm12_vm0, %v3010_v23, 0.0 }
 0xc66   :  { %1132 = vadd.xlane.f32.xlu0 %v1131_v25 }
 0xc67   :  { %v3012_v26 = vpop.eup %3011 }
 0xc68   :  { %v1134_v27 = vsel %vm12_vm0, %v3012_v26, 0.0 }
 0xc69   :  { %1135 = vadd.xlane.f32.xlu1 %v1134_v27 }
 0xcee   :  { %v1127_v28 = vpop.xlane.xlu0 %1126 }
 0xcef   :  { %3013 = vlog2.f32 %v1127_v28 }
 0xcf2   :  { %v1130_v29 = vpop.xlane.xlu1 %1129 }
 0xcf3   :  { %3015 = vlog2.f32 %v1130_v29  ;;  %v1133_v30 = vpop.xlane.xlu0 %1132 }
 0xcf4   :  { %3017 = vlog2.f32 %v1133_v30 }
 0xcf6   :  { %v1136_v31 = vpop.xlane.xlu1 %1135 }
 0xcf7   :  { %3019 = vlog2.f32 %v1136_v31 }
 0xcf9   :  { %v3014_v32 = vpop.eup %3013 }
 0xcfa   :  { %v1138_v33 = vmul.f32 0.6931472, %v3014_v32 }
 0xcfc   :  { %v1145_v34 = vadd.f32 %v1138_v33, %v1103_v20 }
 0xcfd   :  { %v3016_v35 = vpop.eup %3015 }
 0xcfe   :  { %v3018_v36 = vpop.eup %3017  ;;  %v3720_v46 = vsub.f32 %v1097_v41, %v1145_v34  ;;  %v1140_v49 = vmul.f32 0.6931472, %v3016_v35 }
 0xcff   :  { %v1142_v52 = vmul.f32 0.6931472, %v3018_v36 }
 0xd00   :  { %v1153_v56 = vsel %vm12_vm0, %v3720_v46, -inf  ;;  %v1146_v60 = vadd.f32 %v1140_v49, %v1106_v5 }
 0xd01   :  { %v3020_v1 = vpop.eup %3019  ;;  %v1154_v7 = vrot.slane %v1153_v56, 4  ;;  %v1147_v12 = vadd.f32 %v1142_v52, %v1109_v59 }
 0xd02   :  { %v3724_v9 = vsub.f32 %v1098_v57, %v1146_v60  ;;  %v1144_v45 = vmul.f32 0.6931472, %v3020_v1 }
 0xd03   :  { %v1155_v38 = vmax.f32 %v1153_v56, %v1154_v7  ;;  %v3726_v13 = vsub.f32 %v1099_v43, %v1147_v12 }
 0xd04   :  { %v1160_v48 = vsel %vm12_vm0, %v3724_v9, -inf  ;;  %v1148_v39 = vadd.f32 %v1144_v45, %v1112_v4 }
 0xd05   :  { %v1161_v15 = vrot.slane %v1160_v48, 4  ;;  %v1167_v51 = vsel %vm12_vm0, %v3726_v13, -inf  ;;  %v1156_v40 = vrot.slane %v1155_v38, 2 }
 0xd06   :  { %v1168_v17 = vrot.slane %v1167_v51, 4  ;;  %v3732_v14 = vsub.f32 %v1100_v44, %v1148_v39 }
 0xd07   :  { %v1162_v54 = vmax.f32 %v1160_v48, %v1161_v15  ;;  %v1157_v41 = vmax.f32 %v1155_v38, %v1156_v40 }
 0xd08   :  { %v1169_v16 = vmax.f32 %v1167_v51, %v1168_v17  ;;  %v1174_v47 = vsel %vm12_vm0, %v3732_v14, -inf }
 0xd09   :  { %v1175_v53 = vrot.slane %v1174_v47, 4  ;;  %v1158_v42 = vrot.slane %v1157_v41, 1  ;;  %v1163_v18 = vrot.slane %v1162_v54, 2 }
 0xd0a   :  { %v1170_v50 = vrot.slane %v1169_v16, 2 }
 0xd0b   :  { %v1176_v57 = vmax.f32 %v1174_v47, %v1175_v53  ;;  %v1159_v62 = vmax.f32 %v1157_v41, %v1158_v42  ;;  %v1164_v43 = vmax.f32 %v1162_v54, %v1163_v18 }
 0xd0c   :  { %v1171_v19 = vmax.f32 %v1169_v16, %v1170_v50 }
 0xd0d   :  { %v1181_v58 = vsub.f32 %v3720_v46, %v1159_v62  ;;  %v1165_v61 = vrot.slane %v1164_v43, 1  ;;  %v1177_v3 = vrot.slane %v1176_v57, 2 }
 0xd0e   :  { %v1172_v44 = vrot.slane %v1171_v19, 1 }
 0xd0f   :  { %v1185_v20 = vmul.f32 1.442695, %v1181_v58  ;;  %v1166_v55 = vmax.f32 %v1164_v43, %v1165_v61  ;;  %v1178_v2 = vmax.f32 %v1176_v57, %v1177_v3 }
 0xd10   :  { %v1173_v5 = vmax.f32 %v1171_v19, %v1172_v44 }
 0xd11   :  { %3021 = vpow2.f32 %v1185_v20  ;;  %v1182_v8 = vsub.f32 %v3724_v9, %v1166_v55  ;;  %v1179_v59 = vrot.slane %v1178_v2, 1 }
 0xd12   :  { %v1183_v37 = vsub.f32 %v3726_v13, %v1173_v5 }
 0xd13   :  { %v1187_v63 = vmul.f32 1.442695, %v1182_v8  ;;  %v1180_v0 = vmax.f32 %v1178_v2, %v1179_v59 }
 0xd14   :  { %v1189_v4 = vmul.f32 1.442695, %v1183_v37 }
 0xd15   :  { %3023 = vpow2.f32 %v1187_v63  ;;  %v1184_v6 = vsub.f32 %v3732_v14, %v1180_v0 }
 0xd16   :  { %3025 = vpow2.f32 %v1189_v4 }
 0xd17   :  { %v1191_v10 = vmul.f32 1.442695, %v1184_v6 }
 0xd19   :  { %3027 = vpow2.f32 %v1191_v10 }
 0xd1b   :  { %v3022_v11 = vpop.eup %3021 }
 0xd1c   :  { %v1193_v21 = vsel %vm12_vm0, %v3022_v11, 0.0 }
 0xd1d   :  { %v1194_v22 = vrot.slane %v1193_v21, 4 }
 0xd1f   :  { %v3024_v23 = vpop.eup %3023  ;;  %v1195_v24 = vadd.f32 %v1194_v22, %v1193_v21 }
 0xd20   :  { %v3026_v25 = vpop.eup %3025  ;;  %v1200_v26 = vsel %vm12_vm0, %v3024_v23, 0.0 }
 0xd21   :  { %v1196_v27 = vrot.slane %v1195_v24, 2  ;;  %v1201_v28 = vrot.slane %v1200_v26, 4  ;;  %v1207_v29 = vsel %vm12_vm0, %v3026_v25, 0.0 }
 0xd22   :  { %v1208_v30 = vrot.slane %v1207_v29, 4 }
 0xd23   :  { %v3028_v31 = vpop.eup %3027  ;;  %v1197_v32 = vadd.f32 %v1196_v27, %v1195_v24  ;;  %v1202_v33 = vadd.f32 %v1201_v28, %v1200_v26 }
 0xd24   :  { %v1209_v34 = vadd.f32 %v1208_v30, %v1207_v29  ;;  %v1214_v35 = vsel %vm12_vm0, %v3028_v31, 0.0 }
 0xd25   :  { %v1198_v36 = vrot.slane %v1197_v32, 1  ;;  %v1203_v49 = vrot.slane %v1202_v33, 2  ;;  %v1215_v52 = vrot.slane %v1214_v35, 4 }
 0xd26   :  { %v1210_v56 = vrot.slane %v1209_v34, 2 }
 0xd27   :  { %v1199_v60 = vadd.f32 %v1198_v36, %v1197_v32  ;;  %v1204_v1 = vadd.f32 %v1203_v49, %v1202_v33  ;;  %v1216_v7 = vadd.f32 %v1215_v52, %v1214_v35 }
 0xd28   :  { %v1211_v12 = vadd.f32 %v1210_v56, %v1209_v34 }
 0xd29   :  { %3029 = vlog2.f32 %v1199_v60  ;;  %v1205_v45 = vrot.slane %v1204_v1, 1  ;;  %v1217_v38 = vrot.slane %v1216_v7, 2 }
 0xd2a   :  { %v1212_v48 = vrot.slane %v1211_v12, 1 }
 0xd2b   :  { %v1206_v39 = vadd.f32 %v1205_v45, %v1204_v1  ;;  %v1218_v15 = vadd.f32 %v1217_v38, %v1216_v7 }
 0xd2c   :  { %v1213_v51 = vadd.f32 %v1212_v48, %v1211_v12 }
 0xd2d   :  { %3031 = vlog2.f32 %v1206_v39  ;;  %v1219_v40 = vrot.slane %v1218_v15, 1 }
 0xd2e   :  { %3033 = vlog2.f32 %v1213_v51 }
 0xd2f   :  { %v1220_v17 = vadd.f32 %v1219_v40, %v1218_v15 }
 0xd31   :  { %3035 = vlog2.f32 %v1220_v17 }
 0xd33   :  { %v3030_v54 = vpop.eup %3029 }
 0xd34   :  { %v1222_v41 = vmul.f32 0.6931472, %v3030_v54 }
 0xd36   :  { %v1229_v16 = vadd.f32 %v1222_v41, %v1159_v62 }
 0xd37   :  { %v3032_v47 = vpop.eup %3031 }
 0xd38   :  { %v3034_v53 = vpop.eup %3033  ;;  %v1233_v42 = vsub.f32 %v3720_v46, %v1229_v16  ;;  %v1224_v18 = vmul.f32 0.6931472, %v3032_v47 }
 0xd39   :  { %v1226_v50 = vmul.f32 0.6931472, %v3034_v53 }
 0xd3a   :  { %v1237_v57 = vsel %vm12_vm0, %v1233_v42, -inf  ;;  %v1230_v43 = vadd.f32 %v1224_v18, %v1166_v55 }
 0xd3b   :  { %v3036_v19 = vpop.eup %3035  ;;  %1238 = vmax.xlane.f32.xlu0 %v1237_v57  ;;  %v1231_v58 = vadd.f32 %v1226_v50, %v1173_v5 }
 0xd3c   :  { %v1234_v61 = vsub.f32 %v3724_v9, %v1230_v43  ;;  %v1228_v3 = vmul.f32 0.6931472, %v3036_v19 }
 0xd3d   :  { %v1235_v44 = vsub.f32 %v3726_v13, %v1231_v58 }
 0xd3e   :  { %v1240_v20 = vsel %vm12_vm0, %v1234_v61, -inf  ;;  %v1232_v62 = vadd.f32 %v1228_v3, %v1180_v0 }
 0xd3f   :  { %1241 = vmax.xlane.f32.xlu1 %v1240_v20  ;;  %v1243_v2 = vsel %vm12_vm0, %v1235_v44, -inf }
 0xd40   :  { %1244 = vmax.xlane.f32.xlu0 %v1243_v2  ;;  %v1236_v46 = vsub.f32 %v3732_v14, %v1232_v62 }
 0xd42   :  { %v1246_v8 = vsel %vm12_vm0, %v1236_v46, -inf }
 0xd43   :  { %1247 = vmax.xlane.f32.xlu1 %v1246_v8 }
 0xdc8   :  { %v1239_v55 = vpop.xlane.xlu0 %1238 }
 0xdc9   :  { %v1249_v59 = vsub.f32 %v1233_v42, %v1239_v55 }
 0xdcb   :  { %v1253_v5 = vmul.f32 1.442695, %v1249_v59 }
 0xdcc   :  { %v1242_v37 = vpop.xlane.xlu1 %1241 }
 0xdcd   :  { %3037 = vpow2.f32 %v1253_v5  ;;  %v1250_v9 = vsub.f32 %v1234_v61, %v1242_v37  ;;  %v1245_v63 = vpop.xlane.xlu0 %1244 }
 0xdce   :  { %v1251_v13 = vsub.f32 %v1235_v44, %v1245_v63 }
 0xdcf   :  { %v1255_v4 = vmul.f32 1.442695, %v1250_v9 }
 0xdd0   :  { %v1257_v6 = vmul.f32 1.442695, %v1251_v13  ;;  %v1248_v0 = vpop.xlane.xlu1 %1247 }
 0xdd1   :  { %3039 = vpow2.f32 %v1255_v4  ;;  %v1252_v10 = vsub.f32 %v1236_v46, %v1248_v0 }
 0xdd2   :  { %3041 = vpow2.f32 %v1257_v6 }
 0xdd3   :  { %v1259_v11 = vmul.f32 1.442695, %v1252_v10 }
 0xdd5   :  { %3043 = vpow2.f32 %v1259_v11 }
 0xdd7   :  { %v3038_v14 = vpop.eup %3037 }
 0xdd8   :  { %v1261_v21 = vsel %vm12_vm0, %v3038_v14, 0.0 }
 0xdd9   :  { %1262 = vadd.xlane.f32.xlu0 %v1261_v21 }
 0xddb   :  { %v3040_v22 = vpop.eup %3039 }
 0xddc   :  { %v3042_v23 = vpop.eup %3041  ;;  %v1264_v24 = vsel %vm12_vm0, %v3040_v22, 0.0 }
 0xddd   :  { %1265 = vadd.xlane.f32.xlu1 %v1264_v24  ;;  %v1267_v25 = vsel %vm12_vm0, %v3042_v23, 0.0 }
 0xdde   :  { %1268 = vadd.xlane.f32.xlu0 %v1267_v25 }
 0xddf   :  { %v3044_v26 = vpop.eup %3043 }
 0xde0   :  { %v1270_v27 = vsel %vm12_vm0, %v3044_v26, 0.0 }
 0xde1   :  { %1271 = vadd.xlane.f32.xlu1 %v1270_v27 }
 0xe66   :  { %v1263_v28 = vpop.xlane.xlu0 %1262 }
 0xe67   :  { %3045 = vlog2.f32 %v1263_v28 }
 0xe6a   :  { %v1266_v29 = vpop.xlane.xlu1 %1265 }
 0xe6b   :  { %3047 = vlog2.f32 %v1266_v29  ;;  %v1269_v30 = vpop.xlane.xlu0 %1268 }
 0xe6c   :  { %3049 = vlog2.f32 %v1269_v30 }
 0xe6e   :  { %v1272_v31 = vpop.xlane.xlu1 %1271 }
 0xe6f   :  { %3051 = vlog2.f32 %v1272_v31 }
 0xe71   :  { %v3046_v32 = vpop.eup %3045 }
 0xe72   :  { %v1274_v33 = vmul.f32 0.6931472, %v3046_v32 }
 0xe74   :  { %v1281_v34 = vadd.f32 %v1274_v33, %v1239_v55 }
 0xe75   :  { %v3048_v35 = vpop.eup %3047 }
 0xe76   :  { %v3050_v36 = vpop.eup %3049  ;;  %v3756_v49 = vsub.f32 %v1233_v42, %v1281_v34  ;;  %v1276_v52 = vmul.f32 0.6931472, %v3048_v35 }
 0xe77   :  { %v1278_v56 = vmul.f32 0.6931472, %v3050_v36 }
 0xe78   :  { %v1289_v60 = vsel %vm12_vm0, %v3756_v49, -inf  ;;  %v1282_v1 = vadd.f32 %v1276_v52, %v1242_v37 }
 0xe79   :  { %v3052_v7 = vpop.eup %3051  ;;  %v1290_v12 = vrot.slane %v1289_v60, 4  ;;  %v1283_v45 = vadd.f32 %v1278_v56, %v1245_v63 }
 0xe7a   :  { %v3760_v38 = vsub.f32 %v1234_v61, %v1282_v1  ;;  %v1280_v48 = vmul.f32 0.6931472, %v3052_v7 }
 0xe7b   :  { %v1291_v39 = vmax.f32 %v1289_v60, %v1290_v12  ;;  %v3762_v15 = vsub.f32 %v1235_v44, %v1283_v45 }
 0xe7c   :  { %v1296_v51 = vsel %vm12_vm0, %v3760_v38, -inf  ;;  %v1284_v40 = vadd.f32 %v1280_v48, %v1248_v0 }
 0xe7d   :  { %v1297_v17 = vrot.slane %v1296_v51, 4  ;;  %v1303_v54 = vsel %vm12_vm0, %v3762_v15, -inf  ;;  %v1292_v41 = vrot.slane %v1291_v39, 2 }
 0xe7e   :  { %v1304_v16 = vrot.slane %v1303_v54, 4  ;;  %v3768_v47 = vsub.f32 %v1236_v46, %v1284_v40 }
 0xe7f   :  { %v1298_v53 = vmax.f32 %v1296_v51, %v1297_v17  ;;  %v1293_v42 = vmax.f32 %v1291_v39, %v1292_v41 }
 0xe80   :  { %v1305_v18 = vmax.f32 %v1303_v54, %v1304_v16  ;;  %v1310_v50 = vsel %vm12_vm0, %v3768_v47, -inf }
 0xe81   :  { %v1311_v57 = vrot.slane %v1310_v50, 4  ;;  %v1294_v43 = vrot.slane %v1293_v42, 1  ;;  %v1299_v19 = vrot.slane %v1298_v53, 2 }
 0xe82   :  { %v1306_v58 = vrot.slane %v1305_v18, 2 }
 0xe83   :  { %v1312_v61 = vmax.f32 %v1310_v50, %v1311_v57  ;;  %v1295_v3 = vmax.f32 %v1293_v42, %v1294_v43  ;;  %v1300_v44 = vmax.f32 %v1298_v53, %v1299_v19 }
 0xe84   :  { %v1307_v20 = vmax.f32 %v1305_v18, %v1306_v58 }
 0xe85   :  { %v1317_v62 = vsub.f32 %v3756_v49, %v1295_v3  ;;  %v1301_v2 = vrot.slane %v1300_v44, 1  ;;  %v1313_v8 = vrot.slane %v1312_v61, 2 }
 0xe86   :  { %v1308_v46 = vrot.slane %v1307_v20, 1 }
 0xe87   :  { %v1321_v55 = vmul.f32 1.442695, %v1317_v62  ;;  %v1302_v59 = vmax.f32 %v1300_v44, %v1301_v2  ;;  %v1314_v5 = vmax.f32 %v1312_v61, %v1313_v8 }
 0xe88   :  { %v1309_v37 = vmax.f32 %v1307_v20, %v1308_v46 }
 0xe89   :  { %3053 = vpow2.f32 %v1321_v55  ;;  %v1318_v9 = vsub.f32 %v3760_v38, %v1302_v59  ;;  %v1315_v63 = vrot.slane %v1314_v5, 1 }
 0xe8a   :  { %v1319_v13 = vsub.f32 %v3762_v15, %v1309_v37 }
 0xe8b   :  { %v1323_v4 = vmul.f32 1.442695, %v1318_v9  ;;  %v1316_v6 = vmax.f32 %v1314_v5, %v1315_v63 }
 0xe8c   :  { %v1325_v0 = vmul.f32 1.442695, %v1319_v13 }
 0xe8d   :  { %3055 = vpow2.f32 %v1323_v4  ;;  %v1320_v10 = vsub.f32 %v3768_v47, %v1316_v6 }
 0xe8e   :  { %3057 = vpow2.f32 %v1325_v0 }
 0xe8f   :  { %v1327_v11 = vmul.f32 1.442695, %v1320_v10 }
 0xe91   :  { %3059 = vpow2.f32 %v1327_v11 }
 0xe93   :  { %v3054_v14 = vpop.eup %3053 }
 0xe94   :  { %v1329_v21 = vsel %vm12_vm0, %v3054_v14, 0.0 }
 0xe95   :  { %v1330_v22 = vrot.slane %v1329_v21, 4 }
 0xe97   :  { %v3056_v23 = vpop.eup %3055  ;;  %v1331_v24 = vadd.f32 %v1330_v22, %v1329_v21 }
 0xe98   :  { %v3058_v25 = vpop.eup %3057  ;;  %v1336_v26 = vsel %vm12_vm0, %v3056_v23, 0.0 }
 0xe99   :  { %v1332_v27 = vrot.slane %v1331_v24, 2  ;;  %v1337_v28 = vrot.slane %v1336_v26, 4  ;;  %v1343_v29 = vsel %vm12_vm0, %v3058_v25, 0.0 }
 0xe9a   :  { %v1344_v30 = vrot.slane %v1343_v29, 4 }
 0xe9b   :  { %v3060_v31 = vpop.eup %3059  ;;  %v1333_v32 = vadd.f32 %v1332_v27, %v1331_v24  ;;  %v1338_v33 = vadd.f32 %v1337_v28, %v1336_v26 }
 0xe9c   :  { %v1345_v34 = vadd.f32 %v1344_v30, %v1343_v29  ;;  %v1350_v35 = vsel %vm12_vm0, %v3060_v31, 0.0 }
 0xe9d   :  { %v1334_v36 = vrot.slane %v1333_v32, 1  ;;  %v1339_v52 = vrot.slane %v1338_v33, 2  ;;  %v1351_v56 = vrot.slane %v1350_v35, 4 }
 0xe9e   :  { %v1346_v60 = vrot.slane %v1345_v34, 2 }
 0xe9f   :  { %v1335_v1 = vadd.f32 %v1334_v36, %v1333_v32  ;;  %v1340_v7 = vadd.f32 %v1339_v52, %v1338_v33  ;;  %v1352_v12 = vadd.f32 %v1351_v56, %v1350_v35 }
 0xea0   :  { %v1347_v45 = vadd.f32 %v1346_v60, %v1345_v34 }
 0xea1   :  { %3061 = vlog2.f32 %v1335_v1  ;;  %v1341_v48 = vrot.slane %v1340_v7, 1  ;;  %v1353_v39 = vrot.slane %v1352_v12, 2 }
 0xea2   :  { %v1348_v51 = vrot.slane %v1347_v45, 1 }
 0xea3   :  { %v1342_v40 = vadd.f32 %v1341_v48, %v1340_v7  ;;  %v1354_v17 = vadd.f32 %v1353_v39, %v1352_v12 }
 0xea4   :  { %v1349_v54 = vadd.f32 %v1348_v51, %v1347_v45 }
 0xea5   :  { %3063 = vlog2.f32 %v1342_v40  ;;  %v1355_v41 = vrot.slane %v1354_v17, 1 }
 0xea6   :  { %3065 = vlog2.f32 %v1349_v54 }
 0xea7   :  { %v1356_v16 = vadd.f32 %v1355_v41, %v1354_v17 }
 0xea9   :  { %3067 = vlog2.f32 %v1356_v16 }
 0xeab   :  { %v3062_v53 = vpop.eup %3061 }
 0xeac   :  { %v1358_v42 = vmul.f32 0.6931472, %v3062_v53 }
 0xeae   :  { %v1365_v18 = vadd.f32 %v1358_v42, %v1295_v3 }
 0xeaf   :  { %v3064_v50 = vpop.eup %3063 }
 0xeb0   :  { %v3066_v57 = vpop.eup %3065  ;;  %v1369_v43 = vsub.f32 %v3756_v49, %v1365_v18  ;;  %v1360_v19 = vmul.f32 0.6931472, %v3064_v50 }
 0xeb1   :  { %v1362_v58 = vmul.f32 0.6931472, %v3066_v57 }
 0xeb2   :  { %v1373_v61 = vsel %vm12_vm0, %v1369_v43, -inf  ;;  %v1366_v44 = vadd.f32 %v1360_v19, %v1302_v59 }
 0xeb3   :  { %v3068_v20 = vpop.eup %3067  ;;  %1374 = vmax.xlane.f32.xlu0 %v1373_v61  ;;  %v1367_v62 = vadd.f32 %v1362_v58, %v1309_v37 }
 0xeb4   :  { %v1370_v2 = vsub.f32 %v3760_v38, %v1366_v44  ;;  %v1364_v8 = vmul.f32 0.6931472, %v3068_v20 }
 0xeb5   :  { %v1371_v46 = vsub.f32 %v3762_v15, %v1367_v62 }
 0xeb6   :  { %v1376_v55 = vsel %vm12_vm0, %v1370_v2, -inf  ;;  %v1368_v3 = vadd.f32 %v1364_v8, %v1316_v6 }
 0xeb7   :  { %1377 = vmax.xlane.f32.xlu1 %v1376_v55  ;;  %v1379_v5 = vsel %vm12_vm0, %v1371_v46, -inf }
 0xeb8   :  { %1380 = vmax.xlane.f32.xlu0 %v1379_v5  ;;  %v1372_v49 = vsub.f32 %v3768_v47, %v1368_v3 }
 0xeba   :  { %v1382_v9 = vsel %vm12_vm0, %v1372_v49, -inf }
 0xebb   :  { %1383 = vmax.xlane.f32.xlu1 %v1382_v9 }
 0xf40   :  { %v1375_v59 = vpop.xlane.xlu0 %1374 }
 0xf41   :  { %v1385_v63 = vsub.f32 %v1369_v43, %v1375_v59 }
 0xf43   :  { %v1389_v37 = vmul.f32 1.442695, %v1385_v63 }
 0xf44   :  { %v1378_v13 = vpop.xlane.xlu1 %1377 }
 0xf45   :  { %3069 = vpow2.f32 %v1389_v37  ;;  %v1386_v38 = vsub.f32 %v1370_v2, %v1378_v13  ;;  %v1381_v4 = vpop.xlane.xlu0 %1380 }
 0xf46   :  { %v1387_v15 = vsub.f32 %v1371_v46, %v1381_v4 }
 0xf47   :  { %v1391_v0 = vmul.f32 1.442695, %v1386_v38 }
 0xf48   :  { %v1393_v10 = vmul.f32 1.442695, %v1387_v15  ;;  %v1384_v6 = vpop.xlane.xlu1 %1383 }
 0xf49   :  { %3071 = vpow2.f32 %v1391_v0  ;;  %v1388_v11 = vsub.f32 %v1372_v49, %v1384_v6 }
 0xf4a   :  { %3073 = vpow2.f32 %v1393_v10 }
 0xf4b   :  { %v1395_v14 = vmul.f32 1.442695, %v1388_v11 }
 0xf4d   :  { %3075 = vpow2.f32 %v1395_v14 }
 0xf4f   :  { %v3070_v47 = vpop.eup %3069 }
 0xf50   :  { %v1397_v21 = vsel %vm12_vm0, %v3070_v47, 0.0 }
 0xf51   :  { %1398 = vadd.xlane.f32.xlu0 %v1397_v21 }
 0xf53   :  { %v3072_v22 = vpop.eup %3071 }
 0xf54   :  { %v3074_v23 = vpop.eup %3073  ;;  %v1400_v24 = vsel %vm12_vm0, %v3072_v22, 0.0 }
 0xf55   :  { %1401 = vadd.xlane.f32.xlu1 %v1400_v24  ;;  %v1403_v25 = vsel %vm12_vm0, %v3074_v23, 0.0 }
 0xf56   :  { %1404 = vadd.xlane.f32.xlu0 %v1403_v25 }
 0xf57   :  { %v3076_v26 = vpop.eup %3075 }
 0xf58   :  { %v1406_v27 = vsel %vm12_vm0, %v3076_v26, 0.0 }
 0xf59   :  { %1407 = vadd.xlane.f32.xlu1 %v1406_v27 }
 0xfde   :  { %v1399_v28 = vpop.xlane.xlu0 %1398 }
 0xfdf   :  { %3077 = vlog2.f32 %v1399_v28 }
 0xfe2   :  { %v1402_v29 = vpop.xlane.xlu1 %1401 }
 0xfe3   :  { %3079 = vlog2.f32 %v1402_v29  ;;  %v1405_v30 = vpop.xlane.xlu0 %1404 }
 0xfe4   :  { %3081 = vlog2.f32 %v1405_v30 }
 0xfe6   :  { %v1408_v31 = vpop.xlane.xlu1 %1407 }
 0xfe7   :  { %3083 = vlog2.f32 %v1408_v31 }
 0xfe9   :  { %v3078_v32 = vpop.eup %3077 }
 0xfea   :  { %v1410_v33 = vmul.f32 0.6931472, %v3078_v32 }
 0xfec   :  { %v1417_v34 = vadd.f32 %v1410_v33, %v1375_v59 }
 0xfed   :  { %v3080_v35 = vpop.eup %3079 }
 0xfee   :  { %v3082_v36 = vpop.eup %3081  ;;  %v3792_v52 = vsub.f32 %v1369_v43, %v1417_v34  ;;  %v1412_v56 = vmul.f32 0.6931472, %v3080_v35 }
 0xfef   :  { %v1414_v60 = vmul.f32 0.6931472, %v3082_v36 }
 0xff0   :  { %v1425_v1 = vsel %vm12_vm0, %v3792_v52, -inf  ;;  %v1418_v7 = vadd.f32 %v1412_v56, %v1378_v13 }
 0xff1   :  { %v3084_v12 = vpop.eup %3083  ;;  %v1426_v45 = vrot.slane %v1425_v1, 4  ;;  %v1419_v48 = vadd.f32 %v1414_v60, %v1381_v4 }
 0xff2   :  { %v3796_v39 = vsub.f32 %v1370_v2, %v1418_v7  ;;  %v1416_v51 = vmul.f32 0.6931472, %v3084_v12 }
 0xff3   :  { %v1427_v40 = vmax.f32 %v1425_v1, %v1426_v45  ;;  %v3798_v17 = vsub.f32 %v1371_v46, %v1419_v48 }
 0xff4   :  { %v1432_v54 = vsel %vm12_vm0, %v3796_v39, -inf  ;;  %v1420_v41 = vadd.f32 %v1416_v51, %v1384_v6 }
 0xff5   :  { %v1433_v16 = vrot.slane %v1432_v54, 4  ;;  %v1439_v53 = vsel %vm12_vm0, %v3798_v17, -inf  ;;  %v1428_v42 = vrot.slane %v1427_v40, 2 }
 0xff6   :  { %v1440_v18 = vrot.slane %v1439_v53, 4  ;;  %v3804_v50 = vsub.f32 %v1372_v49, %v1420_v41 }
 0xff7   :  { %v1434_v57 = vmax.f32 %v1432_v54, %v1433_v16  ;;  %v1429_v43 = vmax.f32 %v1427_v40, %v1428_v42 }
 0xff8   :  { %v1441_v19 = vmax.f32 %v1439_v53, %v1440_v18  ;;  %v1446_v58 = vsel %vm12_vm0, %v3804_v50, -inf }
 0xff9   :  { %v1447_v61 = vrot.slane %v1446_v58, 4  ;;  %v1430_v44 = vrot.slane %v1429_v43, 1  ;;  %v1435_v20 = vrot.slane %v1434_v57, 2 }
 0xffa   :  { %v1442_v62 = vrot.slane %v1441_v19, 2 }
 0xffb   :  { %v1448_v2 = vmax.f32 %v1446_v58, %v1447_v61  ;;  %v1431_v8 = vmax.f32 %v1429_v43, %v1430_v44  ;;  %v1436_v46 = vmax.f32 %v1434_v57, %v1435_v20 }
 0xffc   :  { %v1443_v55 = vmax.f32 %v1441_v19, %v1442_v62 }
 0xffd   :  { %v1453_v3 = vsub.f32 %v3792_v52, %v1431_v8  ;;  %v1437_v5 = vrot.slane %v1436_v46, 1  ;;  %v1449_v9 = vrot.slane %v1448_v2, 2 }
 0xffe   :  { %v1444_v49 = vrot.slane %v1443_v55, 1 }
 0xfff   :  { %v1457_v59 = vmul.f32 1.442695, %v1453_v3  ;;  %v1438_v63 = vmax.f32 %v1436_v46, %v1437_v5  ;;  %v1450_v37 = vmax.f32 %v1448_v2, %v1449_v9 }
0x1000   :  { %v1445_v13 = vmax.f32 %v1443_v55, %v1444_v49 }
0x1001   :  { %3085 = vpow2.f32 %v1457_v59  ;;  %v1454_v38 = vsub.f32 %v3796_v39, %v1438_v63  ;;  %v1451_v4 = vrot.slane %v1450_v37, 1 }
0x1002   :  { %v1455_v15 = vsub.f32 %v3798_v17, %v1445_v13 }
0x1003   :  { %v1459_v0 = vmul.f32 1.442695, %v1454_v38  ;;  %v1452_v10 = vmax.f32 %v1450_v37, %v1451_v4 }
0x1004   :  { %v1461_v6 = vmul.f32 1.442695, %v1455_v15 }
0x1005   :  { %3087 = vpow2.f32 %v1459_v0  ;;  %v1456_v11 = vsub.f32 %v3804_v50, %v1452_v10 }
0x1006   :  { %3089 = vpow2.f32 %v1461_v6 }
0x1007   :  { %v1463_v14 = vmul.f32 1.442695, %v1456_v11 }
0x1009   :  { %3091 = vpow2.f32 %v1463_v14 }
0x100b   :  { %v3086_v47 = vpop.eup %3085 }
0x100c   :  { %v1465_v21 = vsel %vm12_vm0, %v3086_v47, 0.0 }
0x100d   :  { %v1466_v22 = vrot.slane %v1465_v21, 4 }
0x100f   :  { %v3088_v23 = vpop.eup %3087  ;;  %v1467_v24 = vadd.f32 %v1466_v22, %v1465_v21 }
0x1010   :  { %v3090_v25 = vpop.eup %3089  ;;  %v1472_v26 = vsel %vm12_vm0, %v3088_v23, 0.0 }
0x1011   :  { %v1468_v27 = vrot.slane %v1467_v24, 2  ;;  %v1473_v28 = vrot.slane %v1472_v26, 4  ;;  %v1479_v29 = vsel %vm12_vm0, %v3090_v25, 0.0 }
0x1012   :  { %v1480_v30 = vrot.slane %v1479_v29, 4 }
0x1013   :  { %v3092_v31 = vpop.eup %3091  ;;  %v1469_v32 = vadd.f32 %v1468_v27, %v1467_v24  ;;  %v1474_v33 = vadd.f32 %v1473_v28, %v1472_v26 }
0x1014   :  { %v1481_v34 = vadd.f32 %v1480_v30, %v1479_v29  ;;  %v1486_v35 = vsel %vm12_vm0, %v3092_v31, 0.0 }
0x1015   :  { %v1470_v36 = vrot.slane %v1469_v32, 1  ;;  %v1475_v56 = vrot.slane %v1474_v33, 2  ;;  %v1487_v60 = vrot.slane %v1486_v35, 4 }
0x1016   :  { %v1482_v1 = vrot.slane %v1481_v34, 2 }
0x1017   :  { %v1471_v7 = vadd.f32 %v1470_v36, %v1469_v32  ;;  %v1476_v12 = vadd.f32 %v1475_v56, %v1474_v33  ;;  %v1488_v45 = vadd.f32 %v1487_v60, %v1486_v35 }
0x1018   :  { %v1483_v48 = vadd.f32 %v1482_v1, %v1481_v34 }
0x1019   :  { %3093 = vlog2.f32 %v1471_v7  ;;  %v1477_v51 = vrot.slane %v1476_v12, 1  ;;  %v1489_v40 = vrot.slane %v1488_v45, 2 }
0x101a   :  { %v1484_v54 = vrot.slane %v1483_v48, 1 }
0x101b   :  { %v1478_v41 = vadd.f32 %v1477_v51, %v1476_v12  ;;  %v1490_v16 = vadd.f32 %v1489_v40, %v1488_v45 }
0x101c   :  { %v1485_v53 = vadd.f32 %v1484_v54, %v1483_v48 }
0x101d   :  { %3095 = vlog2.f32 %v1478_v41  ;;  %v1491_v42 = vrot.slane %v1490_v16, 1 }
0x101e   :  { %3097 = vlog2.f32 %v1485_v53 }
0x101f   :  { %v1492_v18 = vadd.f32 %v1491_v42, %v1490_v16 }
0x1021   :  { %3099 = vlog2.f32 %v1492_v18 }
0x1023   :  { %v3094_v57 = vpop.eup %3093 }
0x1024   :  { %v1494_v43 = vmul.f32 0.6931472, %v3094_v57 }
0x1026   :  { %v1501_v19 = vadd.f32 %v1494_v43, %v1431_v8 }
0x1027   :  { %v3096_v58 = vpop.eup %3095 }
0x1028   :  { %v3098_v61 = vpop.eup %3097  ;;  %v1505_v44 = vsub.f32 %v3792_v52, %v1501_v19  ;;  %v1496_v20 = vmul.f32 0.6931472, %v3096_v58 }
0x1029   :  { %v1498_v62 = vmul.f32 0.6931472, %v3098_v61 }
0x102a   :  { %v1509_v2 = vsel %vm12_vm0, %v1505_v44, -inf  ;;  %v1502_v46 = vadd.f32 %v1496_v20, %v1438_v63 }
0x102b   :  { %v3100_v55 = vpop.eup %3099  ;;  %1510 = vmax.xlane.f32.xlu0 %v1509_v2  ;;  %v1503_v3 = vadd.f32 %v1498_v62, %v1445_v13 }
0x102c   :  { %v1506_v5 = vsub.f32 %v3796_v39, %v1502_v46  ;;  %v1500_v9 = vmul.f32 0.6931472, %v3100_v55 }
0x102d   :  { %v1507_v49 = vsub.f32 %v3798_v17, %v1503_v3 }
0x102e   :  { %v1512_v59 = vsel %vm12_vm0, %v1506_v5, -inf  ;;  %v1504_v8 = vadd.f32 %v1500_v9, %v1452_v10 }
0x102f   :  { %1513 = vmax.xlane.f32.xlu1 %v1512_v59  ;;  %v1515_v37 = vsel %vm12_vm0, %v1507_v49, -inf }
0x1030   :  { %1516 = vmax.xlane.f32.xlu0 %v1515_v37  ;;  %v1508_v52 = vsub.f32 %v3804_v50, %v1504_v8 }
0x1032   :  { %v1518_v38 = vsel %vm12_vm0, %v1508_v52, -inf }
0x1033   :  { %1519 = vmax.xlane.f32.xlu1 %v1518_v38 }
0x10b8   :  { %v1511_v63 = vpop.xlane.xlu0 %1510 }
0x10b9   :  { %v1521_v4 = vsub.f32 %v1505_v44, %v1511_v63 }
0x10bb   :  { %v1525_v13 = vmul.f32 1.442695, %v1521_v4 }
0x10bc   :  { %v1514_v15 = vpop.xlane.xlu1 %1513 }
0x10bd   :  { %3101 = vpow2.f32 %v1525_v13  ;;  %v1522_v39 = vsub.f32 %v1506_v5, %v1514_v15  ;;  %v1517_v0 = vpop.xlane.xlu0 %1516 }
0x10be   :  { %v1523_v17 = vsub.f32 %v1507_v49, %v1517_v0 }
0x10bf   :  { %v1527_v6 = vmul.f32 1.442695, %v1522_v39 }
0x10c0   :  { %v1529_v11 = vmul.f32 1.442695, %v1523_v17  ;;  %v1520_v10 = vpop.xlane.xlu1 %1519 }
0x10c1   :  { %3103 = vpow2.f32 %v1527_v6  ;;  %v1524_v14 = vsub.f32 %v1508_v52, %v1520_v10 }
0x10c2   :  { %3105 = vpow2.f32 %v1529_v11 }
0x10c3   :  { %v1531_v47 = vmul.f32 1.442695, %v1524_v14 }
0x10c5   :  { %3107 = vpow2.f32 %v1531_v47 }
0x10c7   :  { %v3102_v50 = vpop.eup %3101 }
0x10c8   :  { %v1533_v21 = vsel %vm12_vm0, %v3102_v50, 0.0 }
0x10c9   :  { %1534 = vadd.xlane.f32.xlu0 %v1533_v21 }
0x10cb   :  { %v3104_v22 = vpop.eup %3103 }
0x10cc   :  { %v3106_v23 = vpop.eup %3105  ;;  %v1536_v24 = vsel %vm12_vm0, %v3104_v22, 0.0 }
0x10cd   :  { %1537 = vadd.xlane.f32.xlu1 %v1536_v24  ;;  %v1539_v25 = vsel %vm12_vm0, %v3106_v23, 0.0 }
0x10ce   :  { %1540 = vadd.xlane.f32.xlu0 %v1539_v25 }
0x10cf   :  { %v3108_v26 = vpop.eup %3107 }
0x10d0   :  { %v1542_v27 = vsel %vm12_vm0, %v3108_v26, 0.0 }
0x10d1   :  { %1543 = vadd.xlane.f32.xlu1 %v1542_v27 }
0x1156   :  { %v1535_v28 = vpop.xlane.xlu0 %1534 }
0x1157   :  { %3109 = vlog2.f32 %v1535_v28 }
0x115a   :  { %v1538_v29 = vpop.xlane.xlu1 %1537 }
0x115b   :  { %3111 = vlog2.f32 %v1538_v29  ;;  %v1541_v30 = vpop.xlane.xlu0 %1540 }
0x115c   :  { %3113 = vlog2.f32 %v1541_v30 }
0x115e   :  { %v1544_v31 = vpop.xlane.xlu1 %1543 }
0x115f   :  { %3115 = vlog2.f32 %v1544_v31 }
0x1161   :  { %v3110_v32 = vpop.eup %3109 }
0x1162   :  { %v1546_v33 = vmul.f32 0.6931472, %v3110_v32 }
0x1164   :  { %v1553_v34 = vadd.f32 %v1546_v33, %v1511_v63 }
0x1165   :  { %v3112_v35 = vpop.eup %3111 }
0x1166   :  { %v3114_v36 = vpop.eup %3113  ;;  %v3828_v56 = vsub.f32 %v1505_v44, %v1553_v34  ;;  %v1548_v60 = vmul.f32 0.6931472, %v3112_v35 }
0x1167   :  { %v1550_v1 = vmul.f32 0.6931472, %v3114_v36 }
0x1168   :  { %v1561_v7 = vsel %vm12_vm0, %v3828_v56, -inf  ;;  %v1554_v12 = vadd.f32 %v1548_v60, %v1514_v15 }
0x1169   :  { %v3116_v45 = vpop.eup %3115  ;;  %v1562_v48 = vrot.slane %v1561_v7, 4  ;;  %v1555_v51 = vadd.f32 %v1550_v1, %v1517_v0 }
0x116a   :  { %v3832_v40 = vsub.f32 %v1506_v5, %v1554_v12  ;;  %v1552_v54 = vmul.f32 0.6931472, %v3116_v45 }
0x116b   :  { %v1563_v41 = vmax.f32 %v1561_v7, %v1562_v48  ;;  %v3834_v16 = vsub.f32 %v1507_v49, %v1555_v51 }
0x116c   :  { %v1568_v53 = vsel %vm12_vm0, %v3832_v40, -inf  ;;  %v1556_v42 = vadd.f32 %v1552_v54, %v1520_v10 }
0x116d   :  { %v1569_v18 = vrot.slane %v1568_v53, 4  ;;  %v1575_v57 = vsel %vm12_vm0, %v3834_v16, -inf  ;;  %v1564_v43 = vrot.slane %v1563_v41, 2 }
0x116e   :  { %v1576_v19 = vrot.slane %v1575_v57, 4  ;;  %v3840_v58 = vsub.f32 %v1508_v52, %v1556_v42 }
0x116f   :  { %v1570_v61 = vmax.f32 %v1568_v53, %v1569_v18  ;;  %v1565_v44 = vmax.f32 %v1563_v41, %v1564_v43 }
0x1170   :  { %v1577_v20 = vmax.f32 %v1575_v57, %v1576_v19  ;;  %v1582_v62 = vsel %vm12_vm0, %v3840_v58, -inf }
0x1171   :  { %v1583_v2 = vrot.slane %v1582_v62, 4  ;;  %v1566_v46 = vrot.slane %v1565_v44, 1  ;;  %v1571_v55 = vrot.slane %v1570_v61, 2 }
0x1172   :  { %v1578_v3 = vrot.slane %v1577_v20, 2 }
0x1173   :  { %v1584_v5 = vmax.f32 %v1582_v62, %v1583_v2  ;;  %v1567_v9 = vmax.f32 %v1565_v44, %v1566_v46  ;;  %v1572_v49 = vmax.f32 %v1570_v61, %v1571_v55 }
0x1174   :  { %v1579_v59 = vmax.f32 %v1577_v20, %v1578_v3 }
0x1175   :  { %v1589_v8 = vsub.f32 %v3828_v56, %v1567_v9  ;;  %v1573_v37 = vrot.slane %v1572_v49, 1  ;;  %v1585_v38 = vrot.slane %v1584_v5, 2 }
0x1176   :  { %v1580_v52 = vrot.slane %v1579_v59, 1 }
0x1177   :  { %v1593_v63 = vmul.f32 1.442695, %v1589_v8  ;;  %v1574_v4 = vmax.f32 %v1572_v49, %v1573_v37  ;;  %v1586_v13 = vmax.f32 %v1584_v5, %v1585_v38 }
0x1178   :  { %v1581_v15 = vmax.f32 %v1579_v59, %v1580_v52 }
0x1179   :  { %3117 = vpow2.f32 %v1593_v63  ;;  %v1590_v39 = vsub.f32 %v3832_v40, %v1574_v4  ;;  %v1587_v0 = vrot.slane %v1586_v13, 1 }
0x117a   :  { %v1591_v17 = vsub.f32 %v3834_v16, %v1581_v15 }
0x117b   :  { %v1595_v6 = vmul.f32 1.442695, %v1590_v39  ;;  %v1588_v11 = vmax.f32 %v1586_v13, %v1587_v0 }
0x117c   :  { %v1597_v10 = vmul.f32 1.442695, %v1591_v17 }
0x117d   :  { %3119 = vpow2.f32 %v1595_v6  ;;  %v1592_v14 = vsub.f32 %v3840_v58, %v1588_v11 }
0x117e   :  { %3121 = vpow2.f32 %v1597_v10 }
0x117f   :  { %v1599_v47 = vmul.f32 1.442695, %v1592_v14 }
0x1181   :  { %3123 = vpow2.f32 %v1599_v47 }
0x1183   :  { %v3118_v50 = vpop.eup %3117 }
0x1184   :  { %v1601_v21 = vsel %vm12_vm0, %v3118_v50, 0.0 }
0x1185   :  { %v1602_v22 = vrot.slane %v1601_v21, 4 }
0x1187   :  { %v3120_v23 = vpop.eup %3119  ;;  %v1603_v24 = vadd.f32 %v1602_v22, %v1601_v21 }
0x1188   :  { %v3122_v25 = vpop.eup %3121  ;;  %v1608_v26 = vsel %vm12_vm0, %v3120_v23, 0.0 }
0x1189   :  { %v1604_v27 = vrot.slane %v1603_v24, 2  ;;  %v1609_v28 = vrot.slane %v1608_v26, 4  ;;  %v1615_v29 = vsel %vm12_vm0, %v3122_v25, 0.0 }
0x118a   :  { %v1616_v30 = vrot.slane %v1615_v29, 4 }
0x118b   :  { %v3124_v31 = vpop.eup %3123  ;;  %v1605_v32 = vadd.f32 %v1604_v27, %v1603_v24  ;;  %v1610_v33 = vadd.f32 %v1609_v28, %v1608_v26 }
0x118c   :  { %v1617_v34 = vadd.f32 %v1616_v30, %v1615_v29  ;;  %v1622_v35 = vsel %vm12_vm0, %v3124_v31, 0.0 }
0x118d   :  { %v1606_v36 = vrot.slane %v1605_v32, 1  ;;  %v1611_v60 = vrot.slane %v1610_v33, 2  ;;  %v1623_v1 = vrot.slane %v1622_v35, 4 }
0x118e   :  { %v1618_v7 = vrot.slane %v1617_v34, 2 }
0x118f   :  { %v1607_v12 = vadd.f32 %v1606_v36, %v1605_v32  ;;  %v1612_v45 = vadd.f32 %v1611_v60, %v1610_v33  ;;  %v1624_v48 = vadd.f32 %v1623_v1, %v1622_v35 }
0x1190   :  { %v1619_v51 = vadd.f32 %v1618_v7, %v1617_v34 }
0x1191   :  { %3125 = vlog2.f32 %v1607_v12  ;;  %v1613_v54 = vrot.slane %v1612_v45, 1  ;;  %v1625_v41 = vrot.slane %v1624_v48, 2 }
0x1192   :  { %v1620_v53 = vrot.slane %v1619_v51, 1 }
0x1193   :  { %v1614_v42 = vadd.f32 %v1613_v54, %v1612_v45  ;;  %v1626_v18 = vadd.f32 %v1625_v41, %v1624_v48 }
0x1194   :  { %v1621_v57 = vadd.f32 %v1620_v53, %v1619_v51 }
0x1195   :  { %3127 = vlog2.f32 %v1614_v42  ;;  %v1627_v43 = vrot.slane %v1626_v18, 1 }
0x1196   :  { %3129 = vlog2.f32 %v1621_v57 }
0x1197   :  { %v1628_v19 = vadd.f32 %v1627_v43, %v1626_v18 }
0x1199   :  { %3131 = vlog2.f32 %v1628_v19 }
0x119b   :  { %v3126_v61 = vpop.eup %3125 }
0x119c   :  { %v1630_v44 = vmul.f32 0.6931472, %v3126_v61 }
0x119e   :  { %v1637_v20 = vadd.f32 %v1630_v44, %v1567_v9 }
0x119f   :  { %v3128_v62 = vpop.eup %3127 }
0x11a0   :  { %v3130_v2 = vpop.eup %3129  ;;  %v1641_v46 = vsub.f32 %v3828_v56, %v1637_v20  ;;  %v1632_v55 = vmul.f32 0.6931472, %v3128_v62 }
0x11a1   :  { %v1634_v3 = vmul.f32 0.6931472, %v3130_v2 }
0x11a2   :  { %v1645_v5 = vsel %vm12_vm0, %v1641_v46, -inf  ;;  %v1638_v49 = vadd.f32 %v1632_v55, %v1574_v4 }
0x11a3   :  { %v3132_v59 = vpop.eup %3131  ;;  %1646 = vmax.xlane.f32.xlu0 %v1645_v5  ;;  %v1639_v8 = vadd.f32 %v1634_v3, %v1581_v15 }
0x11a4   :  { %v1642_v37 = vsub.f32 %v3832_v40, %v1638_v49  ;;  %v1636_v38 = vmul.f32 0.6931472, %v3132_v59 }
0x11a5   :  { %v1643_v52 = vsub.f32 %v3834_v16, %v1639_v8 }
0x11a6   :  { %v1648_v63 = vsel %vm12_vm0, %v1642_v37, -inf  ;;  %v1640_v9 = vadd.f32 %v1636_v38, %v1588_v11 }
0x11a7   :  { %1649 = vmax.xlane.f32.xlu1 %v1648_v63  ;;  %v1651_v13 = vsel %vm12_vm0, %v1643_v52, -inf }
0x11a8   :  { %1652 = vmax.xlane.f32.xlu0 %v1651_v13  ;;  %v1644_v56 = vsub.f32 %v3840_v58, %v1640_v9 }
0x11aa   :  { %v1654_v39 = vsel %vm12_vm0, %v1644_v56, -inf }
0x11ab   :  { %1655 = vmax.xlane.f32.xlu1 %v1654_v39 }
0x1230   :  { %v1647_v4 = vpop.xlane.xlu0 %1646 }
0x1231   :  { %v1657_v0 = vsub.f32 %v1641_v46, %v1647_v4 }
0x1233   :  { %v1661_v15 = vmul.f32 1.442695, %v1657_v0 }
0x1234   :  { %v1650_v17 = vpop.xlane.xlu1 %1649 }
0x1235   :  { %3133 = vpow2.f32 %v1661_v15  ;;  %v1658_v40 = vsub.f32 %v1642_v37, %v1650_v17  ;;  %v1653_v6 = vpop.xlane.xlu0 %1652 }
0x1236   :  { %v1659_v16 = vsub.f32 %v1643_v52, %v1653_v6 }
0x1237   :  { %v1663_v10 = vmul.f32 1.442695, %v1658_v40 }
0x1238   :  { %v1665_v14 = vmul.f32 1.442695, %v1659_v16  ;;  %v1656_v11 = vpop.xlane.xlu1 %1655 }
0x1239   :  { %3135 = vpow2.f32 %v1663_v10  ;;  %v1660_v47 = vsub.f32 %v1644_v56, %v1656_v11 }
0x123a   :  { %3137 = vpow2.f32 %v1665_v14 }
0x123b   :  { %v1667_v50 = vmul.f32 1.442695, %v1660_v47 }
0x123d   :  { %3139 = vpow2.f32 %v1667_v50 }
0x123f   :  { %v3134_v58 = vpop.eup %3133 }
0x1240   :  { %v1669_v21 = vsel %vm12_vm0, %v3134_v58, 0.0 }
0x1241   :  { %1670 = vadd.xlane.f32.xlu0 %v1669_v21 }
0x1243   :  { %v3136_v22 = vpop.eup %3135 }
0x1244   :  { %v3138_v23 = vpop.eup %3137  ;;  %v1672_v24 = vsel %vm12_vm0, %v3136_v22, 0.0 }
0x1245   :  { %1673 = vadd.xlane.f32.xlu1 %v1672_v24  ;;  %v1675_v25 = vsel %vm12_vm0, %v3138_v23, 0.0 }
0x1246   :  { %1676 = vadd.xlane.f32.xlu0 %v1675_v25 }
0x1247   :  { %v3140_v26 = vpop.eup %3139 }
0x1248   :  { %v1678_v27 = vsel %vm12_vm0, %v3140_v26, 0.0 }
0x1249   :  { %1679 = vadd.xlane.f32.xlu1 %v1678_v27 }
0x12ce   :  { %v1671_v28 = vpop.xlane.xlu0 %1670 }
0x12cf   :  { %3141 = vlog2.f32 %v1671_v28 }
0x12d2   :  { %v1674_v29 = vpop.xlane.xlu1 %1673 }
0x12d3   :  { %3143 = vlog2.f32 %v1674_v29  ;;  %v1677_v30 = vpop.xlane.xlu0 %1676 }
0x12d4   :  { %3145 = vlog2.f32 %v1677_v30 }
0x12d6   :  { %v1680_v31 = vpop.xlane.xlu1 %1679 }
0x12d7   :  { %3147 = vlog2.f32 %v1680_v31 }
0x12d9   :  { %v3142_v32 = vpop.eup %3141 }
0x12da   :  { %v1682_v33 = vmul.f32 0.6931472, %v3142_v32 }
0x12dc   :  { %v1689_v34 = vadd.f32 %v1682_v33, %v1647_v4 }
0x12dd   :  { %v3144_v35 = vpop.eup %3143 }
0x12de   :  { %v3146_v36 = vpop.eup %3145  ;;  %v3864_v60 = vsub.f32 %v1641_v46, %v1689_v34  ;;  %v1684_v1 = vmul.f32 0.6931472, %v3144_v35 }
0x12df   :  { %v1686_v7 = vmul.f32 0.6931472, %v3146_v36 }
0x12e0   :  { %v1697_v12 = vsel %vm12_vm0, %v3864_v60, -inf  ;;  %v1690_v45 = vadd.f32 %v1684_v1, %v1650_v17 }
0x12e1   :  { %v3148_v48 = vpop.eup %3147  ;;  %v1698_v51 = vrot.slane %v1697_v12, 4  ;;  %v1691_v54 = vadd.f32 %v1686_v7, %v1653_v6 }
0x12e2   :  { %v3868_v41 = vsub.f32 %v1642_v37, %v1690_v45  ;;  %v1688_v53 = vmul.f32 0.6931472, %v3148_v48 }
0x12e3   :  { %v1699_v42 = vmax.f32 %v1697_v12, %v1698_v51  ;;  %v3870_v18 = vsub.f32 %v1643_v52, %v1691_v54 }
0x12e4   :  { %v1704_v57 = vsel %vm12_vm0, %v3868_v41, -inf  ;;  %v1692_v43 = vadd.f32 %v1688_v53, %v1656_v11 }
0x12e5   :  { %v1705_v19 = vrot.slane %v1704_v57, 4  ;;  %v1711_v61 = vsel %vm12_vm0, %v3870_v18, -inf  ;;  %v1700_v44 = vrot.slane %v1699_v42, 2 }
0x12e6   :  { %v1712_v20 = vrot.slane %v1711_v61, 4  ;;  %v3876_v62 = vsub.f32 %v1644_v56, %v1692_v43 }
0x12e7   :  { %v1706_v2 = vmax.f32 %v1704_v57, %v1705_v19  ;;  %v1701_v46 = vmax.f32 %v1699_v42, %v1700_v44 }
0x12e8   :  { %v1713_v55 = vmax.f32 %v1711_v61, %v1712_v20  ;;  %v1718_v3 = vsel %vm12_vm0, %v3876_v62, -inf }
0x12e9   :  { %v1719_v5 = vrot.slane %v1718_v3, 4  ;;  %v1702_v49 = vrot.slane %v1701_v46, 1  ;;  %v1707_v59 = vrot.slane %v1706_v2, 2 }
0x12ea   :  { %v1714_v8 = vrot.slane %v1713_v55, 2 }
0x12eb   :  { %v1720_v37 = vmax.f32 %v1718_v3, %v1719_v5  ;;  %v1703_v38 = vmax.f32 %v1701_v46, %v1702_v49  ;;  %v1708_v52 = vmax.f32 %v1706_v2, %v1707_v59 }
0x12ec   :  { %v1715_v63 = vmax.f32 %v1713_v55, %v1714_v8 }
0x12ed   :  { %v1725_v9 = vsub.f32 %v3864_v60, %v1703_v38  ;;  %v1709_v13 = vrot.slane %v1708_v52, 1  ;;  %v1721_v39 = vrot.slane %v1720_v37, 2 }
0x12ee   :  { %v1716_v56 = vrot.slane %v1715_v63, 1 }
0x12ef   :  { %v1729_v4 = vmul.f32 1.442695, %v1725_v9  ;;  %v1710_v0 = vmax.f32 %v1708_v52, %v1709_v13  ;;  %v1722_v15 = vmax.f32 %v1720_v37, %v1721_v39 }
0x12f0   :  { %v1717_v17 = vmax.f32 %v1715_v63, %v1716_v56 }
0x12f1   :  { %3149 = vpow2.f32 %v1729_v4  ;;  %v1726_v40 = vsub.f32 %v3868_v41, %v1710_v0  ;;  %v1723_v6 = vrot.slane %v1722_v15, 1 }
0x12f2   :  { %v1727_v16 = vsub.f32 %v3870_v18, %v1717_v17 }
0x12f3   :  { %v1731_v10 = vmul.f32 1.442695, %v1726_v40  ;;  %v1724_v14 = vmax.f32 %v1722_v15, %v1723_v6 }
0x12f4   :  { %v1733_v11 = vmul.f32 1.442695, %v1727_v16 }
0x12f5   :  { %3151 = vpow2.f32 %v1731_v10  ;;  %v1728_v47 = vsub.f32 %v3876_v62, %v1724_v14 }
0x12f6   :  { %3153 = vpow2.f32 %v1733_v11 }
0x12f7   :  { %v1735_v50 = vmul.f32 1.442695, %v1728_v47 }
0x12f9   :  { %3155 = vpow2.f32 %v1735_v50 }
0x12fb   :  { %v3150_v58 = vpop.eup %3149 }
0x12fc   :  { %v1737_v21 = vsel %vm12_vm0, %v3150_v58, 0.0 }
0x12fd   :  { %v1738_v22 = vrot.slane %v1737_v21, 4 }
0x12ff   :  { %v3152_v23 = vpop.eup %3151  ;;  %v1739_v24 = vadd.f32 %v1738_v22, %v1737_v21 }
0x1300   :  { %v3154_v25 = vpop.eup %3153  ;;  %v1744_v26 = vsel %vm12_vm0, %v3152_v23, 0.0 }
0x1301   :  { %v1740_v27 = vrot.slane %v1739_v24, 2  ;;  %v1745_v28 = vrot.slane %v1744_v26, 4  ;;  %v1751_v29 = vsel %vm12_vm0, %v3154_v25, 0.0 }
0x1302   :  { %v1752_v30 = vrot.slane %v1751_v29, 4 }
0x1303   :  { %v3156_v31 = vpop.eup %3155  ;;  %v1741_v32 = vadd.f32 %v1740_v27, %v1739_v24  ;;  %v1746_v33 = vadd.f32 %v1745_v28, %v1744_v26 }
0x1304   :  { %v1753_v34 = vadd.f32 %v1752_v30, %v1751_v29  ;;  %v1758_v35 = vsel %vm12_vm0, %v3156_v31, 0.0 }
0x1305   :  { %v1742_v36 = vrot.slane %v1741_v32, 1  ;;  %v1747_v1 = vrot.slane %v1746_v33, 2  ;;  %v1759_v7 = vrot.slane %v1758_v35, 4 }
0x1306   :  { %v1754_v12 = vrot.slane %v1753_v34, 2 }
0x1307   :  { %v1743_v45 = vadd.f32 %v1742_v36, %v1741_v32  ;;  %v1748_v48 = vadd.f32 %v1747_v1, %v1746_v33  ;;  %v1760_v51 = vadd.f32 %v1759_v7, %v1758_v35 }
0x1308   :  { %v1755_v54 = vadd.f32 %v1754_v12, %v1753_v34 }
0x1309   :  { %3157 = vlog2.f32 %v1743_v45  ;;  %v1749_v53 = vrot.slane %v1748_v48, 1  ;;  %v1761_v42 = vrot.slane %v1760_v51, 2 }
0x130a   :  { %v1756_v57 = vrot.slane %v1755_v54, 1 }
0x130b   :  { %v1750_v43 = vadd.f32 %v1749_v53, %v1748_v48  ;;  %v1762_v19 = vadd.f32 %v1761_v42, %v1760_v51 }
0x130c   :  { %v1757_v61 = vadd.f32 %v1756_v57, %v1755_v54 }
0x130d   :  { %3159 = vlog2.f32 %v1750_v43  ;;  %v1763_v44 = vrot.slane %v1762_v19, 1 }
0x130e   :  { %3161 = vlog2.f32 %v1757_v61 }
0x130f   :  { %v1764_v20 = vadd.f32 %v1763_v44, %v1762_v19 }
0x1311   :  { %3163 = vlog2.f32 %v1764_v20 }
0x1313   :  { %v3158_v2 = vpop.eup %3157 }
0x1314   :  { %v1766_v46 = vmul.f32 0.6931472, %v3158_v2 }
0x1316   :  { %v1773_v55 = vadd.f32 %v1766_v46, %v1703_v38 }
0x1317   :  { %v3160_v3 = vpop.eup %3159 }
0x1318   :  { %v3162_v5 = vpop.eup %3161  ;;  %v1777_v49 = vsub.f32 %v3864_v60, %v1773_v55  ;;  %v1768_v59 = vmul.f32 0.6931472, %v3160_v3 }
0x1319   :  { %v1770_v8 = vmul.f32 0.6931472, %v3162_v5 }
0x131a   :  { %v1781_v37 = vsel %vm12_vm0, %v1777_v49, -inf  ;;  %v1774_v52 = vadd.f32 %v1768_v59, %v1710_v0 }
0x131b   :  { %v3164_v63 = vpop.eup %3163  ;;  %1782 = vmax.xlane.f32.xlu0 %v1781_v37  ;;  %v1775_v9 = vadd.f32 %v1770_v8, %v1717_v17 }
0x131c   :  { %v1778_v13 = vsub.f32 %v3868_v41, %v1774_v52  ;;  %v1772_v39 = vmul.f32 0.6931472, %v3164_v63 }
0x131d   :  { %v1779_v56 = vsub.f32 %v3870_v18, %v1775_v9 }
0x131e   :  { %v1784_v4 = vsel %vm12_vm0, %v1778_v13, -inf  ;;  %v1776_v38 = vadd.f32 %v1772_v39, %v1724_v14 }
0x131f   :  { %1785 = vmax.xlane.f32.xlu1 %v1784_v4  ;;  %v1787_v15 = vsel %vm12_vm0, %v1779_v56, -inf }
0x1320   :  { %1788 = vmax.xlane.f32.xlu0 %v1787_v15  ;;  %v1780_v60 = vsub.f32 %v3876_v62, %v1776_v38 }
0x1322   :  { %v1790_v40 = vsel %vm12_vm0, %v1780_v60, -inf }
0x1323   :  { %1791 = vmax.xlane.f32.xlu1 %v1790_v40 }
0x13a8   :  { %v1783_v0 = vpop.xlane.xlu0 %1782 }
0x13a9   :  { %v1793_v6 = vsub.f32 %v1777_v49, %v1783_v0 }
0x13ab   :  { %v1797_v17 = vmul.f32 1.442695, %v1793_v6 }
0x13ac   :  { %v1786_v16 = vpop.xlane.xlu1 %1785 }
0x13ad   :  { %3165 = vpow2.f32 %v1797_v17  ;;  %v1794_v41 = vsub.f32 %v1778_v13, %v1786_v16  ;;  %v1789_v10 = vpop.xlane.xlu0 %1788 }
0x13ae   :  { %v1795_v18 = vsub.f32 %v1779_v56, %v1789_v10 }
0x13af   :  { %v1799_v11 = vmul.f32 1.442695, %v1794_v41 }
0x13b0   :  { %v1801_v47 = vmul.f32 1.442695, %v1795_v18  ;;  %v1792_v14 = vpop.xlane.xlu1 %1791 }
0x13b1   :  { %3167 = vpow2.f32 %v1799_v11  ;;  %v1796_v50 = vsub.f32 %v1780_v60, %v1792_v14 }
0x13b2   :  { %3169 = vpow2.f32 %v1801_v47 }
0x13b3   :  { %v1803_v58 = vmul.f32 1.442695, %v1796_v50 }
0x13b5   :  { %3171 = vpow2.f32 %v1803_v58 }
0x13b7   :  { %v3166_v62 = vpop.eup %3165 }
0x13b8   :  { %v1805_v21 = vsel %vm12_vm0, %v3166_v62, 0.0 }
0x13b9   :  { %1806 = vadd.xlane.f32.xlu0 %v1805_v21 }
0x13bb   :  { %v3168_v22 = vpop.eup %3167 }
0x13bc   :  { %v3170_v23 = vpop.eup %3169  ;;  %v1808_v24 = vsel %vm12_vm0, %v3168_v22, 0.0 }
0x13bd   :  { %1809 = vadd.xlane.f32.xlu1 %v1808_v24  ;;  %v1811_v25 = vsel %vm12_vm0, %v3170_v23, 0.0 }
0x13be   :  { %1812 = vadd.xlane.f32.xlu0 %v1811_v25 }
0x13bf   :  { %v3172_v26 = vpop.eup %3171 }
0x13c0   :  { %v1814_v27 = vsel %vm12_vm0, %v3172_v26, 0.0 }
0x13c1   :  { %1815 = vadd.xlane.f32.xlu1 %v1814_v27 }
0x1446   :  { %v1807_v28 = vpop.xlane.xlu0 %1806 }
0x1447   :  { %3173 = vlog2.f32 %v1807_v28 }
0x144a   :  { %v1810_v29 = vpop.xlane.xlu1 %1809 }
0x144b   :  { %3175 = vlog2.f32 %v1810_v29  ;;  %v1813_v30 = vpop.xlane.xlu0 %1812 }
0x144c   :  { %3177 = vlog2.f32 %v1813_v30 }
0x144e   :  { %v1816_v31 = vpop.xlane.xlu1 %1815 }
0x144f   :  { %3179 = vlog2.f32 %v1816_v31 }
0x1451   :  { %v3174_v32 = vpop.eup %3173 }
0x1452   :  { %v1818_v33 = vmul.f32 0.6931472, %v3174_v32 }
0x1454   :  { %v1825_v34 = vadd.f32 %v1818_v33, %v1783_v0 }
0x1455   :  { %v3176_v35 = vpop.eup %3175 }
0x1456   :  { %v3178_v36 = vpop.eup %3177  ;;  %v3900_v1 = vsub.f32 %v1777_v49, %v1825_v34  ;;  %v1820_v7 = vmul.f32 0.6931472, %v3176_v35 }
0x1457   :  { %v1822_v12 = vmul.f32 0.6931472, %v3178_v36 }
0x1458   :  { %v1833_v45 = vsel %vm12_vm0, %v3900_v1, -inf  ;;  %v1826_v48 = vadd.f32 %v1820_v7, %v1786_v16 }
0x1459   :  { %v3180_v51 = vpop.eup %3179  ;;  %v1834_v54 = vrot.slane %v1833_v45, 4  ;;  %v1827_v53 = vadd.f32 %v1822_v12, %v1789_v10 }
0x145a   :  { %v3904_v42 = vsub.f32 %v1778_v13, %v1826_v48  ;;  %v1824_v57 = vmul.f32 0.6931472, %v3180_v51 }
0x145b   :  { %v1835_v43 = vmax.f32 %v1833_v45, %v1834_v54  ;;  %v3906_v19 = vsub.f32 %v1779_v56, %v1827_v53 }
0x145c   :  { %v1840_v61 = vsel %vm12_vm0, %v3904_v42, -inf  ;;  %v1828_v44 = vadd.f32 %v1824_v57, %v1792_v14 }
0x145d   :  { %v1841_v20 = vrot.slane %v1840_v61, 4  ;;  %v1847_v2 = vsel %vm12_vm0, %v3906_v19, -inf  ;;  %v1836_v46 = vrot.slane %v1835_v43, 2 }
0x145e   :  { %v1848_v55 = vrot.slane %v1847_v2, 4  ;;  %v3912_v3 = vsub.f32 %v1780_v60, %v1828_v44 }
0x145f   :  { %v1842_v5 = vmax.f32 %v1840_v61, %v1841_v20  ;;  %v1837_v49 = vmax.f32 %v1835_v43, %v1836_v46 }
0x1460   :  { %v1849_v59 = vmax.f32 %v1847_v2, %v1848_v55  ;;  %v1854_v8 = vsel %vm12_vm0, %v3912_v3, -inf }
0x1461   :  { %v1855_v37 = vrot.slane %v1854_v8, 4  ;;  %v1838_v52 = vrot.slane %v1837_v49, 1  ;;  %v1843_v63 = vrot.slane %v1842_v5, 2 }
0x1462   :  { %v1850_v9 = vrot.slane %v1849_v59, 2 }
0x1463   :  { %v1856_v13 = vmax.f32 %v1854_v8, %v1855_v37  ;;  %v1839_v39 = vmax.f32 %v1837_v49, %v1838_v52  ;;  %v1844_v56 = vmax.f32 %v1842_v5, %v1843_v63 }
0x1464   :  { %v1851_v4 = vmax.f32 %v1849_v59, %v1850_v9 }
0x1465   :  { %v1861_v38 = vsub.f32 %v3900_v1, %v1839_v39  ;;  %v1845_v15 = vrot.slane %v1844_v56, 1  ;;  %v1857_v40 = vrot.slane %v1856_v13, 2 }
0x1466   :  { %v1852_v60 = vrot.slane %v1851_v4, 1 }
0x1467   :  { %v1865_v0 = vmul.f32 1.442695, %v1861_v38  ;;  %v1846_v6 = vmax.f32 %v1844_v56, %v1845_v15  ;;  %v1858_v17 = vmax.f32 %v1856_v13, %v1857_v40 }
0x1468   :  { %v1853_v16 = vmax.f32 %v1851_v4, %v1852_v60 }
0x1469   :  { %3181 = vpow2.f32 %v1865_v0  ;;  %v1862_v41 = vsub.f32 %v3904_v42, %v1846_v6  ;;  %v1859_v10 = vrot.slane %v1858_v17, 1 }
0x146a   :  { %v1863_v18 = vsub.f32 %v3906_v19, %v1853_v16 }
0x146b   :  { %v1867_v11 = vmul.f32 1.442695, %v1862_v41  ;;  %v1860_v47 = vmax.f32 %v1858_v17, %v1859_v10 }
0x146c   :  { %v1869_v14 = vmul.f32 1.442695, %v1863_v18 }
0x146d   :  { %3183 = vpow2.f32 %v1867_v11  ;;  %v1864_v50 = vsub.f32 %v3912_v3, %v1860_v47 }
0x146e   :  { %3185 = vpow2.f32 %v1869_v14 }
0x146f   :  { %v1871_v58 = vmul.f32 1.442695, %v1864_v50 }
0x1471   :  { %3187 = vpow2.f32 %v1871_v58 }
0x1473   :  { %v3182_v62 = vpop.eup %3181 }
0x1474   :  { %v1873_v21 = vsel %vm12_vm0, %v3182_v62, 0.0 }
0x1475   :  { %v1874_v22 = vrot.slane %v1873_v21, 4 }
0x1477   :  { %v3184_v23 = vpop.eup %3183  ;;  %v1875_v24 = vadd.f32 %v1874_v22, %v1873_v21 }
0x1478   :  { %v3186_v25 = vpop.eup %3185  ;;  %v1880_v26 = vsel %vm12_vm0, %v3184_v23, 0.0 }
0x1479   :  { %v1876_v27 = vrot.slane %v1875_v24, 2  ;;  %v1881_v28 = vrot.slane %v1880_v26, 4  ;;  %v1887_v29 = vsel %vm12_vm0, %v3186_v25, 0.0 }
0x147a   :  { %v1888_v30 = vrot.slane %v1887_v29, 4 }
0x147b   :  { %v3188_v31 = vpop.eup %3187  ;;  %v1877_v32 = vadd.f32 %v1876_v27, %v1875_v24  ;;  %v1882_v33 = vadd.f32 %v1881_v28, %v1880_v26 }
0x147c   :  { %v1889_v34 = vadd.f32 %v1888_v30, %v1887_v29  ;;  %v1894_v35 = vsel %vm12_vm0, %v3188_v31, 0.0 }
0x147d   :  { %v1878_v36 = vrot.slane %v1877_v32, 1  ;;  %v1883_v7 = vrot.slane %v1882_v33, 2  ;;  %v1895_v12 = vrot.slane %v1894_v35, 4 }
0x147e   :  { %v1890_v45 = vrot.slane %v1889_v34, 2 }
0x147f   :  { %v1879_v48 = vadd.f32 %v1878_v36, %v1877_v32  ;;  %v1884_v51 = vadd.f32 %v1883_v7, %v1882_v33  ;;  %v1896_v54 = vadd.f32 %v1895_v12, %v1894_v35 }
0x1480   :  { %v1891_v53 = vadd.f32 %v1890_v45, %v1889_v34 }
0x1481   :  { %3189 = vlog2.f32 %v1879_v48  ;;  %v1885_v57 = vrot.slane %v1884_v51, 1  ;;  %v1897_v43 = vrot.slane %v1896_v54, 2 }
0x1482   :  { %v1892_v61 = vrot.slane %v1891_v53, 1 }
0x1483   :  { %v1886_v44 = vadd.f32 %v1885_v57, %v1884_v51  ;;  %v1898_v20 = vadd.f32 %v1897_v43, %v1896_v54 }
0x1484   :  { %v1893_v2 = vadd.f32 %v1892_v61, %v1891_v53 }
0x1485   :  { %3191 = vlog2.f32 %v1886_v44  ;;  %v1899_v46 = vrot.slane %v1898_v20, 1 }
0x1486   :  { %3193 = vlog2.f32 %v1893_v2 }
0x1487   :  { %v1900_v55 = vadd.f32 %v1899_v46, %v1898_v20 }
0x1489   :  { %3195 = vlog2.f32 %v1900_v55 }
0x148b   :  { %v3190_v5 = vpop.eup %3189 }
0x148c   :  { %v1902_v49 = vmul.f32 0.6931472, %v3190_v5 }
0x148e   :  { %v1909_v59 = vadd.f32 %v1902_v49, %v1839_v39 }
0x148f   :  { %v3192_v8 = vpop.eup %3191 }
0x1490   :  { %v3194_v37 = vpop.eup %3193  ;;  %v1913_v52 = vsub.f32 %v3900_v1, %v1909_v59  ;;  %v1904_v63 = vmul.f32 0.6931472, %v3192_v8 }
0x1491   :  { %v1906_v9 = vmul.f32 0.6931472, %v3194_v37 }
0x1492   :  { %v1917_v13 = vsel %vm12_vm0, %v1913_v52, -inf  ;;  %v1910_v56 = vadd.f32 %v1904_v63, %v1846_v6 }
0x1493   :  { %v3196_v4 = vpop.eup %3195  ;;  %1918 = vmax.xlane.f32.xlu0 %v1917_v13  ;;  %v1911_v38 = vadd.f32 %v1906_v9, %v1853_v16 }
0x1494   :  { %v1914_v15 = vsub.f32 %v3904_v42, %v1910_v56  ;;  %v1908_v40 = vmul.f32 0.6931472, %v3196_v4 }
0x1495   :  { %v1915_v60 = vsub.f32 %v3906_v19, %v1911_v38 }
0x1496   :  { %v1920_v0 = vsel %vm12_vm0, %v1914_v15, -inf  ;;  %v1912_v39 = vadd.f32 %v1908_v40, %v1860_v47 }
0x1497   :  { %1921 = vmax.xlane.f32.xlu1 %v1920_v0  ;;  %v1923_v17 = vsel %vm12_vm0, %v1915_v60, -inf }
0x1498   :  { %1924 = vmax.xlane.f32.xlu0 %v1923_v17  ;;  %v1916_v1 = vsub.f32 %v3912_v3, %v1912_v39 }
0x149a   :  { %v1926_v41 = vsel %vm12_vm0, %v1916_v1, -inf }
0x149b   :  { %1927 = vmax.xlane.f32.xlu1 %v1926_v41 }
0x1520   :  { %v1919_v6 = vpop.xlane.xlu0 %1918 }
0x1521   :  { %v1929_v10 = vsub.f32 %v1913_v52, %v1919_v6 }
0x1523   :  { %v1933_v16 = vmul.f32 1.442695, %v1929_v10 }
0x1524   :  { %v1922_v18 = vpop.xlane.xlu1 %1921 }
0x1525   :  { %3197 = vpow2.f32 %v1933_v16  ;;  %v1930_v42 = vsub.f32 %v1914_v15, %v1922_v18  ;;  %v1925_v11 = vpop.xlane.xlu0 %1924 }
0x1526   :  { %v1931_v19 = vsub.f32 %v1915_v60, %v1925_v11 }
0x1527   :  { %v1935_v14 = vmul.f32 1.442695, %v1930_v42 }
0x1528   :  { %v1937_v50 = vmul.f32 1.442695, %v1931_v19  ;;  %v1928_v47 = vpop.xlane.xlu1 %1927 }
0x1529   :  { %3199 = vpow2.f32 %v1935_v14  ;;  %v1932_v58 = vsub.f32 %v1916_v1, %v1928_v47 }
0x152a   :  { %3201 = vpow2.f32 %v1937_v50 }
0x152b   :  { %v1939_v62 = vmul.f32 1.442695, %v1932_v58 }
0x152d   :  { %3203 = vpow2.f32 %v1939_v62 }
0x152f   :  { %v3198_v3 = vpop.eup %3197 }
0x1530   :  { %v1941_v21 = vsel %vm12_vm0, %v3198_v3, 0.0 }
0x1531   :  { %1942 = vadd.xlane.f32.xlu0 %v1941_v21 }
0x1533   :  { %v3200_v22 = vpop.eup %3199 }
0x1534   :  { %v3202_v23 = vpop.eup %3201  ;;  %v1944_v24 = vsel %vm12_vm0, %v3200_v22, 0.0 }
0x1535   :  { %1945 = vadd.xlane.f32.xlu1 %v1944_v24  ;;  %v1947_v25 = vsel %vm12_vm0, %v3202_v23, 0.0 }
0x1536   :  { %1948 = vadd.xlane.f32.xlu0 %v1947_v25 }
0x1537   :  { %v3204_v26 = vpop.eup %3203 }
0x1538   :  { %v1950_v27 = vsel %vm12_vm0, %v3204_v26, 0.0 }
0x1539   :  { %1951 = vadd.xlane.f32.xlu1 %v1950_v27 }
0x15be   :  { %v1943_v28 = vpop.xlane.xlu0 %1942 }
0x15bf   :  { %3205 = vlog2.f32 %v1943_v28 }
0x15c2   :  { %v1946_v29 = vpop.xlane.xlu1 %1945 }
0x15c3   :  { %3207 = vlog2.f32 %v1946_v29  ;;  %v1949_v30 = vpop.xlane.xlu0 %1948 }
0x15c4   :  { %3209 = vlog2.f32 %v1949_v30 }
0x15c6   :  { %v1952_v31 = vpop.xlane.xlu1 %1951 }
0x15c7   :  { %3211 = vlog2.f32 %v1952_v31 }
0x15c9   :  { %v3206_v32 = vpop.eup %3205 }
0x15ca   :  { %v1954_v33 = vmul.f32 0.6931472, %v3206_v32 }
0x15cc   :  { %v1961_v34 = vadd.f32 %v1954_v33, %v1919_v6 }
0x15cd   :  { %v3208_v35 = vpop.eup %3207 }
0x15ce   :  { %v3210_v36 = vpop.eup %3209  ;;  %v3936_v7 = vsub.f32 %v1913_v52, %v1961_v34  ;;  %v1956_v12 = vmul.f32 0.6931472, %v3208_v35 }
0x15cf   :  { %v1958_v45 = vmul.f32 0.6931472, %v3210_v36 }
0x15d0   :  { %v1969_v48 = vsel %vm12_vm0, %v3936_v7, -inf  ;;  %v1962_v51 = vadd.f32 %v1956_v12, %v1922_v18 }
0x15d1   :  { %v3212_v54 = vpop.eup %3211  ;;  %v1970_v53 = vrot.slane %v1969_v48, 4  ;;  %v1963_v57 = vadd.f32 %v1958_v45, %v1925_v11 }
0x15d2   :  { %v3940_v43 = vsub.f32 %v1914_v15, %v1962_v51  ;;  %v1960_v61 = vmul.f32 0.6931472, %v3212_v54 }
0x15d3   :  { %v1971_v44 = vmax.f32 %v1969_v48, %v1970_v53  ;;  %v3942_v20 = vsub.f32 %v1915_v60, %v1963_v57 }
0x15d4   :  { %v1976_v2 = vsel %vm12_vm0, %v3940_v43, -inf  ;;  %v1964_v46 = vadd.f32 %v1960_v61, %v1928_v47 }
0x15d5   :  { %v1977_v55 = vrot.slane %v1976_v2, 4  ;;  %v1983_v5 = vsel %vm12_vm0, %v3942_v20, -inf  ;;  %v1972_v49 = vrot.slane %v1971_v44, 2 }
0x15d6   :  { %v1984_v59 = vrot.slane %v1983_v5, 4  ;;  %v3948_v8 = vsub.f32 %v1916_v1, %v1964_v46 }
0x15d7   :  { %v1978_v37 = vmax.f32 %v1976_v2, %v1977_v55  ;;  %v1973_v52 = vmax.f32 %v1971_v44, %v1972_v49 }
0x15d8   :  { %v1985_v63 = vmax.f32 %v1983_v5, %v1984_v59  ;;  %v1990_v9 = vsel %vm12_vm0, %v3948_v8, -inf }
0x15d9   :  { %v1991_v13 = vrot.slane %v1990_v9, 4  ;;  %v1974_v56 = vrot.slane %v1973_v52, 1  ;;  %v1979_v4 = vrot.slane %v1978_v37, 2 }
0x15da   :  { %v1986_v38 = vrot.slane %v1985_v63, 2 }
0x15db   :  { %v1992_v15 = vmax.f32 %v1990_v9, %v1991_v13  ;;  %v1975_v40 = vmax.f32 %v1973_v52, %v1974_v56  ;;  %v1980_v60 = vmax.f32 %v1978_v37, %v1979_v4 }
0x15dc   :  { %v1987_v0 = vmax.f32 %v1985_v63, %v1986_v38 }
0x15dd   :  { %v1997_v39 = vsub.f32 %v3936_v7, %v1975_v40  ;;  %v1981_v17 = vrot.slane %v1980_v60, 1  ;;  %v1993_v41 = vrot.slane %v1992_v15, 2 }
0x15de   :  { %v1988_v1 = vrot.slane %v1987_v0, 1 }
0x15df   :  { %v2001_v6 = vmul.f32 1.442695, %v1997_v39  ;;  %v1982_v10 = vmax.f32 %v1980_v60, %v1981_v17  ;;  %v1994_v16 = vmax.f32 %v1992_v15, %v1993_v41 }
0x15e0   :  { %v1989_v18 = vmax.f32 %v1987_v0, %v1988_v1 }
0x15e1   :  { %3213 = vpow2.f32 %v2001_v6  ;;  %v1998_v42 = vsub.f32 %v3940_v43, %v1982_v10  ;;  %v1995_v11 = vrot.slane %v1994_v16, 1 }
0x15e2   :  { %v1999_v19 = vsub.f32 %v3942_v20, %v1989_v18 }
0x15e3   :  { %v2003_v14 = vmul.f32 1.442695, %v1998_v42  ;;  %v1996_v50 = vmax.f32 %v1994_v16, %v1995_v11 }
0x15e4   :  { %v2005_v47 = vmul.f32 1.442695, %v1999_v19 }
0x15e5   :  { %3215 = vpow2.f32 %v2003_v14  ;;  %v2000_v58 = vsub.f32 %v3948_v8, %v1996_v50 }
0x15e6   :  { %3217 = vpow2.f32 %v2005_v47 }
0x15e7   :  { %v2007_v62 = vmul.f32 1.442695, %v2000_v58 }
0x15e9   :  { %3219 = vpow2.f32 %v2007_v62 }
0x15eb   :  { %v3214_v3 = vpop.eup %3213 }
0x15ec   :  { %v2009_v21 = vsel %vm12_vm0, %v3214_v3, 0.0 }
0x15ed   :  { %v2010_v22 = vrot.slane %v2009_v21, 4 }
0x15ef   :  { %v3216_v23 = vpop.eup %3215  ;;  %v2011_v24 = vadd.f32 %v2010_v22, %v2009_v21 }
0x15f0   :  { %v3218_v25 = vpop.eup %3217  ;;  %v2016_v26 = vsel %vm12_vm0, %v3216_v23, 0.0 }
0x15f1   :  { %v2012_v27 = vrot.slane %v2011_v24, 2  ;;  %v2017_v28 = vrot.slane %v2016_v26, 4  ;;  %v2023_v29 = vsel %vm12_vm0, %v3218_v25, 0.0 }
0x15f2   :  { %v2024_v30 = vrot.slane %v2023_v29, 4 }
0x15f3   :  { %v3220_v31 = vpop.eup %3219  ;;  %v2013_v32 = vadd.f32 %v2012_v27, %v2011_v24  ;;  %v2018_v33 = vadd.f32 %v2017_v28, %v2016_v26 }
0x15f4   :  { %v2025_v34 = vadd.f32 %v2024_v30, %v2023_v29  ;;  %v2030_v35 = vsel %vm12_vm0, %v3220_v31, 0.0 }
0x15f5   :  { %v2014_v36 = vrot.slane %v2013_v32, 1  ;;  %v2019_v12 = vrot.slane %v2018_v33, 2  ;;  %v2031_v45 = vrot.slane %v2030_v35, 4 }
0x15f6   :  { %v2026_v48 = vrot.slane %v2025_v34, 2 }
0x15f7   :  { %v2015_v51 = vadd.f32 %v2014_v36, %v2013_v32  ;;  %v2020_v54 = vadd.f32 %v2019_v12, %v2018_v33  ;;  %v2032_v53 = vadd.f32 %v2031_v45, %v2030_v35 }
0x15f8   :  { %v2027_v57 = vadd.f32 %v2026_v48, %v2025_v34 }
0x15f9   :  { %3221 = vlog2.f32 %v2015_v51  ;;  %v2021_v61 = vrot.slane %v2020_v54, 1  ;;  %v2033_v44 = vrot.slane %v2032_v53, 2 }
0x15fa   :  { %v2028_v2 = vrot.slane %v2027_v57, 1 }
0x15fb   :  { %v2022_v46 = vadd.f32 %v2021_v61, %v2020_v54  ;;  %v2034_v55 = vadd.f32 %v2033_v44, %v2032_v53 }
0x15fc   :  { %v2029_v5 = vadd.f32 %v2028_v2, %v2027_v57 }
0x15fd   :  { %3223 = vlog2.f32 %v2022_v46  ;;  %v2035_v49 = vrot.slane %v2034_v55, 1 }
0x15fe   :  { %3225 = vlog2.f32 %v2029_v5 }
0x15ff   :  { %v2036_v59 = vadd.f32 %v2035_v49, %v2034_v55 }
0x1601   :  { %3227 = vlog2.f32 %v2036_v59 }
0x1603   :  { %v3222_v37 = vpop.eup %3221 }
0x1604   :  { %v2038_v52 = vmul.f32 0.6931472, %v3222_v37 }
0x1606   :  { %v2045_v63 = vadd.f32 %v2038_v52, %v1975_v40 }
0x1607   :  { %v3224_v9 = vpop.eup %3223 }
0x1608   :  { %v3226_v13 = vpop.eup %3225  ;;  %v2049_v56 = vsub.f32 %v3936_v7, %v2045_v63  ;;  %v2040_v4 = vmul.f32 0.6931472, %v3224_v9 }
0x1609   :  { %v2042_v38 = vmul.f32 0.6931472, %v3226_v13 }
0x160a   :  { %v2053_v15 = vsel %vm12_vm0, %v2049_v56, -inf  ;;  %v2046_v60 = vadd.f32 %v2040_v4, %v1982_v10 }
0x160b   :  { %v3228_v0 = vpop.eup %3227  ;;  %2054 = vmax.xlane.f32.xlu0 %v2053_v15  ;;  %v2047_v39 = vadd.f32 %v2042_v38, %v1989_v18 }
0x160c   :  { %v2050_v17 = vsub.f32 %v3940_v43, %v2046_v60  ;;  %v2044_v41 = vmul.f32 0.6931472, %v3228_v0 }
0x160d   :  { %v2051_v1 = vsub.f32 %v3942_v20, %v2047_v39 }
0x160e   :  { %v2056_v6 = vsel %vm12_vm0, %v2050_v17, -inf  ;;  %v2048_v40 = vadd.f32 %v2044_v41, %v1996_v50 }
0x160f   :  { %2057 = vmax.xlane.f32.xlu1 %v2056_v6  ;;  %v2059_v16 = vsel %vm12_vm0, %v2051_v1, -inf }
0x1610   :  { %2060 = vmax.xlane.f32.xlu0 %v2059_v16  ;;  %v2052_v7 = vsub.f32 %v3948_v8, %v2048_v40 }
0x1612   :  { %v2062_v42 = vsel %vm12_vm0, %v2052_v7, -inf }
0x1613   :  { %2063 = vmax.xlane.f32.xlu1 %v2062_v42 }
0x1698   :  { %v2055_v10 = vpop.xlane.xlu0 %2054 }
0x1699   :  { %v2065_v11 = vsub.f32 %v2049_v56, %v2055_v10 }
0x169b   :  { %v2069_v18 = vmul.f32 1.442695, %v2065_v11 }
0x169c   :  { %v2058_v19 = vpop.xlane.xlu1 %2057 }
0x169d   :  { %3229 = vpow2.f32 %v2069_v18  ;;  %v2066_v43 = vsub.f32 %v2050_v17, %v2058_v19  ;;  %v2061_v14 = vpop.xlane.xlu0 %2060 }
0x169e   :  { %v2067_v20 = vsub.f32 %v2051_v1, %v2061_v14 }
0x169f   :  { %v2071_v47 = vmul.f32 1.442695, %v2066_v43 }
0x16a0   :  { %v2073_v58 = vmul.f32 1.442695, %v2067_v20  ;;  %v2064_v50 = vpop.xlane.xlu1 %2063 }
0x16a1   :  { %3231 = vpow2.f32 %v2071_v47  ;;  %v2068_v62 = vsub.f32 %v2052_v7, %v2064_v50 }
0x16a2   :  { %3233 = vpow2.f32 %v2073_v58 }
0x16a3   :  { %v2075_v3 = vmul.f32 1.442695, %v2068_v62 }
0x16a5   :  { %3235 = vpow2.f32 %v2075_v3 }
0x16a7   :  { %v3230_v8 = vpop.eup %3229 }
0x16a8   :  { %v2077_v21 = vsel %vm12_vm0, %v3230_v8, 0.0 }
0x16a9   :  { %2078 = vadd.xlane.f32.xlu0 %v2077_v21 }
0x16ab   :  { %v3232_v22 = vpop.eup %3231 }
0x16ac   :  { %v3234_v23 = vpop.eup %3233  ;;  %v2080_v24 = vsel %vm12_vm0, %v3232_v22, 0.0 }
0x16ad   :  { %2081 = vadd.xlane.f32.xlu1 %v2080_v24  ;;  %v2083_v25 = vsel %vm12_vm0, %v3234_v23, 0.0 }
0x16ae   :  { %2084 = vadd.xlane.f32.xlu0 %v2083_v25 }
0x16af   :  { %v3236_v26 = vpop.eup %3235 }
0x16b0   :  { %v2086_v27 = vsel %vm12_vm0, %v3236_v26, 0.0 }
0x16b1   :  { %2087 = vadd.xlane.f32.xlu1 %v2086_v27 }
0x1736   :  { %v2079_v28 = vpop.xlane.xlu0 %2078 }
0x1737   :  { %3237 = vlog2.f32 %v2079_v28 }
0x173a   :  { %v2082_v29 = vpop.xlane.xlu1 %2081 }
0x173b   :  { %3239 = vlog2.f32 %v2082_v29  ;;  %v2085_v30 = vpop.xlane.xlu0 %2084 }
0x173c   :  { %3241 = vlog2.f32 %v2085_v30 }
0x173e   :  { %v2088_v31 = vpop.xlane.xlu1 %2087 }
0x173f   :  { %3243 = vlog2.f32 %v2088_v31 }
0x1741   :  { %v3238_v32 = vpop.eup %3237 }
0x1742   :  { %v2090_v33 = vmul.f32 0.6931472, %v3238_v32 }
0x1744   :  { %v2097_v34 = vadd.f32 %v2090_v33, %v2055_v10 }
0x1745   :  { %v3240_v35 = vpop.eup %3239 }
0x1746   :  { %v3242_v36 = vpop.eup %3241  ;;  %v3972_v12 = vsub.f32 %v2049_v56, %v2097_v34  ;;  %v2092_v45 = vmul.f32 0.6931472, %v3240_v35 }
0x1747   :  { %v2094_v48 = vmul.f32 0.6931472, %v3242_v36 }
0x1748   :  { %v2105_v51 = vsel %vm12_vm0, %v3972_v12, -inf  ;;  %v2098_v54 = vadd.f32 %v2092_v45, %v2058_v19 }
0x1749   :  { %v3244_v53 = vpop.eup %3243  ;;  %v2106_v57 = vrot.slane %v2105_v51, 4  ;;  %v2099_v61 = vadd.f32 %v2094_v48, %v2061_v14 }
0x174a   :  { %v3976_v44 = vsub.f32 %v2050_v17, %v2098_v54  ;;  %v2096_v2 = vmul.f32 0.6931472, %v3244_v53 }
0x174b   :  { %v2107_v46 = vmax.f32 %v2105_v51, %v2106_v57  ;;  %v3978_v55 = vsub.f32 %v2051_v1, %v2099_v61 }
0x174c   :  { %v2112_v5 = vsel %vm12_vm0, %v3976_v44, -inf  ;;  %v2100_v49 = vadd.f32 %v2096_v2, %v2064_v50 }
0x174d   :  { %v2113_v59 = vrot.slane %v2112_v5, 4  ;;  %v2119_v37 = vsel %vm12_vm0, %v3978_v55, -inf  ;;  %v2108_v52 = vrot.slane %v2107_v46, 2 }
0x174e   :  { %v2120_v63 = vrot.slane %v2119_v37, 4  ;;  %v3984_v9 = vsub.f32 %v2052_v7, %v2100_v49 }
0x174f   :  { %v2114_v13 = vmax.f32 %v2112_v5, %v2113_v59  ;;  %v2109_v56 = vmax.f32 %v2107_v46, %v2108_v52 }
0x1750   :  { %v2121_v4 = vmax.f32 %v2119_v37, %v2120_v63  ;;  %v2126_v38 = vsel %vm12_vm0, %v3984_v9, -inf }
0x1751   :  { %v2127_v15 = vrot.slane %v2126_v38, 4  ;;  %v2110_v60 = vrot.slane %v2109_v56, 1  ;;  %v2115_v0 = vrot.slane %v2114_v13, 2 }
0x1752   :  { %v2122_v39 = vrot.slane %v2121_v4, 2 }
0x1753   :  { %v2128_v17 = vmax.f32 %v2126_v38, %v2127_v15  ;;  %v2111_v41 = vmax.f32 %v2109_v56, %v2110_v60  ;;  %v2116_v1 = vmax.f32 %v2114_v13, %v2115_v0 }
0x1754   :  { %v2123_v6 = vmax.f32 %v2121_v4, %v2122_v39 }
0x1755   :  { %v2133_v40 = vsub.f32 %v3972_v12, %v2111_v41  ;;  %v2117_v16 = vrot.slane %v2116_v1, 1  ;;  %v2129_v42 = vrot.slane %v2128_v17, 2 }
0x1756   :  { %v2124_v7 = vrot.slane %v2123_v6, 1 }
0x1757   :  { %v2137_v10 = vmul.f32 1.442695, %v2133_v40  ;;  %v2118_v11 = vmax.f32 %v2116_v1, %v2117_v16  ;;  %v2130_v18 = vmax.f32 %v2128_v17, %v2129_v42 }
0x1758   :  { %v2125_v19 = vmax.f32 %v2123_v6, %v2124_v7 }
0x1759   :  { %3245 = vpow2.f32 %v2137_v10  ;;  %v2134_v43 = vsub.f32 %v3976_v44, %v2118_v11  ;;  %v2131_v14 = vrot.slane %v2130_v18, 1 }
0x175a   :  { %v2135_v20 = vsub.f32 %v3978_v55, %v2125_v19 }
0x175b   :  { %v2139_v47 = vmul.f32 1.442695, %v2134_v43  ;;  %v2132_v58 = vmax.f32 %v2130_v18, %v2131_v14 }
0x175c   :  { %v2141_v50 = vmul.f32 1.442695, %v2135_v20 }
0x175d   :  { %3247 = vpow2.f32 %v2139_v47  ;;  %v2136_v62 = vsub.f32 %v3984_v9, %v2132_v58 }
0x175e   :  { %3249 = vpow2.f32 %v2141_v50 }
0x175f   :  { %v2143_v3 = vmul.f32 1.442695, %v2136_v62 }
0x1761   :  { %3251 = vpow2.f32 %v2143_v3 }
0x1763   :  { %v3246_v8 = vpop.eup %3245 }
0x1764   :  { %v2145_v21 = vsel %vm12_vm0, %v3246_v8, 0.0 }
0x1765   :  { %v2146_v22 = vrot.slane %v2145_v21, 4 }
0x1767   :  { %v3248_v23 = vpop.eup %3247  ;;  %v2147_v24 = vadd.f32 %v2146_v22, %v2145_v21 }
0x1768   :  { %v3250_v25 = vpop.eup %3249  ;;  %v2152_v26 = vsel %vm12_vm0, %v3248_v23, 0.0 }
0x1769   :  { %v2148_v27 = vrot.slane %v2147_v24, 2  ;;  %v2153_v28 = vrot.slane %v2152_v26, 4  ;;  %v2159_v29 = vsel %vm12_vm0, %v3250_v25, 0.0 }
0x176a   :  { %v2160_v30 = vrot.slane %v2159_v29, 4 }
0x176b   :  { %v3252_v31 = vpop.eup %3251  ;;  %v2149_v32 = vadd.f32 %v2148_v27, %v2147_v24  ;;  %v2154_v33 = vadd.f32 %v2153_v28, %v2152_v26 }
0x176c   :  { %v2161_v34 = vadd.f32 %v2160_v30, %v2159_v29  ;;  %v2166_v35 = vsel %vm12_vm0, %v3252_v31, 0.0 }
0x176d   :  { %v2150_v36 = vrot.slane %v2149_v32, 1  ;;  %v2155_v45 = vrot.slane %v2154_v33, 2  ;;  %v2167_v48 = vrot.slane %v2166_v35, 4 }
0x176e   :  { %v2162_v51 = vrot.slane %v2161_v34, 2 }
0x176f   :  { %v2151_v54 = vadd.f32 %v2150_v36, %v2149_v32  ;;  %v2156_v53 = vadd.f32 %v2155_v45, %v2154_v33  ;;  %v2168_v57 = vadd.f32 %v2167_v48, %v2166_v35 }
0x1770   :  { %v2163_v61 = vadd.f32 %v2162_v51, %v2161_v34 }
0x1771   :  { %3253 = vlog2.f32 %v2151_v54  ;;  %v2157_v2 = vrot.slane %v2156_v53, 1  ;;  %v2169_v46 = vrot.slane %v2168_v57, 2 }
0x1772   :  { %v2164_v5 = vrot.slane %v2163_v61, 1 }
0x1773   :  { %v2158_v49 = vadd.f32 %v2157_v2, %v2156_v53  ;;  %v2170_v59 = vadd.f32 %v2169_v46, %v2168_v57 }
0x1774   :  { %v2165_v37 = vadd.f32 %v2164_v5, %v2163_v61 }
0x1775   :  { %3255 = vlog2.f32 %v2158_v49  ;;  %v2171_v52 = vrot.slane %v2170_v59, 1 }
0x1776   :  { %3257 = vlog2.f32 %v2165_v37 }
0x1777   :  { %v2172_v63 = vadd.f32 %v2171_v52, %v2170_v59 }
0x1779   :  { %3259 = vlog2.f32 %v2172_v63 }
0x177b   :  { %v3254_v13 = vpop.eup %3253 }
0x177c   :  { %v2174_v56 = vmul.f32 0.6931472, %v3254_v13 }
0x177e   :  { %v2181_v4 = vadd.f32 %v2174_v56, %v2111_v41 }
0x177f   :  { %v3256_v38 = vpop.eup %3255 }
0x1780   :  { %v3258_v15 = vpop.eup %3257  ;;  %v2185_v60 = vsub.f32 %v3972_v12, %v2181_v4  ;;  %v2176_v0 = vmul.f32 0.6931472, %v3256_v38 }
0x1781   :  { %v2178_v39 = vmul.f32 0.6931472, %v3258_v15 }
0x1782   :  { %v2189_v17 = vsel %vm12_vm0, %v2185_v60, -inf  ;;  %v2182_v1 = vadd.f32 %v2176_v0, %v2118_v11 }
0x1783   :  { %v3260_v6 = vpop.eup %3259  ;;  %2190 = vmax.xlane.f32.xlu0 %v2189_v17  ;;  %v2183_v40 = vadd.f32 %v2178_v39, %v2125_v19 }
0x1784   :  { %v2186_v16 = vsub.f32 %v3976_v44, %v2182_v1  ;;  %v2180_v42 = vmul.f32 0.6931472, %v3260_v6 }
0x1785   :  { %v2187_v7 = vsub.f32 %v3978_v55, %v2183_v40 }
0x1786   :  { %v2192_v10 = vsel %vm12_vm0, %v2186_v16, -inf  ;;  %v2184_v41 = vadd.f32 %v2180_v42, %v2132_v58 }
0x1787   :  { %2193 = vmax.xlane.f32.xlu1 %v2192_v10  ;;  %v2195_v18 = vsel %vm12_vm0, %v2187_v7, -inf }
0x1788   :  { %2196 = vmax.xlane.f32.xlu0 %v2195_v18  ;;  %v2188_v12 = vsub.f32 %v3984_v9, %v2184_v41 }
0x178a   :  { %v2198_v43 = vsel %vm12_vm0, %v2188_v12, -inf }
0x178b   :  { %2199 = vmax.xlane.f32.xlu1 %v2198_v43 }
0x1810   :  { %v2191_v11 = vpop.xlane.xlu0 %2190 }
0x1811   :  { %v2201_v14 = vsub.f32 %v2185_v60, %v2191_v11 }
0x1813   :  { %v2205_v19 = vmul.f32 1.442695, %v2201_v14 }
0x1814   :  { %v2194_v20 = vpop.xlane.xlu1 %2193 }
0x1815   :  { %3261 = vpow2.f32 %v2205_v19  ;;  %v2202_v44 = vsub.f32 %v2186_v16, %v2194_v20  ;;  %v2197_v47 = vpop.xlane.xlu0 %2196 }
0x1816   :  { %v2203_v55 = vsub.f32 %v2187_v7, %v2197_v47 }
0x1817   :  { %v2207_v50 = vmul.f32 1.442695, %v2202_v44 }
0x1818   :  { %v2209_v62 = vmul.f32 1.442695, %v2203_v55  ;;  %v2200_v58 = vpop.xlane.xlu1 %2199 }
0x1819   :  { %3263 = vpow2.f32 %v2207_v50  ;;  %v2204_v3 = vsub.f32 %v2188_v12, %v2200_v58 }
0x181a   :  { %3265 = vpow2.f32 %v2209_v62 }
0x181b   :  { %v2211_v8 = vmul.f32 1.442695, %v2204_v3 }
0x181d   :  { %3267 = vpow2.f32 %v2211_v8 }
0x181f   :  { %v3262_v9 = vpop.eup %3261 }
0x1820   :  { %v2213_v21 = vsel %vm12_vm0, %v3262_v9, 0.0 }
0x1821   :  { %2214 = vadd.xlane.f32.xlu0 %v2213_v21 }
0x1823   :  { %v3264_v22 = vpop.eup %3263 }
0x1824   :  { %v3266_v23 = vpop.eup %3265  ;;  %v2216_v24 = vsel %vm12_vm0, %v3264_v22, 0.0 }
0x1825   :  { %2217 = vadd.xlane.f32.xlu1 %v2216_v24  ;;  %v2219_v25 = vsel %vm12_vm0, %v3266_v23, 0.0 }
0x1826   :  { %2220 = vadd.xlane.f32.xlu0 %v2219_v25 }
0x1827   :  { %v3268_v26 = vpop.eup %3267 }
0x1828   :  { %v2222_v27 = vsel %vm12_vm0, %v3268_v26, 0.0 }
0x1829   :  { %2223 = vadd.xlane.f32.xlu1 %v2222_v27 }
0x18ae   :  { %v2215_v28 = vpop.xlane.xlu0 %2214 }
0x18af   :  { %3269 = vlog2.f32 %v2215_v28 }
0x18b2   :  { %v2218_v29 = vpop.xlane.xlu1 %2217 }
0x18b3   :  { %3271 = vlog2.f32 %v2218_v29  ;;  %v2221_v30 = vpop.xlane.xlu0 %2220 }
0x18b4   :  { %3273 = vlog2.f32 %v2221_v30 }
0x18b6   :  { %v2224_v31 = vpop.xlane.xlu1 %2223 }
0x18b7   :  { %3275 = vlog2.f32 %v2224_v31 }
0x18b9   :  { %v3270_v32 = vpop.eup %3269 }
0x18ba   :  { %v2226_v33 = vmul.f32 0.6931472, %v3270_v32 }
0x18bc   :  { %v2233_v34 = vadd.f32 %v2226_v33, %v2191_v11 }
0x18bd   :  { %v3272_v35 = vpop.eup %3271 }
0x18be   :  { %v3274_v36 = vpop.eup %3273  ;;  %v4008_v45 = vsub.f32 %v2185_v60, %v2233_v34  ;;  %v2228_v48 = vmul.f32 0.6931472, %v3272_v35 }
0x18bf   :  { %v2230_v51 = vmul.f32 0.6931472, %v3274_v36 }
0x18c0   :  { %v2241_v54 = vsel %vm12_vm0, %v4008_v45, -inf  ;;  %v2234_v53 = vadd.f32 %v2228_v48, %v2194_v20 }
0x18c1   :  { %v3276_v57 = vpop.eup %3275  ;;  %v2242_v61 = vrot.slane %v2241_v54, 4  ;;  %v2235_v2 = vadd.f32 %v2230_v51, %v2197_v47 }
0x18c2   :  { %v4012_v46 = vsub.f32 %v2186_v16, %v2234_v53  ;;  %v2232_v5 = vmul.f32 0.6931472, %v3276_v57 }
0x18c3   :  { %v2243_v49 = vmax.f32 %v2241_v54, %v2242_v61  ;;  %v4014_v59 = vsub.f32 %v2187_v7, %v2235_v2 }
0x18c4   :  { %v2248_v37 = vsel %vm12_vm0, %v4012_v46, -inf  ;;  %v2236_v52 = vadd.f32 %v2232_v5, %v2200_v58 }
0x18c5   :  { %v2249_v63 = vrot.slane %v2248_v37, 4  ;;  %v2255_v13 = vsel %vm12_vm0, %v4014_v59, -inf  ;;  %v2244_v56 = vrot.slane %v2243_v49, 2 }
0x18c6   :  { %v2256_v4 = vrot.slane %v2255_v13, 4  ;;  %v4020_v38 = vsub.f32 %v2188_v12, %v2236_v52 }
0x18c7   :  { %v2250_v15 = vmax.f32 %v2248_v37, %v2249_v63  ;;  %v2245_v60 = vmax.f32 %v2243_v49, %v2244_v56 }
0x18c8   :  { %v2257_v0 = vmax.f32 %v2255_v13, %v2256_v4  ;;  %v2262_v39 = vsel %vm12_vm0, %v4020_v38, -inf }
0x18c9   :  { %v2263_v17 = vrot.slane %v2262_v39, 4  ;;  %v2246_v1 = vrot.slane %v2245_v60, 1  ;;  %v2251_v6 = vrot.slane %v2250_v15, 2 }
0x18ca   :  { %v2258_v40 = vrot.slane %v2257_v0, 2 }
0x18cb   :  { %v2264_v16 = vmax.f32 %v2262_v39, %v2263_v17  ;;  %v2247_v42 = vmax.f32 %v2245_v60, %v2246_v1  ;;  %v2252_v7 = vmax.f32 %v2250_v15, %v2251_v6 }
0x18cc   :  { %v2259_v10 = vmax.f32 %v2257_v0, %v2258_v40 }
0x18cd   :  { %v2269_v41 = vsub.f32 %v4008_v45, %v2247_v42  ;;  %v2253_v18 = vrot.slane %v2252_v7, 1  ;;  %v2265_v43 = vrot.slane %v2264_v16, 2 }
0x18ce   :  { %v2260_v12 = vrot.slane %v2259_v10, 1 }
0x18cf   :  { %v2273_v11 = vmul.f32 1.442695, %v2269_v41  ;;  %v2254_v14 = vmax.f32 %v2252_v7, %v2253_v18  ;;  %v2266_v19 = vmax.f32 %v2264_v16, %v2265_v43 }
0x18d0   :  { %v2261_v20 = vmax.f32 %v2259_v10, %v2260_v12 }
0x18d1   :  { %3277 = vpow2.f32 %v2273_v11  ;;  %v2270_v44 = vsub.f32 %v4012_v46, %v2254_v14  ;;  %v2267_v47 = vrot.slane %v2266_v19, 1 }
0x18d2   :  { %v2271_v55 = vsub.f32 %v4014_v59, %v2261_v20 }
0x18d3   :  { %v2275_v50 = vmul.f32 1.442695, %v2270_v44  ;;  %v2268_v62 = vmax.f32 %v2266_v19, %v2267_v47 }
0x18d4   :  { %v2277_v58 = vmul.f32 1.442695, %v2271_v55 }
0x18d5   :  { %3279 = vpow2.f32 %v2275_v50  ;;  %v2272_v3 = vsub.f32 %v4020_v38, %v2268_v62 }
0x18d6   :  { %3281 = vpow2.f32 %v2277_v58 }
0x18d7   :  { %v2279_v8 = vmul.f32 1.442695, %v2272_v3 }
0x18d9   :  { %3283 = vpow2.f32 %v2279_v8 }
0x18db   :  { %v3278_v9 = vpop.eup %3277 }
0x18dc   :  { %v2281_v21 = vsel %vm12_vm0, %v3278_v9, 0.0 }
0x18dd   :  { %v2282_v22 = vrot.slane %v2281_v21, 4 }
0x18df   :  { %v3280_v23 = vpop.eup %3279  ;;  %v2283_v24 = vadd.f32 %v2282_v22, %v2281_v21 }
0x18e0   :  { %v3282_v25 = vpop.eup %3281  ;;  %v2288_v26 = vsel %vm12_vm0, %v3280_v23, 0.0 }
0x18e1   :  { %v2284_v27 = vrot.slane %v2283_v24, 2  ;;  %v2289_v28 = vrot.slane %v2288_v26, 4  ;;  %v2295_v29 = vsel %vm12_vm0, %v3282_v25, 0.0 }
0x18e2   :  { %v2296_v30 = vrot.slane %v2295_v29, 4 }
0x18e3   :  { %v3284_v31 = vpop.eup %3283  ;;  %v2285_v32 = vadd.f32 %v2284_v27, %v2283_v24  ;;  %v2290_v33 = vadd.f32 %v2289_v28, %v2288_v26 }
0x18e4   :  { %v2297_v34 = vadd.f32 %v2296_v30, %v2295_v29  ;;  %v2302_v35 = vsel %vm12_vm0, %v3284_v31, 0.0 }
0x18e5   :  { %v2286_v36 = vrot.slane %v2285_v32, 1  ;;  %v2291_v48 = vrot.slane %v2290_v33, 2  ;;  %v2303_v51 = vrot.slane %v2302_v35, 4 }
0x18e6   :  { %v2298_v54 = vrot.slane %v2297_v34, 2 }
0x18e7   :  { %v2287_v53 = vadd.f32 %v2286_v36, %v2285_v32  ;;  %v2292_v57 = vadd.f32 %v2291_v48, %v2290_v33  ;;  %v2304_v61 = vadd.f32 %v2303_v51, %v2302_v35 }
0x18e8   :  { %v2299_v2 = vadd.f32 %v2298_v54, %v2297_v34 }
0x18e9   :  { %3285 = vlog2.f32 %v2287_v53  ;;  %v2293_v5 = vrot.slane %v2292_v57, 1  ;;  %v2305_v49 = vrot.slane %v2304_v61, 2 }
0x18ea   :  { %v2300_v37 = vrot.slane %v2299_v2, 1 }
0x18eb   :  { %v2294_v52 = vadd.f32 %v2293_v5, %v2292_v57  ;;  %v2306_v63 = vadd.f32 %v2305_v49, %v2304_v61 }
0x18ec   :  { %v2301_v13 = vadd.f32 %v2300_v37, %v2299_v2 }
0x18ed   :  { %3287 = vlog2.f32 %v2294_v52  ;;  %v2307_v56 = vrot.slane %v2306_v63, 1 }
0x18ee   :  { %3289 = vlog2.f32 %v2301_v13 }
0x18ef   :  { %v2308_v4 = vadd.f32 %v2307_v56, %v2306_v63 }
0x18f1   :  { %3291 = vlog2.f32 %v2308_v4 }
0x18f3   :  { %v3286_v15 = vpop.eup %3285 }
0x18f4   :  { %v2310_v60 = vmul.f32 0.6931472, %v3286_v15 }
0x18f6   :  { %v2317_v0 = vadd.f32 %v2310_v60, %v2247_v42 }
0x18f7   :  { %v3288_v39 = vpop.eup %3287 }
0x18f8   :  { %v3290_v17 = vpop.eup %3289  ;;  %v2321_v1 = vsub.f32 %v4008_v45, %v2317_v0  ;;  %v2312_v6 = vmul.f32 0.6931472, %v3288_v39 }
0x18f9   :  { %v2314_v40 = vmul.f32 0.6931472, %v3290_v17 }
0x18fa   :  { %v2325_v16 = vsel %vm12_vm0, %v2321_v1, -inf  ;;  %v2318_v7 = vadd.f32 %v2312_v6, %v2254_v14 }
0x18fb   :  { %v3292_v10 = vpop.eup %3291  ;;  %2326 = vmax.xlane.f32.xlu0 %v2325_v16  ;;  %v2319_v41 = vadd.f32 %v2314_v40, %v2261_v20 }
0x18fc   :  { %v2322_v18 = vsub.f32 %v4012_v46, %v2318_v7  ;;  %v2316_v43 = vmul.f32 0.6931472, %v3292_v10 }
0x18fd   :  { %v2323_v12 = vsub.f32 %v4014_v59, %v2319_v41 }
0x18fe   :  { %v2328_v11 = vsel %vm12_vm0, %v2322_v18, -inf  ;;  %v2320_v42 = vadd.f32 %v2316_v43, %v2268_v62 }
0x18ff   :  { %2329 = vmax.xlane.f32.xlu1 %v2328_v11  ;;  %v2331_v19 = vsel %vm12_vm0, %v2323_v12, -inf }
0x1900   :  { %2332 = vmax.xlane.f32.xlu0 %v2331_v19  ;;  %v2324_v45 = vsub.f32 %v4020_v38, %v2320_v42 }
0x1902   :  { %v2334_v44 = vsel %vm12_vm0, %v2324_v45, -inf }
0x1903   :  { %2335 = vmax.xlane.f32.xlu1 %v2334_v44 }
0x1988   :  { %v2327_v14 = vpop.xlane.xlu0 %2326 }
0x1989   :  { %v2337_v47 = vsub.f32 %v2321_v1, %v2327_v14 }
0x198b   :  { %v2341_v20 = vmul.f32 1.442695, %v2337_v47 }
0x198c   :  { %v2330_v55 = vpop.xlane.xlu1 %2329 }
0x198d   :  { %3293 = vpow2.f32 %v2341_v20  ;;  %v2338_v46 = vsub.f32 %v2322_v18, %v2330_v55  ;;  %v2333_v50 = vpop.xlane.xlu0 %2332 }
0x198e   :  { %v2339_v59 = vsub.f32 %v2323_v12, %v2333_v50 }
0x198f   :  { %v2343_v58 = vmul.f32 1.442695, %v2338_v46 }
0x1990   :  { %v2345_v3 = vmul.f32 1.442695, %v2339_v59  ;;  %v2336_v62 = vpop.xlane.xlu1 %2335 }
0x1991   :  { %3295 = vpow2.f32 %v2343_v58  ;;  %v2340_v8 = vsub.f32 %v2324_v45, %v2336_v62 }
0x1992   :  { %3297 = vpow2.f32 %v2345_v3 }
0x1993   :  { %v2347_v9 = vmul.f32 1.442695, %v2340_v8 }
0x1995   :  { %3299 = vpow2.f32 %v2347_v9 }
0x1997   :  { %v3294_v38 = vpop.eup %3293 }
0x1998   :  { %v2349_v21 = vsel %vm12_vm0, %v3294_v38, 0.0 }
0x1999   :  { %2350 = vadd.xlane.f32.xlu0 %v2349_v21 }
0x199b   :  { %v3296_v22 = vpop.eup %3295 }
0x199c   :  { %v3298_v23 = vpop.eup %3297  ;;  %v2352_v24 = vsel %vm12_vm0, %v3296_v22, 0.0 }
0x199d   :  { %2353 = vadd.xlane.f32.xlu1 %v2352_v24  ;;  %v2355_v25 = vsel %vm12_vm0, %v3298_v23, 0.0 }
0x199e   :  { %2356 = vadd.xlane.f32.xlu0 %v2355_v25 }
0x199f   :  { %v3300_v26 = vpop.eup %3299 }
0x19a0   :  { %v2358_v27 = vsel %vm12_vm0, %v3300_v26, 0.0 }
0x19a1   :  { %2359 = vadd.xlane.f32.xlu1 %v2358_v27 }
0x1a26   :  { %v2351_v28 = vpop.xlane.xlu0 %2350 }
0x1a27   :  { %3301 = vlog2.f32 %v2351_v28 }
0x1a2a   :  { %v2354_v29 = vpop.xlane.xlu1 %2353 }
0x1a2b   :  { %3303 = vlog2.f32 %v2354_v29  ;;  %v2357_v30 = vpop.xlane.xlu0 %2356 }
0x1a2c   :  { %3305 = vlog2.f32 %v2357_v30 }
0x1a2e   :  { %v2360_v31 = vpop.xlane.xlu1 %2359 }
0x1a2f   :  { %3307 = vlog2.f32 %v2360_v31 }
0x1a31   :  { %v3302_v32 = vpop.eup %3301 }
0x1a32   :  { %v2362_v33 = vmul.f32 0.6931472, %v3302_v32 }
0x1a34   :  { %v2369_v34 = vadd.f32 %v2362_v33, %v2327_v14 }
0x1a35   :  { %v3304_v35 = vpop.eup %3303 }
0x1a36   :  { %v3306_v36 = vpop.eup %3305  ;;  %v4044_v48 = vsub.f32 %v2321_v1, %v2369_v34  ;;  %v2364_v51 = vmul.f32 0.6931472, %v3304_v35 }
0x1a37   :  { %v2366_v54 = vmul.f32 0.6931472, %v3306_v36 }
0x1a38   :  { %v2377_v53 = vsel %vm12_vm0, %v4044_v48, -inf  ;;  %v2370_v57 = vadd.f32 %v2364_v51, %v2330_v55 }
0x1a39   :  { %v3308_v61 = vpop.eup %3307  ;;  %v2378_v2 = vrot.slane %v2377_v53, 4  ;;  %v2371_v5 = vadd.f32 %v2366_v54, %v2333_v50 }
0x1a3a   :  { %v4048_v49 = vsub.f32 %v2322_v18, %v2370_v57  ;;  %v2368_v37 = vmul.f32 0.6931472, %v3308_v61 }
0x1a3b   :  { %v2379_v52 = vmax.f32 %v2377_v53, %v2378_v2  ;;  %v4050_v63 = vsub.f32 %v2323_v12, %v2371_v5 }
0x1a3c   :  { %v2384_v13 = vsel %vm12_vm0, %v4048_v49, -inf  ;;  %v2372_v56 = vadd.f32 %v2368_v37, %v2336_v62 }
0x1a3d   :  { %v2385_v4 = vrot.slane %v2384_v13, 4  ;;  %v2391_v15 = vsel %vm12_vm0, %v4050_v63, -inf  ;;  %v2380_v60 = vrot.slane %v2379_v52, 2 }
0x1a3e   :  { %v2392_v0 = vrot.slane %v2391_v15, 4  ;;  %v4056_v39 = vsub.f32 %v2324_v45, %v2372_v56 }
0x1a3f   :  { %v2386_v17 = vmax.f32 %v2384_v13, %v2385_v4  ;;  %v2381_v1 = vmax.f32 %v2379_v52, %v2380_v60 }
0x1a40   :  { %v2393_v6 = vmax.f32 %v2391_v15, %v2392_v0  ;;  %v2398_v40 = vsel %vm12_vm0, %v4056_v39, -inf }
0x1a41   :  { %v2399_v16 = vrot.slane %v2398_v40, 4  ;;  %v2382_v7 = vrot.slane %v2381_v1, 1  ;;  %v2387_v10 = vrot.slane %v2386_v17, 2 }
0x1a42   :  { %v2394_v41 = vrot.slane %v2393_v6, 2 }
0x1a43   :  { %v2400_v18 = vmax.f32 %v2398_v40, %v2399_v16  ;;  %v2383_v43 = vmax.f32 %v2381_v1, %v2382_v7  ;;  %v2388_v12 = vmax.f32 %v2386_v17, %v2387_v10 }
0x1a44   :  { %v2395_v11 = vmax.f32 %v2393_v6, %v2394_v41 }
0x1a45   :  { %v2405_v42 = vsub.f32 %v4044_v48, %v2383_v43  ;;  %v2389_v19 = vrot.slane %v2388_v12, 1  ;;  %v2401_v44 = vrot.slane %v2400_v18, 2 }
0x1a46   :  { %v2396_v45 = vrot.slane %v2395_v11, 1 }
0x1a47   :  { %v2409_v14 = vmul.f32 1.442695, %v2405_v42  ;;  %v2390_v47 = vmax.f32 %v2388_v12, %v2389_v19  ;;  %v2402_v20 = vmax.f32 %v2400_v18, %v2401_v44 }
0x1a48   :  { %v2397_v55 = vmax.f32 %v2395_v11, %v2396_v45 }
0x1a49   :  { %3309 = vpow2.f32 %v2409_v14  ;;  %v2406_v46 = vsub.f32 %v4048_v49, %v2390_v47  ;;  %v2403_v50 = vrot.slane %v2402_v20, 1 }
0x1a4a   :  { %v2407_v59 = vsub.f32 %v4050_v63, %v2397_v55 }
0x1a4b   :  { %v2411_v58 = vmul.f32 1.442695, %v2406_v46  ;;  %v2404_v3 = vmax.f32 %v2402_v20, %v2403_v50 }
0x1a4c   :  { %v2413_v62 = vmul.f32 1.442695, %v2407_v59 }
0x1a4d   :  { %3311 = vpow2.f32 %v2411_v58  ;;  %v2408_v8 = vsub.f32 %v4056_v39, %v2404_v3 }
0x1a4e   :  { %3313 = vpow2.f32 %v2413_v62 }
0x1a4f   :  { %v2415_v9 = vmul.f32 1.442695, %v2408_v8 }
0x1a51   :  { %3315 = vpow2.f32 %v2415_v9 }
0x1a53   :  { %v3310_v38 = vpop.eup %3309 }
0x1a54   :  { %v2417_v21 = vsel %vm12_vm0, %v3310_v38, 0.0 }
0x1a55   :  { %v2418_v22 = vrot.slane %v2417_v21, 4 }
0x1a57   :  { %v3312_v23 = vpop.eup %3311  ;;  %v2419_v24 = vadd.f32 %v2418_v22, %v2417_v21 }
0x1a58   :  { %v3314_v25 = vpop.eup %3313  ;;  %v2424_v26 = vsel %vm12_vm0, %v3312_v23, 0.0 }
0x1a59   :  { %v2420_v27 = vrot.slane %v2419_v24, 2  ;;  %v2425_v28 = vrot.slane %v2424_v26, 4  ;;  %v2431_v29 = vsel %vm12_vm0, %v3314_v25, 0.0 }
0x1a5a   :  { %v2432_v30 = vrot.slane %v2431_v29, 4 }
0x1a5b   :  { %v3316_v31 = vpop.eup %3315  ;;  %v2421_v32 = vadd.f32 %v2420_v27, %v2419_v24  ;;  %v2426_v33 = vadd.f32 %v2425_v28, %v2424_v26 }
0x1a5c   :  { %v2433_v34 = vadd.f32 %v2432_v30, %v2431_v29  ;;  %v2438_v35 = vsel %vm12_vm0, %v3316_v31, 0.0 }
0x1a5d   :  { %v2422_v36 = vrot.slane %v2421_v32, 1  ;;  %v2427_v51 = vrot.slane %v2426_v33, 2  ;;  %v2439_v54 = vrot.slane %v2438_v35, 4 }
0x1a5e   :  { %v2434_v53 = vrot.slane %v2433_v34, 2 }
0x1a5f   :  { %v2423_v57 = vadd.f32 %v2422_v36, %v2421_v32  ;;  %v2428_v61 = vadd.f32 %v2427_v51, %v2426_v33  ;;  %v2440_v2 = vadd.f32 %v2439_v54, %v2438_v35 }
0x1a60   :  { %v2435_v5 = vadd.f32 %v2434_v53, %v2433_v34 }
0x1a61   :  { %3317 = vlog2.f32 %v2423_v57  ;;  %v2429_v37 = vrot.slane %v2428_v61, 1  ;;  %v2441_v52 = vrot.slane %v2440_v2, 2 }
0x1a62   :  { %v2436_v13 = vrot.slane %v2435_v5, 1 }
0x1a63   :  { %v2430_v56 = vadd.f32 %v2429_v37, %v2428_v61  ;;  %v2442_v4 = vadd.f32 %v2441_v52, %v2440_v2 }
0x1a64   :  { %v2437_v15 = vadd.f32 %v2436_v13, %v2435_v5 }
0x1a65   :  { %3319 = vlog2.f32 %v2430_v56  ;;  %v2443_v60 = vrot.slane %v2442_v4, 1 }
0x1a66   :  { %3321 = vlog2.f32 %v2437_v15 }
0x1a67   :  { %v2444_v0 = vadd.f32 %v2443_v60, %v2442_v4 }
0x1a69   :  { %3323 = vlog2.f32 %v2444_v0 }
0x1a6b   :  { %v3318_v17 = vpop.eup %3317 }
0x1a6c   :  { %v2446_v1 = vmul.f32 0.6931472, %v3318_v17 }
0x1a6e   :  { %v2453_v6 = vadd.f32 %v2446_v1, %v2383_v43 }
0x1a6f   :  { %v3320_v40 = vpop.eup %3319 }
0x1a70   :  { %v3322_v16 = vpop.eup %3321  ;;  %v2457_v7 = vsub.f32 %v4044_v48, %v2453_v6  ;;  %v2448_v10 = vmul.f32 0.6931472, %v3320_v40 }
0x1a71   :  { %v2450_v41 = vmul.f32 0.6931472, %v3322_v16 }
0x1a72   :  { %v2461_v18 = vsel %vm12_vm0, %v2457_v7, -inf  ;;  %v2454_v12 = vadd.f32 %v2448_v10, %v2390_v47 }
0x1a73   :  { %v3324_v11 = vpop.eup %3323  ;;  %2462 = vmax.xlane.f32.xlu0 %v2461_v18  ;;  %v2455_v42 = vadd.f32 %v2450_v41, %v2397_v55 }
0x1a74   :  { %v2458_v19 = vsub.f32 %v4048_v49, %v2454_v12  ;;  %v2452_v44 = vmul.f32 0.6931472, %v3324_v11 }
0x1a75   :  { %v2459_v45 = vsub.f32 %v4050_v63, %v2455_v42 }
0x1a76   :  { %v2464_v14 = vsel %vm12_vm0, %v2458_v19, -inf  ;;  %v2456_v43 = vadd.f32 %v2452_v44, %v2404_v3 }
0x1a77   :  { %2465 = vmax.xlane.f32.xlu1 %v2464_v14  ;;  %v2467_v20 = vsel %vm12_vm0, %v2459_v45, -inf }
0x1a78   :  { %2468 = vmax.xlane.f32.xlu0 %v2467_v20  ;;  %v2460_v48 = vsub.f32 %v4056_v39, %v2456_v43 }
0x1a7a   :  { %v2470_v46 = vsel %vm12_vm0, %v2460_v48, -inf }
0x1a7b   :  { %2471 = vmax.xlane.f32.xlu1 %v2470_v46 }
0x1b00   :  { %v2463_v47 = vpop.xlane.xlu0 %2462 }
0x1b01   :  { %v2473_v50 = vsub.f32 %v2457_v7, %v2463_v47 }
0x1b03   :  { %v2477_v55 = vmul.f32 1.442695, %v2473_v50 }
0x1b04   :  { %v2466_v59 = vpop.xlane.xlu1 %2465 }
0x1b05   :  { %3325 = vpow2.f32 %v2477_v55  ;;  %v2474_v49 = vsub.f32 %v2458_v19, %v2466_v59  ;;  %v2469_v58 = vpop.xlane.xlu0 %2468 }
0x1b06   :  { %v2475_v63 = vsub.f32 %v2459_v45, %v2469_v58 }
0x1b07   :  { %v2479_v62 = vmul.f32 1.442695, %v2474_v49 }
0x1b08   :  { %v2481_v8 = vmul.f32 1.442695, %v2475_v63  ;;  %v2472_v3 = vpop.xlane.xlu1 %2471 }
0x1b09   :  { %3327 = vpow2.f32 %v2479_v62  ;;  %v2476_v9 = vsub.f32 %v2460_v48, %v2472_v3 }
0x1b0a   :  { %3329 = vpow2.f32 %v2481_v8 }
0x1b0b   :  { %v2483_v38 = vmul.f32 1.442695, %v2476_v9 }
0x1b0d   :  { %3331 = vpow2.f32 %v2483_v38 }
0x1b0f   :  { %v3326_v39 = vpop.eup %3325 }
0x1b10   :  { %v2485_v21 = vsel %vm12_vm0, %v3326_v39, 0.0 }
0x1b11   :  { %2486 = vadd.xlane.f32.xlu0 %v2485_v21 }
0x1b13   :  { %v3328_v22 = vpop.eup %3327 }
0x1b14   :  { %v3330_v23 = vpop.eup %3329  ;;  %v2488_v24 = vsel %vm12_vm0, %v3328_v22, 0.0 }
0x1b15   :  { %2489 = vadd.xlane.f32.xlu1 %v2488_v24  ;;  %v2491_v25 = vsel %vm12_vm0, %v3330_v23, 0.0 }
0x1b16   :  { %2492 = vadd.xlane.f32.xlu0 %v2491_v25 }
0x1b17   :  { %v3332_v26 = vpop.eup %3331 }
0x1b18   :  { %v2494_v27 = vsel %vm12_vm0, %v3332_v26, 0.0 }
0x1b19   :  { %2495 = vadd.xlane.f32.xlu1 %v2494_v27 }
0x1b9e   :  { %v2487_v28 = vpop.xlane.xlu0 %2486 }
0x1b9f   :  { %3333 = vlog2.f32 %v2487_v28 }
0x1ba2   :  { %v2490_v29 = vpop.xlane.xlu1 %2489 }
0x1ba3   :  { %3335 = vlog2.f32 %v2490_v29  ;;  %v2493_v30 = vpop.xlane.xlu0 %2492 }
0x1ba4   :  { %3337 = vlog2.f32 %v2493_v30 }
0x1ba6   :  { %v2496_v31 = vpop.xlane.xlu1 %2495 }
0x1ba7   :  { %3339 = vlog2.f32 %v2496_v31 }
0x1ba9   :  { %v3334_v32 = vpop.eup %3333 }
0x1baa   :  { %v2498_v33 = vmul.f32 0.6931472, %v3334_v32 }
0x1bac   :  { %v2505_v34 = vadd.f32 %v2498_v33, %v2463_v47 }
0x1bad   :  { %v3336_v35 = vpop.eup %3335 }
0x1bae   :  { %v3338_v36 = vpop.eup %3337  ;;  %v4080_v51 = vsub.f32 %v2457_v7, %v2505_v34  ;;  %v2500_v54 = vmul.f32 0.6931472, %v3336_v35 }
0x1baf   :  { %v2502_v53 = vmul.f32 0.6931472, %v3338_v36 }
0x1bb0   :  { %v2513_v57 = vsel %vm12_vm0, %v4080_v51, -inf  ;;  %v2506_v61 = vadd.f32 %v2500_v54, %v2466_v59 }
0x1bb1   :  { %v3340_v2 = vpop.eup %3339  ;;  %v2514_v5 = vrot.slane %v2513_v57, 4  ;;  %v2507_v37 = vadd.f32 %v2502_v53, %v2469_v58 }
0x1bb2   :  { %v4084_v52 = vsub.f32 %v2458_v19, %v2506_v61  ;;  %v2504_v13 = vmul.f32 0.6931472, %v3340_v2 }
0x1bb3   :  { %v2515_v56 = vmax.f32 %v2513_v57, %v2514_v5  ;;  %v4086_v4 = vsub.f32 %v2459_v45, %v2507_v37 }
0x1bb4   :  { %v2520_v15 = vsel %vm12_vm0, %v4084_v52, -inf  ;;  %v2508_v60 = vadd.f32 %v2504_v13, %v2472_v3 }
0x1bb5   :  { %v2521_v0 = vrot.slane %v2520_v15, 4  ;;  %v2527_v17 = vsel %vm12_vm0, %v4086_v4, -inf  ;;  %v2516_v1 = vrot.slane %v2515_v56, 2 }
0x1bb6   :  { %v2528_v6 = vrot.slane %v2527_v17, 4  ;;  %v4092_v40 = vsub.f32 %v2460_v48, %v2508_v60 }
0x1bb7   :  { %v2522_v16 = vmax.f32 %v2520_v15, %v2521_v0  ;;  %v2517_v7 = vmax.f32 %v2515_v56, %v2516_v1 }
0x1bb8   :  { %v2529_v10 = vmax.f32 %v2527_v17, %v2528_v6  ;;  %v2534_v41 = vsel %vm12_vm0, %v4092_v40, -inf }
0x1bb9   :  { %v2535_v18 = vrot.slane %v2534_v41, 4  ;;  %v2518_v12 = vrot.slane %v2517_v7, 1  ;;  %v2523_v11 = vrot.slane %v2522_v16, 2 }
0x1bba   :  { %v2530_v42 = vrot.slane %v2529_v10, 2 }
0x1bbb   :  { %v2536_v19 = vmax.f32 %v2534_v41, %v2535_v18  ;;  %v2519_v44 = vmax.f32 %v2517_v7, %v2518_v12  ;;  %v2524_v45 = vmax.f32 %v2522_v16, %v2523_v11 }
0x1bbc   :  { %v2531_v14 = vmax.f32 %v2529_v10, %v2530_v42 }
0x1bbd   :  { %v2541_v43 = vsub.f32 %v4080_v51, %v2519_v44  ;;  %v2525_v20 = vrot.slane %v2524_v45, 1  ;;  %v2537_v46 = vrot.slane %v2536_v19, 2 }
0x1bbe   :  { %v2532_v48 = vrot.slane %v2531_v14, 1 }
0x1bbf   :  { %v2545_v47 = vmul.f32 1.442695, %v2541_v43  ;;  %v2526_v50 = vmax.f32 %v2524_v45, %v2525_v20  ;;  %v2538_v55 = vmax.f32 %v2536_v19, %v2537_v46 }
0x1bc0   :  { %v2533_v59 = vmax.f32 %v2531_v14, %v2532_v48 }
0x1bc1   :  { %3341 = vpow2.f32 %v2545_v47  ;;  %v2542_v49 = vsub.f32 %v4084_v52, %v2526_v50  ;;  %v2539_v58 = vrot.slane %v2538_v55, 1 }
0x1bc2   :  { %v2543_v63 = vsub.f32 %v4086_v4, %v2533_v59 }
0x1bc3   :  { %v2547_v62 = vmul.f32 1.442695, %v2542_v49  ;;  %v2540_v8 = vmax.f32 %v2538_v55, %v2539_v58 }
0x1bc4   :  { %v2549_v3 = vmul.f32 1.442695, %v2543_v63 }
0x1bc5   :  { %3343 = vpow2.f32 %v2547_v62  ;;  %v2544_v9 = vsub.f32 %v4092_v40, %v2540_v8 }
0x1bc6   :  { %3345 = vpow2.f32 %v2549_v3 }
0x1bc7   :  { %v2551_v38 = vmul.f32 1.442695, %v2544_v9 }
0x1bc9   :  { %3347 = vpow2.f32 %v2551_v38 }
0x1bcb   :  { %v3342_v39 = vpop.eup %3341 }
0x1bcc   :  { %v2553_v21 = vsel %vm12_vm0, %v3342_v39, 0.0 }
0x1bcd   :  { %v2554_v22 = vrot.slane %v2553_v21, 4 }
0x1bcf   :  { %v3344_v23 = vpop.eup %3343  ;;  %v2555_v24 = vadd.f32 %v2554_v22, %v2553_v21 }
0x1bd0   :  { %v3346_v25 = vpop.eup %3345  ;;  %v2560_v26 = vsel %vm12_vm0, %v3344_v23, 0.0 }
0x1bd1   :  { %v2556_v27 = vrot.slane %v2555_v24, 2  ;;  %v2561_v28 = vrot.slane %v2560_v26, 4  ;;  %v2567_v29 = vsel %vm12_vm0, %v3346_v25, 0.0 }
0x1bd2   :  { %v2568_v30 = vrot.slane %v2567_v29, 4 }
0x1bd3   :  { %v3348_v31 = vpop.eup %3347  ;;  %v2557_v32 = vadd.f32 %v2556_v27, %v2555_v24  ;;  %v2562_v33 = vadd.f32 %v2561_v28, %v2560_v26 }
0x1bd4   :  { %v2569_v34 = vadd.f32 %v2568_v30, %v2567_v29  ;;  %v2574_v35 = vsel %vm12_vm0, %v3348_v31, 0.0 }
0x1bd5   :  { %v2558_v36 = vrot.slane %v2557_v32, 1  ;;  %v2563_v54 = vrot.slane %v2562_v33, 2  ;;  %v2575_v53 = vrot.slane %v2574_v35, 4 }
0x1bd6   :  { %v2570_v57 = vrot.slane %v2569_v34, 2 }
0x1bd7   :  { %v2559_v61 = vadd.f32 %v2558_v36, %v2557_v32  ;;  %v2564_v2 = vadd.f32 %v2563_v54, %v2562_v33  ;;  %v2576_v5 = vadd.f32 %v2575_v53, %v2574_v35 }
0x1bd8   :  { %v2571_v37 = vadd.f32 %v2570_v57, %v2569_v34 }
0x1bd9   :  { %3349 = vlog2.f32 %v2559_v61  ;;  %v2565_v13 = vrot.slane %v2564_v2, 1  ;;  %v2577_v56 = vrot.slane %v2576_v5, 2 }
0x1bda   :  { %v2572_v15 = vrot.slane %v2571_v37, 1 }
0x1bdb   :  { %v2566_v60 = vadd.f32 %v2565_v13, %v2564_v2  ;;  %v2578_v0 = vadd.f32 %v2577_v56, %v2576_v5 }
0x1bdc   :  { %v2573_v17 = vadd.f32 %v2572_v15, %v2571_v37 }
0x1bdd   :  { %3351 = vlog2.f32 %v2566_v60  ;;  %v2579_v1 = vrot.slane %v2578_v0, 1 }
0x1bde   :  { %3353 = vlog2.f32 %v2573_v17 }
0x1bdf   :  { %v2580_v6 = vadd.f32 %v2579_v1, %v2578_v0 }
0x1be1   :  { %3355 = vlog2.f32 %v2580_v6 }
0x1be3   :  { %v3350_v16 = vpop.eup %3349 }
0x1be4   :  { %v2582_v7 = vmul.f32 0.6931472, %v3350_v16 }
0x1be6   :  { %v2589_v10 = vadd.f32 %v2582_v7, %v2519_v44 }
0x1be7   :  { %v3352_v41 = vpop.eup %3351 }
0x1be8   :  { %v3354_v18 = vpop.eup %3353  ;;  %v2593_v12 = vsub.f32 %v4080_v51, %v2589_v10  ;;  %v2584_v11 = vmul.f32 0.6931472, %v3352_v41 }
0x1be9   :  { %v2586_v42 = vmul.f32 0.6931472, %v3354_v18 }
0x1bea   :  { %v2597_v19 = vsel %vm12_vm0, %v2593_v12, -inf  ;;  %v2590_v45 = vadd.f32 %v2584_v11, %v2526_v50 }
0x1beb   :  { %v3356_v14 = vpop.eup %3355  ;;  %2598 = vmax.xlane.f32.xlu0 %v2597_v19  ;;  %v2591_v43 = vadd.f32 %v2586_v42, %v2533_v59 }
0x1bec   :  { %v2594_v20 = vsub.f32 %v4084_v52, %v2590_v45  ;;  %v2588_v46 = vmul.f32 0.6931472, %v3356_v14 }
0x1bed   :  { %v2595_v48 = vsub.f32 %v4086_v4, %v2591_v43 }
0x1bee   :  { %v2600_v47 = vsel %vm12_vm0, %v2594_v20, -inf  ;;  %v2592_v44 = vadd.f32 %v2588_v46, %v2540_v8 }
0x1bef   :  { %2601 = vmax.xlane.f32.xlu1 %v2600_v47  ;;  %v2603_v55 = vsel %vm12_vm0, %v2595_v48, -inf }
0x1bf0   :  { %2604 = vmax.xlane.f32.xlu0 %v2603_v55  ;;  %v2596_v51 = vsub.f32 %v4092_v40, %v2592_v44 }
0x1bf2   :  { %v2606_v49 = vsel %vm12_vm0, %v2596_v51, -inf }
0x1bf3   :  { %2607 = vmax.xlane.f32.xlu1 %v2606_v49 }
0x1c78   :  { %v2599_v50 = vpop.xlane.xlu0 %2598 }
0x1c79   :  { %v2609_v58 = vsub.f32 %v2593_v12, %v2599_v50 }
0x1c7b   :  { %v2613_v59 = vmul.f32 1.442695, %v2609_v58 }
0x1c7c   :  { %v2602_v63 = vpop.xlane.xlu1 %2601 }
0x1c7d   :  { %3357 = vpow2.f32 %v2613_v59  ;;  %v2610_v52 = vsub.f32 %v2594_v20, %v2602_v63  ;;  %v2605_v62 = vpop.xlane.xlu0 %2604 }
0x1c7e   :  { %v2611_v4 = vsub.f32 %v2595_v48, %v2605_v62 }
0x1c7f   :  { %v2615_v3 = vmul.f32 1.442695, %v2610_v52 }
0x1c80   :  { %v2617_v9 = vmul.f32 1.442695, %v2611_v4  ;;  %v2608_v8 = vpop.xlane.xlu1 %2607 }
0x1c81   :  { %3359 = vpow2.f32 %v2615_v3  ;;  %v2612_v38 = vsub.f32 %v2596_v51, %v2608_v8 }
0x1c82   :  { %3361 = vpow2.f32 %v2617_v9 }
0x1c83   :  { %v2619_v39 = vmul.f32 1.442695, %v2612_v38 }
0x1c85   :  { %3363 = vpow2.f32 %v2619_v39 }
0x1c87   :  { %v3358_v40 = vpop.eup %3357 }
0x1c88   :  { %v2621_v21 = vsel %vm12_vm0, %v3358_v40, 0.0 }
0x1c89   :  { %2622 = vadd.xlane.f32.xlu0 %v2621_v21 }
0x1c8b   :  { %v3360_v22 = vpop.eup %3359 }
0x1c8c   :  { %v3362_v23 = vpop.eup %3361  ;;  %v2624_v24 = vsel %vm12_vm0, %v3360_v22, 0.0 }
0x1c8d   :  { %2625 = vadd.xlane.f32.xlu1 %v2624_v24  ;;  %v2627_v25 = vsel %vm12_vm0, %v3362_v23, 0.0 }
0x1c8e   :  { %2628 = vadd.xlane.f32.xlu0 %v2627_v25 }
0x1c8f   :  { %v3364_v26 = vpop.eup %3363 }
0x1c90   :  { %v2630_v27 = vsel %vm12_vm0, %v3364_v26, 0.0 }
0x1c91   :  { %2631 = vadd.xlane.f32.xlu1 %v2630_v27 }
0x1d16   :  { %v2623_v28 = vpop.xlane.xlu0 %2622 }
0x1d17   :  { %3365 = vlog2.f32 %v2623_v28 }
0x1d1a   :  { %v2626_v29 = vpop.xlane.xlu1 %2625 }
0x1d1b   :  { %3367 = vlog2.f32 %v2626_v29  ;;  %v2629_v30 = vpop.xlane.xlu0 %2628 }
0x1d1c   :  { %3369 = vlog2.f32 %v2629_v30 }
0x1d1e   :  { %v2632_v31 = vpop.xlane.xlu1 %2631 }
0x1d1f   :  { %3371 = vlog2.f32 %v2632_v31 }
0x1d21   :  { %v3366_v32 = vpop.eup %3365 }
0x1d22   :  { %v2634_v33 = vmul.f32 0.6931472, %v3366_v32 }
0x1d24   :  { %v2641_v34 = vadd.f32 %v2634_v33, %v2599_v50 }
0x1d25   :  { %v3368_v35 = vpop.eup %3367 }
0x1d26   :  { %v3370_v36 = vpop.eup %3369  ;;  %v4116_v54 = vsub.f32 %v2593_v12, %v2641_v34  ;;  %v2636_v53 = vmul.f32 0.6931472, %v3368_v35 }
0x1d27   :  { %v2638_v57 = vmul.f32 0.6931472, %v3370_v36 }
0x1d28   :  { %v2649_v61 = vsel %vm12_vm0, %v4116_v54, -inf  ;;  %v2642_v2 = vadd.f32 %v2636_v53, %v2602_v63 }
0x1d29   :  { %v3372_v5 = vpop.eup %3371  ;;  %v2650_v37 = vrot.slane %v2649_v61, 4  ;;  %v2643_v13 = vadd.f32 %v2638_v57, %v2605_v62 }
0x1d2a   :  { %v4120_v56 = vsub.f32 %v2594_v20, %v2642_v2  ;;  %v2640_v15 = vmul.f32 0.6931472, %v3372_v5 }
0x1d2b   :  { %v2651_v60 = vmax.f32 %v2649_v61, %v2650_v37  ;;  %v4122_v0 = vsub.f32 %v2595_v48, %v2643_v13 }
0x1d2c   :  { %v2656_v17 = vsel %vm12_vm0, %v4120_v56, -inf  ;;  %v2644_v1 = vadd.f32 %v2640_v15, %v2608_v8 }
0x1d2d   :  { %v2652_v6 = vrot.slane %v2651_v60, 2  ;;  %v2657_v16 = vrot.slane %v2656_v17, 4  ;;  %v2663_v7 = vsel %vm12_vm0, %v4122_v0, -inf }
0x1d2e   :  { %v2664_v10 = vrot.slane %v2663_v7, 4  ;;  %v4128_v41 = vsub.f32 %v2596_v51, %v2644_v1 }
0x1d2f   :  { %v2653_v18 = vmax.f32 %v2651_v60, %v2652_v6  ;;  %v2658_v12 = vmax.f32 %v2656_v17, %v2657_v16 }
0x1d30   :  { %v2665_v11 = vmax.f32 %v2663_v7, %v2664_v10  ;;  %v2670_v42 = vsel %vm12_vm0, %v4128_v41, -inf }
0x1d31   :  { %v2654_v19 = vrot.slane %v2653_v18, 1  ;;  %v2659_v45 = vrot.slane %v2658_v12, 2  ;;  %v2671_v14 = vrot.slane %v2670_v42, 4 }
0x1d32   :  { %v2666_v43 = vrot.slane %v2665_v11, 2 }
0x1d33   :  { %v2655_v20 = vmax.f32 %v2653_v18, %v2654_v19  ;;  %v2660_v46 = vmax.f32 %v2658_v12, %v2659_v45  ;;  %v2672_v48 = vmax.f32 %v2670_v42, %v2671_v14 }
0x1d34   :  { %v2667_v47 = vmax.f32 %v2665_v11, %v2666_v43 }
0x1d35   :  { %v2677_v44 = vsub.f32 %v4116_v54, %v2655_v20  ;;  %v2661_v55 = vrot.slane %v2660_v46, 1  ;;  %v2673_v49 = vrot.slane %v2672_v48, 2 }
0x1d36   :  { %v2668_v51 = vrot.slane %v2667_v47, 1 }
0x1d37   :  { %v2681_v50 = vmul.f32 1.442695, %v2677_v44  ;;  %v2662_v58 = vmax.f32 %v2660_v46, %v2661_v55  ;;  %v2674_v59 = vmax.f32 %v2672_v48, %v2673_v49 }
0x1d38   :  { %v2669_v63 = vmax.f32 %v2667_v47, %v2668_v51 }
0x1d39   :  { %3373 = vpow2.f32 %v2681_v50  ;;  %v2678_v52 = vsub.f32 %v4120_v56, %v2662_v58  ;;  %v2675_v62 = vrot.slane %v2674_v59, 1 }
0x1d3a   :  { %v2679_v4 = vsub.f32 %v4122_v0, %v2669_v63 }
0x1d3b   :  { %v2683_v3 = vmul.f32 1.442695, %v2678_v52  ;;  %v2676_v9 = vmax.f32 %v2674_v59, %v2675_v62 }
0x1d3c   :  { %v2685_v8 = vmul.f32 1.442695, %v2679_v4 }
0x1d3d   :  { %3375 = vpow2.f32 %v2683_v3  ;;  %v2680_v38 = vsub.f32 %v4128_v41, %v2676_v9 }
0x1d3e   :  { %3377 = vpow2.f32 %v2685_v8 }
0x1d3f   :  { %v2687_v39 = vmul.f32 1.442695, %v2680_v38 }
0x1d41   :  { %3379 = vpow2.f32 %v2687_v39 }
0x1d43   :  { %v3374_v40 = vpop.eup %3373 }
0x1d44   :  { %v2689_v21 = vsel %vm12_vm0, %v3374_v40, 0.0 }
0x1d45   :  { %v2690_v22 = vrot.slane %v2689_v21, 4 }
0x1d47   :  { %v3376_v23 = vpop.eup %3375  ;;  %v2691_v24 = vadd.f32 %v2690_v22, %v2689_v21 }
0x1d48   :  { %v3378_v25 = vpop.eup %3377  ;;  %v2696_v26 = vsel %vm12_vm0, %v3376_v23, 0.0 }
0x1d49   :  { %v2692_v27 = vrot.slane %v2691_v24, 2  ;;  %v2697_v28 = vrot.slane %v2696_v26, 4  ;;  %v2703_v29 = vsel %vm12_vm0, %v3378_v25, 0.0 }
0x1d4a   :  { %v2704_v30 = vrot.slane %v2703_v29, 4 }
0x1d4b   :  { %v3380_v31 = vpop.eup %3379  ;;  %v2693_v32 = vadd.f32 %v2692_v27, %v2691_v24  ;;  %v2698_v33 = vadd.f32 %v2697_v28, %v2696_v26 }
0x1d4c   :  { %v2705_v34 = vadd.f32 %v2704_v30, %v2703_v29  ;;  %v2710_v35 = vsel %vm12_vm0, %v3380_v31, 0.0 }
0x1d4d   :  { %v2694_v36 = vrot.slane %v2693_v32, 1  ;;  %v2699_v53 = vrot.slane %v2698_v33, 2  ;;  %v2711_v57 = vrot.slane %v2710_v35, 4 }
0x1d4e   :  { %v2706_v61 = vrot.slane %v2705_v34, 2 }
0x1d4f   :  { %v2695_v2 = vadd.f32 %v2694_v36, %v2693_v32  ;;  %v2700_v5 = vadd.f32 %v2699_v53, %v2698_v33  ;;  %v2712_v37 = vadd.f32 %v2711_v57, %v2710_v35 }
0x1d50   :  { %v2707_v13 = vadd.f32 %v2706_v61, %v2705_v34 }
0x1d51   :  { %3381 = vlog2.f32 %v2695_v2  ;;  %v2701_v15 = vrot.slane %v2700_v5, 1  ;;  %v2713_v60 = vrot.slane %v2712_v37, 2 }
0x1d52   :  { %v2708_v17 = vrot.slane %v2707_v13, 1 }
0x1d53   :  { %v2702_v1 = vadd.f32 %v2701_v15, %v2700_v5  ;;  %v2714_v6 = vadd.f32 %v2713_v60, %v2712_v37 }
0x1d54   :  { %v2709_v16 = vadd.f32 %v2708_v17, %v2707_v13 }
0x1d55   :  { %3383 = vlog2.f32 %v2702_v1  ;;  %v2715_v7 = vrot.slane %v2714_v6, 1 }
0x1d56   :  { %3385 = vlog2.f32 %v2709_v16 }
0x1d57   :  { %v2716_v10 = vadd.f32 %v2715_v7, %v2714_v6 }
0x1d59   :  { %3387 = vlog2.f32 %v2716_v10 }
0x1d5b   :  { %v3382_v18 = vpop.eup %3381 }
0x1d5c   :  { %v2718_v12 = vmul.f32 0.6931472, %v3382_v18 }
0x1d5e   :  { %v2725_v11 = vadd.f32 %v2718_v12, %v2655_v20 }
0x1d5f   :  { %v3384_v42 = vpop.eup %3383 }
0x1d60   :  { %v3386_v19 = vpop.eup %3385  ;;  %v2729_v45 = vsub.f32 %v4116_v54, %v2725_v11  ;;  %v2720_v14 = vmul.f32 0.6931472, %v3384_v42 }
0x1d61   :  { %v2722_v43 = vmul.f32 0.6931472, %v3386_v19 }
0x1d62   :  { %v2733_v46 = vmul.f32 1.442695, %v2729_v45  ;;  %v2726_v48 = vadd.f32 %v2720_v14, %v2662_v58 }
0x1d63   :  { %v3388_v47 = vpop.eup %3387  ;;  %v2727_v44 = vadd.f32 %v2722_v43, %v2669_v63 }
0x1d64   :  { %3389 = vpow2.f32 %v2733_v46  ;;  %v2730_v55 = vsub.f32 %v4120_v56, %v2726_v48  ;;  %v2724_v49 = vmul.f32 0.6931472, %v3388_v47 }
0x1d65   :  { %v2731_v51 = vsub.f32 %v4122_v0, %v2727_v44 }
0x1d66   :  { %v2735_v50 = vmul.f32 1.442695, %v2730_v55  ;;  %v2728_v59 = vadd.f32 %v2724_v49, %v2676_v9 }
0x1d67   :  { %v2737_v52 = vmul.f32 1.442695, %v2731_v51 }
0x1d68   :  { %3391 = vpow2.f32 %v2735_v50  ;;  %v2732_v20 = vsub.f32 %v4128_v41, %v2728_v59 }
0x1d69   :  { %3393 = vpow2.f32 %v2737_v52 }
0x1d6a   :  { %v2739_v54 = vmul.f32 1.442695, %v2732_v20 }
0x1d6c   :  { %3395 = vpow2.f32 %v2739_v54 }
0x1d6e   :  { %v3390_v62 = vpop.eup %3389 }
0x1d6f   :  { %2741 = vst.msk [vmem:[%s4161_s1] sm:$0xff] %vm12_vm0, %v3390_v62 }
0x1d72   :  { %v3392_v58 = vpop.eup %3391 }
0x1d73   :  { %v3394_v56 = vpop.eup %3393  ;;  %2742 = vst.msk [vmem:[%s4161_s1 + $0x8] sm:$0xff] %vm12_vm0, %v3392_v58 }
0x1d74   :  { %2743 = vst.msk [vmem:[%s4161_s1 + $0x10] sm:$0xff] %vm12_vm0, %v3394_v56 }
0x1d76   :  { %v3396_v0 = vpop.eup %3395 }
0x1d77   :  { %2744 = vst.msk [vmem:[%s4161_s1 + $0x18] sm:$0xff] %vm12_vm0, %v3396_v0 }

</bundles_post_ra>
